<compile_context>
chip_gen: v5e
topology: v5e:2x2
jax: 0.10.0
libtpu: 0.0.40
codegen_flags: <defaults>
</compile_context>

<pallas_src>
from functools import partial

import jax
import jax.numpy as jnp
from jax import lax
from jax.experimental import pallas as pl
from jax.experimental.pallas import tpu as pltpu

_BN_EPS = 1e-5


def _round_up(n, m):
    return ((n + m - 1) // m) * m


# --------------------------------------------------------------------------------------
# Pallas kernel: one fused ConvLayer (conv1 + bias + ReLU -> conv2(3x3) + bias + ReLU)
# --------------------------------------------------------------------------------------
def conv_layer_kernel(zf_ref, w1_ref, b1_ref, w2_ref, b2_ref, o_ref, pad_ref,
                      *, ws, k1, ho, wo):
    """zf_ref : (1, Nf1, Cin)  flattened conv1 input, row stride ws (mult of 8), data starts
                               at column 1 (one extra left-shift column) -- one image.
       w1_ref : (k1*k1, Cin, Cout)  per-tap conv1 weights (BN folded)
       b1_ref : (1, Cout)
       w2_ref : (9, Cout, Cout)     per-tap conv2 weights (BN folded)
       b2_ref : (1, Cout)
       o_ref  : (1, ho*ws, Cout)    flattened conv2 output slab (wrapper crops valid cols)
       pad_ref: (Nf2, Cout) f32 scratch = zero-padded flattened conv2 input."""
    cout = o_ref.shape[-1]
    n = ho * ws                      # flat rows of both conv outputs
    nf2 = pad_ref.shape[0]

    # ---- conv1: k1*k1 shifted matmuls straight off the input ref (no full-value load) ----
    acc = None
    for dy in range(k1):
        for dx in range(k1):
            off = dy * ws + dx
            t = jnp.dot(zf_ref[0, off:off + n, :], w1_ref[dy * k1 + dx],
                        preferred_element_type=jnp.float32)
            acc = t if acc is None else acc + t
    h1 = jnp.maximum(acc + b1_ref[...], 0.0)

    # Valid conv1 outputs live in flat columns [1, wo]; zero everything else with ONE select
    # so the garbage columns double as the left/right zero-padding of the conv2 input.
    col = lax.broadcasted_iota(jnp.int32, (n, 1), 0) % ws
    h1 = jnp.where((col >= 1) & (col <= wo), h1, 0.0)

    # ---- re-embed: three aligned, unmasked stores (top border, bottom border, body) ----
    pad_ref[0:ws, :] = jnp.zeros((ws, cout), jnp.float32)
    pad_ref[(ho + 1) * ws:nf2, :] = jnp.zeros((nf2 - (ho + 1) * ws, cout), jnp.float32)
    pad_ref[ws:ws + n, :] = h1

    # ---- conv2: 3x3 stride-1, 9 shifted matmuls off the padded scratch ----
    acc2 = None
    for dy in range(3):
        for dx in range(3):
            off = dy * ws + dx
            t = jnp.dot(pad_ref[off:off + n, :], w2_ref[dy * 3 + dx],
                        preferred_element_type=jnp.float32)
            acc2 = t if acc2 is None else acc2 + t

    # ---- single full-slab store; wrapper crops the wo valid columns ----
    o_ref[0, :, :] = jnp.maximum(acc2 + b2_ref[...], 0.0).astype(o_ref.dtype)


def _vmem_estimate(nf1, cin, nf2, n_out, cout, k1):
    f = 4
    b = 2 * nf1 * cin * f                       # double-buffered input block
    b += 2 * n_out * cout * f                   # double-buffered output block
    b += 2 * f * (k1 * k1 * cin * cout + 9 * cout * cout + 2 * cout)   # weights/bias
    b += nf2 * cout * f                         # pad scratch
    b += 2 * n_out * cout * f                   # f32 accumulators held as values
    return b


def _run_conv_layer(zf, w1r, b1, w2r, b2, *, ws, k1, ho, wo, out_dtype):
    B, nf1, cin = zf.shape
    cout = w1r.shape[-1]
    nf2 = (ho + 2) * ws + 8
    n_out = ho * ws
    kern = partial(conv_layer_kernel, ws=ws, k1=k1, ho=ho, wo=wo)
    needed = 2 * _vmem_estimate(nf1, cin, nf2, n_out, cout, k1)
    vmem_limit = int(min(64 * 2**20, max(32 * 2**20, needed)))
    return pl.pallas_call(
        kern,
        out_shape=jax.ShapeDtypeStruct((B, n_out, cout), out_dtype),
        grid_spec=pltpu.PrefetchScalarGridSpec(
            num_scalar_prefetch=0,
            grid=(B,),
            in_specs=[
                pl.BlockSpec((1, nf1, cin), lambda b: (b, 0, 0)),
                pl.BlockSpec(w1r.shape, lambda b: (0, 0, 0)),
                pl.BlockSpec(b1.shape, lambda b: (0, 0)),
                pl.BlockSpec(w2r.shape, lambda b: (0, 0, 0)),
                pl.BlockSpec(b2.shape, lambda b: (0, 0)),
            ],
            out_specs=pl.BlockSpec((1, n_out, cout), lambda b: (b, 0, 0)),
            scratch_shapes=[pltpu.VMEM((nf2, cout), jnp.float32)],
        ),
        compiler_params=pltpu.CompilerParams(
            dimension_semantics=("parallel",),
            vmem_limit_bytes=vmem_limit,
        ),
    )(zf, w1r, b1, w2r, b2)


# --------------------------------------------------------------------------------------
# Host-side parameter folding / repacking
# --------------------------------------------------------------------------------------
def _fold_bn(w, b, gamma, beta, mean, var):
    """Fold inference-mode BatchNorm into the preceding conv. w: (Cout, Cin, K, K)."""
    scale = gamma / jnp.sqrt(var + _BN_EPS)
    w_eff = w * scale[:, None, None, None]
    b_eff = (b - mean) * scale + beta
    return w_eff, b_eff


def _taps_3x3(w_eff):
    """(Cout, Cin, 3, 3) -> (9, Cin, Cout) per-tap matrices (tap index = dy*3 + dx)."""
    cout, cin = w_eff.shape[:2]
    return jnp.transpose(w_eff, (2, 3, 1, 0)).reshape(9, cin, cout)


def _taps_7x7_s2(w_eff):
    """7x7 stride-2 conv weights (Cout, Cin, 7, 7) -> (16, 4*Cin, Cout) taps of the
    equivalent stride-1 4x4 conv on the space-to-depth(2) input."""
    cout, cin = w_eff.shape[:2]
    w = jnp.zeros((4, 4, 4 * cin, cout), w_eff.dtype)
    for qy in range(4):
        for qx in range(4):
            for ry in range(2):
                for rx in range(2):
                    dy, dx = 2 * qy + ry, 2 * qx + rx
                    if dy < 7 and dx < 7:
                        blk = (ry * 2 + rx) * cin
                        w = w.at[qy, qx, blk:blk + cin, :].set(w_eff[:, :, dy, dx].T)
    return w.reshape(16, 4 * cin, cout)


# --------------------------------------------------------------------------------------
# Wrapper: cheap layout / pooling steps between the per-stage Pallas calls
# --------------------------------------------------------------------------------------
def _prep_first_stage_input(x_nchw):
    """pad=3, space-to-depth(2), right-shift 1 col, flatten with row stride ws (mult of 8)."""
    B, C, H, W = x_nchw.shape
    ho, wo = H // 2, W // 2
    ws = _round_up(wo + 4, 8)
    x = jnp.transpose(x_nchw, (0, 2, 3, 1))                           # NHWC
    xp = jnp.pad(x, ((0, 0), (3, 3), (3, 3), (0, 0)))                 # (B, H+6, W+6, C)
    Hp, Wp = H + 6, W + 6
    z = xp.reshape(B, Hp // 2, 2, Wp // 2, 2, C)
    z = jnp.transpose(z, (0, 1, 3, 2, 4, 5)).reshape(B, Hp // 2, Wp // 2, 4 * C)
    z = jnp.pad(z, ((0, 0), (0, 0), (1, ws - (wo + 3) - 1), (0, 0)))  # shift + align width
    zf = z.reshape(B, (Hp // 2) * ws, 4 * C)
    zf = jnp.pad(zf, ((0, 0), (0, 8), (0, 0)))                        # tail slack for taps
    return zf, ws, ho, wo


def _prep_down_stage_input(feat_nhwc):
    """MaxPool2d(2), pad=1, right-shift 1 extra col, flatten with row stride ws (mult of 8)."""
    B, H, W, C = feat_nhwc.shape
    ho, wo = H // 2, W // 2
    ws = _round_up(wo + 3, 8)
    pooled = feat_nhwc.reshape(B, ho, 2, wo, 2, C).max(axis=(2, 4))
    pp = jnp.pad(pooled, ((0, 0), (1, 1), (2, ws - wo - 2), (0, 0)))
    zf = pp.reshape(B, (ho + 2) * ws, C)
    zf = jnp.pad(zf, ((0, 0), (0, 8), (0, 0)))
    return zf, ws, ho, wo


def encoder_forward(x_nchw, params):
    """Encoder.forward: returns the list of per-stage features in NCHW."""
    feats_nchw = []
    feat_nhwc = None
    out_dtype = x_nchw.dtype
    for stage, layer in enumerate(params):
        w1, b1 = _fold_bn(layer["conv1_w"], layer["conv1_b"], layer["conv1_gamma"],
                          layer["conv1_beta"], layer["conv1_mean"], layer["conv1_var"])
        w2, b2 = _fold_bn(layer["conv2_w"], layer["conv2_b"], layer["conv2_gamma"],
                          layer["conv2_beta"], layer["conv2_mean"], layer["conv2_var"])
        if stage == 0:
            zf, ws, ho, wo = _prep_first_stage_input(x_nchw)
            w1r, k1 = _taps_7x7_s2(w1), 4
        else:
            zf, ws, ho, wo = _prep_down_stage_input(feat_nhwc)
            w1r, k1 = _taps_3x3(w1), 3
        w2r = _taps_3x3(w2)
        cout = w1r.shape[-1]
        slab = _run_conv_layer(zf, w1r, b1.reshape(1, -1), w2r, b2.reshape(1, -1),
                               ws=ws, k1=k1, ho=ho, wo=wo, out_dtype=out_dtype)
        feat_nhwc = slab.reshape(slab.shape[0], ho, ws, cout)[:, :, :wo, :]
        feats_nchw.append(jnp.transpose(feat_nhwc, (0, 3, 1, 2)))
    return feats_nchw


# --------------------------------------------------------------------------------------
# Pure-JAX reference (mirrors the PyTorch module, inference-mode BatchNorm)
# --------------------------------------------------------------------------------------
def reference_encoder(x, params):
    def conv(x, w, b, stride, pad):
        y = lax.conv_general_dilated(x, w, (stride, stride), [(pad, pad), (pad, pad)],
                                     dimension_numbers=("NCHW", "OIHW", "NCHW"))
        return y + b.reshape(1, -1, 1, 1)

    def bn(x, g, bt, m, v):
        return ((x - m.reshape(1, -1, 1, 1)) / jnp.sqrt(v.reshape(1, -1, 1, 1) + _BN_EPS)
                * g.reshape(1, -1, 1, 1) + bt.reshape(1, -1, 1, 1))

    def conv_layer(x, layer, s1, p1):
        h = conv(x, layer["conv1_w"], layer["conv1_b"], s1, p1)
        h = jnp.maximum(bn(h, layer["conv1_gamma"], layer["conv1_beta"],
                           layer["conv1_mean"], layer["conv1_var"]), 0.0)
        h = conv(h, layer["conv2_w"], layer["conv2_b"], 1, 1)
        h = jnp.maximum(bn(h, layer["conv2_gamma"], layer["conv2_beta"],
                           layer["conv2_mean"], layer["conv2_var"]), 0.0)
        return h

    feats, h = [], x
    for stage, layer in enumerate(params):
        if stage == 0:
            h = conv_layer(h, layer, 2, 3)
        else:
            h = lax.reduce_window(h, -jnp.inf, lax.max, (1, 1, 2, 2), (1, 1, 2, 2), "VALID")
            h = conv_layer(h, layer, 1, 1)
        feats.append(h)
    return feats


# --------------------------------------------------------------------------------------
# Deterministic parameter construction + test
# --------------------------------------------------------------------------------------
def init_encoder_params(key, channels):
    specs = [(channels[0], channels[1], 7)]
    for in_c, out_c in zip(channels[1:], channels[2:]):
        specs.append((in_c, out_c, 3))
    params = []
    for in_c, out_c, k1 in specs:
        layer = {}
        for name, (ci, co, kk) in (("conv1", (in_c, out_c, k1)), ("conv2", (out_c, out_c, 3))):
            key, kw, kb, kg, kbt, km, kv = jax.random.split(key, 7)
            bound = 1.0 / (ci * kk * kk) ** 0.5
            layer[name + "_w"] = jax.random.uniform(kw, (co, ci, kk, kk), jnp.float32, -bound, bound)
            layer[name + "_b"] = jax.random.uniform(kb, (co,), jnp.float32, -bound, bound)
            layer[name + "_gamma"] = jax.random.uniform(kg, (co,), jnp.float32, 0.5, 1.5)
            layer[name + "_beta"] = 0.1 * jax.random.normal(kbt, (co,), jnp.float32)
            layer[name + "_mean"] = 0.1 * jax.random.normal(km, (co,), jnp.float32)
            layer[name + "_var"] = jax.random.uniform(kv, (co,), jnp.float32, 0.5, 1.5)
        params.append(layer)
    return params


if __name__ == "__main__":
    channels = (4, 8, 16, 32)          # Encoder(channels): 1 ConvLayer stage + 2 DownLayer stages
    B, H, W = 2, 16, 16

    key = jax.random.PRNGKey(0)
    kx, kp = jax.random.split(key)
    x = jax.random.normal(kx, (B, channels[0], H, W), dtype=jnp.float32)
    params = init_encoder_params(kp, channels)

    encoder_jit = jax.jit(encoder_forward)
    feats = encoder_jit(x, params)
    feats = jax.block_until_ready(feats)

    refs = reference_encoder(x, params)
    assert len(feats) == len(channels) - 1
    hw = H // 2
    for i, (f, r) in enumerate(zip(feats, refs)):
        assert f.shape == (B, channels[i + 1], hw, hw), (i, f.shape)
        err = float(jnp.max(jnp.abs(f - r)))
        assert err < 2e-4, (i, err)
        hw //= 2

    print("KERNEL_OK")
</pallas_src>

<mosaic_0001>
module attributes {stable_mosaic.version = 11 : i64} {
  func.func @conv_layer_kernel(%arg0: i32, %arg1: memref<1x184x16xf32, #tpu.memory_space<vmem>>, %arg2: memref<16x16x8xf32, #tpu.memory_space<vmem>>, %arg3: memref<1x8xf32, #tpu.memory_space<vmem>>, %arg4: memref<9x8x8xf32, #tpu.memory_space<vmem>>, %arg5: memref<1x8xf32, #tpu.memory_space<vmem>>, %arg6: memref<1x128x8xf32, #tpu.memory_space<vmem>>, %arg7: memref<168x8xf32, #tpu.memory_space<vmem>>) attributes {dimension_semantics = [#tpu.dimension_semantics<parallel>], iteration_bounds = array<i64: 2>, scalar_prefetch = 0 : i64, scratch_operands = 1 : i64, tpu.core_type = #tpu.core_type<tc>, window_params = [{transform_indices = @transform_0, window_bounds = array<i64: 1, 184, 16>}, {pipeline_mode = #tpu.pipeline_mode<synchronous>, transform_indices = @transform_1, window_bounds = array<i64: 16, 16, 8>}, {pipeline_mode = #tpu.pipeline_mode<synchronous>, transform_indices = @transform_2, window_bounds = array<i64: 1, 8>}, {pipeline_mode = #tpu.pipeline_mode<synchronous>, transform_indices = @transform_3, window_bounds = array<i64: 9, 8, 8>}, {pipeline_mode = #tpu.pipeline_mode<synchronous>, transform_indices = @transform_4, window_bounds = array<i64: 1, 8>}, {transform_indices = @transform_5, window_bounds = array<i64: 1, 128, 8>}]} {
    %c0 = arith.constant 0 : index
    %c0_0 = arith.constant 0 : index
    %c0_1 = arith.constant 0 : index
    %0 = vector.load %arg1[%c0, %c0_0, %c0_1] : memref<1x184x16xf32, #tpu.memory_space<vmem>>, vector<1x128x16xf32>
    %1 = vector.shape_cast %0 : vector<1x128x16xf32> to vector<128x16xf32>
    %c0_2 = arith.constant 0 : index
    %c0_3 = arith.constant 0 : index
    %c0_4 = arith.constant 0 : index
    %2 = vector.load %arg2[%c0_2, %c0_3, %c0_4] : memref<16x16x8xf32, #tpu.memory_space<vmem>>, vector<1x16x8xf32>
    %3 = vector.shape_cast %2 : vector<1x16x8xf32> to vector<16x8xf32>
    %cst = arith.constant dense<0.000000e+00> : vector<128x8xf32>
    %4 = tpu.matmul %1, %3, %cst {dimension_numbers = #tpu.dot_dimension_numbers<[1], [0], [0], [1], [0, 0, 1, 1], [], []>} : vector<128x16xf32>, vector<16x8xf32>, vector<128x8xf32> -> vector<128x8xf32>
    %c0_5 = arith.constant 0 : index
    %c1 = arith.constant 1 : index
    %c0_6 = arith.constant 0 : index
    %5 = vector.load %arg1[%c0_5, %c1, %c0_6] : memref<1x184x16xf32, #tpu.memory_space<vmem>>, vector<1x128x16xf32>
    %6 = vector.shape_cast %5 : vector<1x128x16xf32> to vector<128x16xf32>
    %c1_7 = arith.constant 1 : index
    %c0_8 = arith.constant 0 : index
    %c0_9 = arith.constant 0 : index
    %7 = vector.load %arg2[%c1_7, %c0_8, %c0_9] : memref<16x16x8xf32, #tpu.memory_space<vmem>>, vector<1x16x8xf32>
    %8 = vector.shape_cast %7 : vector<1x16x8xf32> to vector<16x8xf32>
    %cst_10 = arith.constant dense<0.000000e+00> : vector<128x8xf32>
    %9 = tpu.matmul %6, %8, %cst_10 {dimension_numbers = #tpu.dot_dimension_numbers<[1], [0], [0], [1], [0, 0, 1, 1], [], []>} : vector<128x16xf32>, vector<16x8xf32>, vector<128x8xf32> -> vector<128x8xf32>
    %10 = arith.addf %4, %9 : vector<128x8xf32>
    %c0_11 = arith.constant 0 : index
    %c2 = arith.constant 2 : index
    %c0_12 = arith.constant 0 : index
    %11 = vector.load %arg1[%c0_11, %c2, %c0_12] : memref<1x184x16xf32, #tpu.memory_space<vmem>>, vector<1x128x16xf32>
    %12 = vector.shape_cast %11 : vector<1x128x16xf32> to vector<128x16xf32>
    %c2_13 = arith.constant 2 : index
    %c0_14 = arith.constant 0 : index
    %c0_15 = arith.constant 0 : index
    %13 = vector.load %arg2[%c2_13, %c0_14, %c0_15] : memref<16x16x8xf32, #tpu.memory_space<vmem>>, vector<1x16x8xf32>
    %14 = vector.shape_cast %13 : vector<1x16x8xf32> to vector<16x8xf32>
    %cst_16 = arith.constant dense<0.000000e+00> : vector<128x8xf32>
    %15 = tpu.matmul %12, %14, %cst_16 {dimension_numbers = #tpu.dot_dimension_numbers<[1], [0], [0], [1], [0, 0, 1, 1], [], []>} : vector<128x16xf32>, vector<16x8xf32>, vector<128x8xf32> -> vector<128x8xf32>
    %16 = arith.addf %10, %15 : vector<128x8xf32>
    %c0_17 = arith.constant 0 : index
    %c3 = arith.constant 3 : index
    %c0_18 = arith.constant 0 : index
    %17 = vector.load %arg1[%c0_17, %c3, %c0_18] : memref<1x184x16xf32, #tpu.memory_space<vmem>>, vector<1x128x16xf32>
    %18 = vector.shape_cast %17 : vector<1x128x16xf32> to vector<128x16xf32>
    %c3_19 = arith.constant 3 : index
    %c0_20 = arith.constant 0 : index
    %c0_21 = arith.constant 0 : index
    %19 = vector.load %arg2[%c3_19, %c0_20, %c0_21] : memref<16x16x8xf32, #tpu.memory_space<vmem>>, vector<1x16x8xf32>
    %20 = vector.shape_cast %19 : vector<1x16x8xf32> to vector<16x8xf32>
    %cst_22 = arith.constant dense<0.000000e+00> : vector<128x8xf32>
    %21 = tpu.matmul %18, %20, %cst_22 {dimension_numbers = #tpu.dot_dimension_numbers<[1], [0], [0], [1], [0, 0, 1, 1], [], []>} : vector<128x16xf32>, vector<16x8xf32>, vector<128x8xf32> -> vector<128x8xf32>
    %22 = arith.addf %16, %21 : vector<128x8xf32>
    %c0_23 = arith.constant 0 : index
    %c16 = arith.constant 16 : index
    %c0_24 = arith.constant 0 : index
    %23 = vector.load %arg1[%c0_23, %c16, %c0_24] : memref<1x184x16xf32, #tpu.memory_space<vmem>>, vector<1x128x16xf32>
    %24 = vector.shape_cast %23 : vector<1x128x16xf32> to vector<128x16xf32>
    %c4 = arith.constant 4 : index
    %c0_25 = arith.constant 0 : index
    %c0_26 = arith.constant 0 : index
    %25 = vector.load %arg2[%c4, %c0_25, %c0_26] : memref<16x16x8xf32, #tpu.memory_space<vmem>>, vector<1x16x8xf32>
    %26 = vector.shape_cast %25 : vector<1x16x8xf32> to vector<16x8xf32>
    %cst_27 = arith.constant dense<0.000000e+00> : vector<128x8xf32>
    %27 = tpu.matmul %24, %26, %cst_27 {dimension_numbers = #tpu.dot_dimension_numbers<[1], [0], [0], [1], [0, 0, 1, 1], [], []>} : vector<128x16xf32>, vector<16x8xf32>, vector<128x8xf32> -> vector<128x8xf32>
    %28 = arith.addf %22, %27 : vector<128x8xf32>
    %c0_28 = arith.constant 0 : index
    %c17 = arith.constant 17 : index
    %c0_29 = arith.constant 0 : index
    %29 = vector.load %arg1[%c0_28, %c17, %c0_29] : memref<1x184x16xf32, #tpu.memory_space<vmem>>, vector<1x128x16xf32>
    %30 = vector.shape_cast %29 : vector<1x128x16xf32> to vector<128x16xf32>
    %c5 = arith.constant 5 : index
    %c0_30 = arith.constant 0 : index
    %c0_31 = arith.constant 0 : index
    %31 = vector.load %arg2[%c5, %c0_30, %c0_31] : memref<16x16x8xf32, #tpu.memory_space<vmem>>, vector<1x16x8xf32>
    %32 = vector.shape_cast %31 : vector<1x16x8xf32> to vector<16x8xf32>
    %cst_32 = arith.constant dense<0.000000e+00> : vector<128x8xf32>
    %33 = tpu.matmul %30, %32, %cst_32 {dimension_numbers = #tpu.dot_dimension_numbers<[1], [0], [0], [1], [0, 0, 1, 1], [], []>} : vector<128x16xf32>, vector<16x8xf32>, vector<128x8xf32> -> vector<128x8xf32>
    %34 = arith.addf %28, %33 : vector<128x8xf32>
    %c0_33 = arith.constant 0 : index
    %c18 = arith.constant 18 : index
    %c0_34 = arith.constant 0 : index
    %35 = vector.load %arg1[%c0_33, %c18, %c0_34] : memref<1x184x16xf32, #tpu.memory_space<vmem>>, vector<1x128x16xf32>
    %36 = vector.shape_cast %35 : vector<1x128x16xf32> to vector<128x16xf32>
    %c6 = arith.constant 6 : index
    %c0_35 = arith.constant 0 : index
    %c0_36 = arith.constant 0 : index
    %37 = vector.load %arg2[%c6, %c0_35, %c0_36] : memref<16x16x8xf32, #tpu.memory_space<vmem>>, vector<1x16x8xf32>
    %38 = vector.shape_cast %37 : vector<1x16x8xf32> to vector<16x8xf32>
    %cst_37 = arith.constant dense<0.000000e+00> : vector<128x8xf32>
    %39 = tpu.matmul %36, %38, %cst_37 {dimension_numbers = #tpu.dot_dimension_numbers<[1], [0], [0], [1], [0, 0, 1, 1], [], []>} : vector<128x16xf32>, vector<16x8xf32>, vector<128x8xf32> -> vector<128x8xf32>
    %40 = arith.addf %34, %39 : vector<128x8xf32>
    %c0_38 = arith.constant 0 : index
    %c19 = arith.constant 19 : index
    %c0_39 = arith.constant 0 : index
    %41 = vector.load %arg1[%c0_38, %c19, %c0_39] : memref<1x184x16xf32, #tpu.memory_space<vmem>>, vector<1x128x16xf32>
    %42 = vector.shape_cast %41 : vector<1x128x16xf32> to vector<128x16xf32>
    %c7 = arith.constant 7 : index
    %c0_40 = arith.constant 0 : index
    %c0_41 = arith.constant 0 : index
    %43 = vector.load %arg2[%c7, %c0_40, %c0_41] : memref<16x16x8xf32, #tpu.memory_space<vmem>>, vector<1x16x8xf32>
    %44 = vector.shape_cast %43 : vector<1x16x8xf32> to vector<16x8xf32>
    %cst_42 = arith.constant dense<0.000000e+00> : vector<128x8xf32>
    %45 = tpu.matmul %42, %44, %cst_42 {dimension_numbers = #tpu.dot_dimension_numbers<[1], [0], [0], [1], [0, 0, 1, 1], [], []>} : vector<128x16xf32>, vector<16x8xf32>, vector<128x8xf32> -> vector<128x8xf32>
    %46 = arith.addf %40, %45 : vector<128x8xf32>
    %c0_43 = arith.constant 0 : index
    %c32 = arith.constant 32 : index
    %c0_44 = arith.constant 0 : index
    %47 = vector.load %arg1[%c0_43, %c32, %c0_44] : memref<1x184x16xf32, #tpu.memory_space<vmem>>, vector<1x128x16xf32>
    %48 = vector.shape_cast %47 : vector<1x128x16xf32> to vector<128x16xf32>
    %c8 = arith.constant 8 : index
    %c0_45 = arith.constant 0 : index
    %c0_46 = arith.constant 0 : index
    %49 = vector.load %arg2[%c8, %c0_45, %c0_46] : memref<16x16x8xf32, #tpu.memory_space<vmem>>, vector<1x16x8xf32>
    %50 = vector.shape_cast %49 : vector<1x16x8xf32> to vector<16x8xf32>
    %cst_47 = arith.constant dense<0.000000e+00> : vector<128x8xf32>
    %51 = tpu.matmul %48, %50, %cst_47 {dimension_numbers = #tpu.dot_dimension_numbers<[1], [0], [0], [1], [0, 0, 1, 1], [], []>} : vector<128x16xf32>, vector<16x8xf32>, vector<128x8xf32> -> vector<128x8xf32>
    %52 = arith.addf %46, %51 : vector<128x8xf32>
    %c0_48 = arith.constant 0 : index
    %c33 = arith.constant 33 : index
    %c0_49 = arith.constant 0 : index
    %53 = vector.load %arg1[%c0_48, %c33, %c0_49] : memref<1x184x16xf32, #tpu.memory_space<vmem>>, vector<1x128x16xf32>
    %54 = vector.shape_cast %53 : vector<1x128x16xf32> to vector<128x16xf32>
    %c9 = arith.constant 9 : index
    %c0_50 = arith.constant 0 : index
    %c0_51 = arith.constant 0 : index
    %55 = vector.load %arg2[%c9, %c0_50, %c0_51] : memref<16x16x8xf32, #tpu.memory_space<vmem>>, vector<1x16x8xf32>
    %56 = vector.shape_cast %55 : vector<1x16x8xf32> to vector<16x8xf32>
    %cst_52 = arith.constant dense<0.000000e+00> : vector<128x8xf32>
    %57 = tpu.matmul %54, %56, %cst_52 {dimension_numbers = #tpu.dot_dimension_numbers<[1], [0], [0], [1], [0, 0, 1, 1], [], []>} : vector<128x16xf32>, vector<16x8xf32>, vector<128x8xf32> -> vector<128x8xf32>
    %58 = arith.addf %52, %57 : vector<128x8xf32>
    %c0_53 = arith.constant 0 : index
    %c34 = arith.constant 34 : index
    %c0_54 = arith.constant 0 : index
    %59 = vector.load %arg1[%c0_53, %c34, %c0_54] : memref<1x184x16xf32, #tpu.memory_space<vmem>>, vector<1x128x16xf32>
    %60 = vector.shape_cast %59 : vector<1x128x16xf32> to vector<128x16xf32>
    %c10 = arith.constant 10 : index
    %c0_55 = arith.constant 0 : index
    %c0_56 = arith.constant 0 : index
    %61 = vector.load %arg2[%c10, %c0_55, %c0_56] : memref<16x16x8xf32, #tpu.memory_space<vmem>>, vector<1x16x8xf32>
    %62 = vector.shape_cast %61 : vector<1x16x8xf32> to vector<16x8xf32>
    %cst_57 = arith.constant dense<0.000000e+00> : vector<128x8xf32>
    %63 = tpu.matmul %60, %62, %cst_57 {dimension_numbers = #tpu.dot_dimension_numbers<[1], [0], [0], [1], [0, 0, 1, 1], [], []>} : vector<128x16xf32>, vector<16x8xf32>, vector<128x8xf32> -> vector<128x8xf32>
    %64 = arith.addf %58, %63 : vector<128x8xf32>
    %c0_58 = arith.constant 0 : index
    %c35 = arith.constant 35 : index
    %c0_59 = arith.constant 0 : index
    %65 = vector.load %arg1[%c0_58, %c35, %c0_59] : memref<1x184x16xf32, #tpu.memory_space<vmem>>, vector<1x128x16xf32>
    %66 = vector.shape_cast %65 : vector<1x128x16xf32> to vector<128x16xf32>
    %c11 = arith.constant 11 : index
    %c0_60 = arith.constant 0 : index
    %c0_61 = arith.constant 0 : index
    %67 = vector.load %arg2[%c11, %c0_60, %c0_61] : memref<16x16x8xf32, #tpu.memory_space<vmem>>, vector<1x16x8xf32>
    %68 = vector.shape_cast %67 : vector<1x16x8xf32> to vector<16x8xf32>
    %cst_62 = arith.constant dense<0.000000e+00> : vector<128x8xf32>
    %69 = tpu.matmul %66, %68, %cst_62 {dimension_numbers = #tpu.dot_dimension_numbers<[1], [0], [0], [1], [0, 0, 1, 1], [], []>} : vector<128x16xf32>, vector<16x8xf32>, vector<128x8xf32> -> vector<128x8xf32>
    %70 = arith.addf %64, %69 : vector<128x8xf32>
    %c0_63 = arith.constant 0 : index
    %c48 = arith.constant 48 : index
    %c0_64 = arith.constant 0 : index
    %71 = vector.load %arg1[%c0_63, %c48, %c0_64] : memref<1x184x16xf32, #tpu.memory_space<vmem>>, vector<1x128x16xf32>
    %72 = vector.shape_cast %71 : vector<1x128x16xf32> to vector<128x16xf32>
    %c12 = arith.constant 12 : index
    %c0_65 = arith.constant 0 : index
    %c0_66 = arith.constant 0 : index
    %73 = vector.load %arg2[%c12, %c0_65, %c0_66] : memref<16x16x8xf32, #tpu.memory_space<vmem>>, vector<1x16x8xf32>
    %74 = vector.shape_cast %73 : vector<1x16x8xf32> to vector<16x8xf32>
    %cst_67 = arith.constant dense<0.000000e+00> : vector<128x8xf32>
    %75 = tpu.matmul %72, %74, %cst_67 {dimension_numbers = #tpu.dot_dimension_numbers<[1], [0], [0], [1], [0, 0, 1, 1], [], []>} : vector<128x16xf32>, vector<16x8xf32>, vector<128x8xf32> -> vector<128x8xf32>
    %76 = arith.addf %70, %75 : vector<128x8xf32>
    %c0_68 = arith.constant 0 : index
    %c49 = arith.constant 49 : index
    %c0_69 = arith.constant 0 : index
    %77 = vector.load %arg1[%c0_68, %c49, %c0_69] : memref<1x184x16xf32, #tpu.memory_space<vmem>>, vector<1x128x16xf32>
    %78 = vector.shape_cast %77 : vector<1x128x16xf32> to vector<128x16xf32>
    %c13 = arith.constant 13 : index
    %c0_70 = arith.constant 0 : index
    %c0_71 = arith.constant 0 : index
    %79 = vector.load %arg2[%c13, %c0_70, %c0_71] : memref<16x16x8xf32, #tpu.memory_space<vmem>>, vector<1x16x8xf32>
    %80 = vector.shape_cast %79 : vector<1x16x8xf32> to vector<16x8xf32>
    %cst_72 = arith.constant dense<0.000000e+00> : vector<128x8xf32>
    %81 = tpu.matmul %78, %80, %cst_72 {dimension_numbers = #tpu.dot_dimension_numbers<[1], [0], [0], [1], [0, 0, 1, 1], [], []>} : vector<128x16xf32>, vector<16x8xf32>, vector<128x8xf32> -> vector<128x8xf32>
    %82 = arith.addf %76, %81 : vector<128x8xf32>
    %c0_73 = arith.constant 0 : index
    %c50 = arith.constant 50 : index
    %c0_74 = arith.constant 0 : index
    %83 = vector.load %arg1[%c0_73, %c50, %c0_74] : memref<1x184x16xf32, #tpu.memory_space<vmem>>, vector<1x128x16xf32>
    %84 = vector.shape_cast %83 : vector<1x128x16xf32> to vector<128x16xf32>
    %c14 = arith.constant 14 : index
    %c0_75 = arith.constant 0 : index
    %c0_76 = arith.constant 0 : index
    %85 = vector.load %arg2[%c14, %c0_75, %c0_76] : memref<16x16x8xf32, #tpu.memory_space<vmem>>, vector<1x16x8xf32>
    %86 = vector.shape_cast %85 : vector<1x16x8xf32> to vector<16x8xf32>
    %cst_77 = arith.constant dense<0.000000e+00> : vector<128x8xf32>
    %87 = tpu.matmul %84, %86, %cst_77 {dimension_numbers = #tpu.dot_dimension_numbers<[1], [0], [0], [1], [0, 0, 1, 1], [], []>} : vector<128x16xf32>, vector<16x8xf32>, vector<128x8xf32> -> vector<128x8xf32>
    %88 = arith.addf %82, %87 : vector<128x8xf32>
    %c0_78 = arith.constant 0 : index
    %c51 = arith.constant 51 : index
    %c0_79 = arith.constant 0 : index
    %89 = vector.load %arg1[%c0_78, %c51, %c0_79] : memref<1x184x16xf32, #tpu.memory_space<vmem>>, vector<1x128x16xf32>
    %90 = vector.shape_cast %89 : vector<1x128x16xf32> to vector<128x16xf32>
    %c15 = arith.constant 15 : index
    %c0_80 = arith.constant 0 : index
    %c0_81 = arith.constant 0 : index
    %91 = vector.load %arg2[%c15, %c0_80, %c0_81] : memref<16x16x8xf32, #tpu.memory_space<vmem>>, vector<1x16x8xf32>
    %92 = vector.shape_cast %91 : vector<1x16x8xf32> to vector<16x8xf32>
    %cst_82 = arith.constant dense<0.000000e+00> : vector<128x8xf32>
    %93 = tpu.matmul %90, %92, %cst_82 {dimension_numbers = #tpu.dot_dimension_numbers<[1], [0], [0], [1], [0, 0, 1, 1], [], []>} : vector<128x16xf32>, vector<16x8xf32>, vector<128x8xf32> -> vector<128x8xf32>
    %94 = arith.addf %88, %93 : vector<128x8xf32>
    %c0_83 = arith.constant 0 : index
    %c0_84 = arith.constant 0 : index
    %95 = vector.load %arg3[%c0_83, %c0_84] : memref<1x8xf32, #tpu.memory_space<vmem>>, vector<1x8xf32>
    %96 = vector.broadcast %95 : vector<1x8xf32> to vector<128x8xf32>
    %97 = arith.addf %94, %96 : vector<128x8xf32>
    %cst_85 = arith.constant 0.000000e+00 : f32
    %98 = vector.broadcast %cst_85 : f32 to vector<128x8xf32>
    %99 = arith.maximumf %97, %98 : vector<128x8xf32>
    %100 = tpu.iota {dimensions = array<i32: 0>} : vector<128x1xi32>
    %c16_i32 = arith.constant 16 : i32
    %c0_i32 = arith.constant 0 : i32
    %101 = arith.cmpi eq, %c16_i32, %c0_i32 : i32
    %c1_i32 = arith.constant 1 : i32
    %102 = arith.select %101, %c1_i32, %c16_i32 : i32
    %103 = vector.broadcast %102 : i32 to vector<128x1xi32>
    %104 = arith.remsi %100, %103 : vector<128x1xi32>
    %c0_i32_86 = arith.constant 0 : i32
    %105 = vector.broadcast %c0_i32_86 : i32 to vector<128x1xi32>
    %106 = arith.cmpi ne, %104, %105 : vector<128x1xi32>
    %c0_i32_87 = arith.constant 0 : i32
    %107 = vector.broadcast %c0_i32_87 : i32 to vector<128x1xi32>
    %108 = arith.cmpi slt, %104, %107 : vector<128x1xi32>
    %c0_i32_88 = arith.constant 0 : i32
    %109 = arith.cmpi slt, %102, %c0_i32_88 : i32
    %110 = vector.broadcast %109 : i1 to vector<128x1xi1>
    %111 = vector.broadcast %110 : vector<128x1xi1> to vector<128x1xi1>
    %112 = arith.xori %108, %111 : vector<128x1xi1>
    %113 = arith.andi %112, %106 : vector<128x1xi1>
    %114 = vector.broadcast %102 : i32 to vector<128x1xi32>
    %115 = arith.addi %104, %114 : vector<128x1xi32>
    %116 = arith.select %113, %115, %104 : vector<128x1xi1>, vector<128x1xi32>
    %c1_i32_89 = arith.constant 1 : i32
    %117 = vector.broadcast %c1_i32_89 : i32 to vector<128x1xi32>
    %118 = arith.cmpi sge, %116, %117 : vector<128x1xi32>
    %c8_i32 = arith.constant 8 : i32
    %119 = vector.broadcast %c8_i32 : i32 to vector<128x1xi32>
    %120 = arith.cmpi sle, %116, %119 : vector<128x1xi32>
    %121 = arith.andi %118, %120 : vector<128x1xi1>
    %cst_90 = arith.constant 0.000000e+00 : f32
    %122 = vector.shape_cast %121 : vector<128x1xi1> to vector<128x1xi1>
    %123 = vector.broadcast %122 : vector<128x1xi1> to vector<128x8xi1>
    %124 = vector.broadcast %cst_90 : f32 to vector<128x8xf32>
    %125 = arith.select %123, %99, %124 : vector<128x8xi1>, vector<128x8xf32>
    %cst_91 = arith.constant 0.000000e+00 : f32
    %126 = vector.broadcast %cst_91 : f32 to vector<16x8xf32>
    %c0_92 = arith.constant 0 : index
    %c0_93 = arith.constant 0 : index
    %127 = vector.load %arg7[%c0_92, %c0_93] : memref<168x8xf32, #tpu.memory_space<vmem>>, vector<16x8xf32>
    tpu.vector_store %arg7[%c0_92, %c0_93], %126 {strides = array<i32>} : memref<168x8xf32, #tpu.memory_space<vmem>>, vector<16x8xf32>,
    %cst_94 = arith.constant 0.000000e+00 : f32
    %128 = vector.broadcast %cst_94 : f32 to vector<24x8xf32>
    %c144 = arith.constant 144 : index
    %c0_95 = arith.constant 0 : index
    %129 = vector.load %arg7[%c144, %c0_95] : memref<168x8xf32, #tpu.memory_space<vmem>>, vector<24x8xf32>
    tpu.vector_store %arg7[%c144, %c0_95], %128 {strides = array<i32>} : memref<168x8xf32, #tpu.memory_space<vmem>>, vector<24x8xf32>,
    %c16_96 = arith.constant 16 : index
    %c0_97 = arith.constant 0 : index
    %130 = vector.load %arg7[%c16_96, %c0_97] : memref<168x8xf32, #tpu.memory_space<vmem>>, vector<128x8xf32>
    tpu.vector_store %arg7[%c16_96, %c0_97], %125 {strides = array<i32>} : memref<168x8xf32, #tpu.memory_space<vmem>>, vector<128x8xf32>,
    %c0_98 = arith.constant 0 : index
    %c0_99 = arith.constant 0 : index
    %131 = vector.load %arg7[%c0_98, %c0_99] : memref<168x8xf32, #tpu.memory_space<vmem>>, vector<128x8xf32>
    %c0_100 = arith.constant 0 : index
    %c0_101 = arith.constant 0 : index
    %c0_102 = arith.constant 0 : index
    %132 = vector.load %arg4[%c0_100, %c0_101, %c0_102] : memref<9x8x8xf32, #tpu.memory_space<vmem>>, vector<1x8x8xf32>
    %133 = vector.shape_cast %132 : vector<1x8x8xf32> to vector<8x8xf32>
    %cst_103 = arith.constant dense<0.000000e+00> : vector<128x8xf32>
    %134 = tpu.matmul %131, %133, %cst_103 {dimension_numbers = #tpu.dot_dimension_numbers<[1], [0], [0], [1], [0, 0, 1, 1], [], []>} : vector<128x8xf32>, vector<8x8xf32>, vector<128x8xf32> -> vector<128x8xf32>
    %c1_104 = arith.constant 1 : index
    %c0_105 = arith.constant 0 : index
    %135 = vector.load %arg7[%c1_104, %c0_105] : memref<168x8xf32, #tpu.memory_space<vmem>>, vector<128x8xf32>
    %c1_106 = arith.constant 1 : index
    %c0_107 = arith.constant 0 : index
    %c0_108 = arith.constant 0 : index
    %136 = vector.load %arg4[%c1_106, %c0_107, %c0_108] : memref<9x8x8xf32, #tpu.memory_space<vmem>>, vector<1x8x8xf32>
    %137 = vector.shape_cast %136 : vector<1x8x8xf32> to vector<8x8xf32>
    %cst_109 = arith.constant dense<0.000000e+00> : vector<128x8xf32>
    %138 = tpu.matmul %135, %137, %cst_109 {dimension_numbers = #tpu.dot_dimension_numbers<[1], [0], [0], [1], [0, 0, 1, 1], [], []>} : vector<128x8xf32>, vector<8x8xf32>, vector<128x8xf32> -> vector<128x8xf32>
    %139 = arith.addf %134, %138 : vector<128x8xf32>
    %c2_110 = arith.constant 2 : index
    %c0_111 = arith.constant 0 : index
    %140 = vector.load %arg7[%c2_110, %c0_111] : memref<168x8xf32, #tpu.memory_space<vmem>>, vector<128x8xf32>
    %c2_112 = arith.constant 2 : index
    %c0_113 = arith.constant 0 : index
    %c0_114 = arith.constant 0 : index
    %141 = vector.load %arg4[%c2_112, %c0_113, %c0_114] : memref<9x8x8xf32, #tpu.memory_space<vmem>>, vector<1x8x8xf32>
    %142 = vector.shape_cast %141 : vector<1x8x8xf32> to vector<8x8xf32>
    %cst_115 = arith.constant dense<0.000000e+00> : vector<128x8xf32>
    %143 = tpu.matmul %140, %142, %cst_115 {dimension_numbers = #tpu.dot_dimension_numbers<[1], [0], [0], [1], [0, 0, 1, 1], [], []>} : vector<128x8xf32>, vector<8x8xf32>, vector<128x8xf32> -> vector<128x8xf32>
    %144 = arith.addf %139, %143 : vector<128x8xf32>
    %c16_116 = arith.constant 16 : index
    %c0_117 = arith.constant 0 : index
    %145 = vector.load %arg7[%c16_116, %c0_117] : memref<168x8xf32, #tpu.memory_space<vmem>>, vector<128x8xf32>
    %c3_118 = arith.constant 3 : index
    %c0_119 = arith.constant 0 : index
    %c0_120 = arith.constant 0 : index
    %146 = vector.load %arg4[%c3_118, %c0_119, %c0_120] : memref<9x8x8xf32, #tpu.memory_space<vmem>>, vector<1x8x8xf32>
    %147 = vector.shape_cast %146 : vector<1x8x8xf32> to vector<8x8xf32>
    %cst_121 = arith.constant dense<0.000000e+00> : vector<128x8xf32>
    %148 = tpu.matmul %145, %147, %cst_121 {dimension_numbers = #tpu.dot_dimension_numbers<[1], [0], [0], [1], [0, 0, 1, 1], [], []>} : vector<128x8xf32>, vector<8x8xf32>, vector<128x8xf32> -> vector<128x8xf32>
    %149 = arith.addf %144, %148 : vector<128x8xf32>
    %c17_122 = arith.constant 17 : index
    %c0_123 = arith.constant 0 : index
    %150 = vector.load %arg7[%c17_122, %c0_123] : memref<168x8xf32, #tpu.memory_space<vmem>>, vector<128x8xf32>
    %c4_124 = arith.constant 4 : index
    %c0_125 = arith.constant 0 : index
    %c0_126 = arith.constant 0 : index
    %151 = vector.load %arg4[%c4_124, %c0_125, %c0_126] : memref<9x8x8xf32, #tpu.memory_space<vmem>>, vector<1x8x8xf32>
    %152 = vector.shape_cast %151 : vector<1x8x8xf32> to vector<8x8xf32>
    %cst_127 = arith.constant dense<0.000000e+00> : vector<128x8xf32>
    %153 = tpu.matmul %150, %152, %cst_127 {dimension_numbers = #tpu.dot_dimension_numbers<[1], [0], [0], [1], [0, 0, 1, 1], [], []>} : vector<128x8xf32>, vector<8x8xf32>, vector<128x8xf32> -> vector<128x8xf32>
    %154 = arith.addf %149, %153 : vector<128x8xf32>
    %c18_128 = arith.constant 18 : index
    %c0_129 = arith.constant 0 : index
    %155 = vector.load %arg7[%c18_128, %c0_129] : memref<168x8xf32, #tpu.memory_space<vmem>>, vector<128x8xf32>
    %c5_130 = arith.constant 5 : index
    %c0_131 = arith.constant 0 : index
    %c0_132 = arith.constant 0 : index
    %156 = vector.load %arg4[%c5_130, %c0_131, %c0_132] : memref<9x8x8xf32, #tpu.memory_space<vmem>>, vector<1x8x8xf32>
    %157 = vector.shape_cast %156 : vector<1x8x8xf32> to vector<8x8xf32>
    %cst_133 = arith.constant dense<0.000000e+00> : vector<128x8xf32>
    %158 = tpu.matmul %155, %157, %cst_133 {dimension_numbers = #tpu.dot_dimension_numbers<[1], [0], [0], [1], [0, 0, 1, 1], [], []>} : vector<128x8xf32>, vector<8x8xf32>, vector<128x8xf32> -> vector<128x8xf32>
    %159 = arith.addf %154, %158 : vector<128x8xf32>
    %c32_134 = arith.constant 32 : index
    %c0_135 = arith.constant 0 : index
    %160 = vector.load %arg7[%c32_134, %c0_135] : memref<168x8xf32, #tpu.memory_space<vmem>>, vector<128x8xf32>
    %c6_136 = arith.constant 6 : index
    %c0_137 = arith.constant 0 : index
    %c0_138 = arith.constant 0 : index
    %161 = vector.load %arg4[%c6_136, %c0_137, %c0_138] : memref<9x8x8xf32, #tpu.memory_space<vmem>>, vector<1x8x8xf32>
    %162 = vector.shape_cast %161 : vector<1x8x8xf32> to vector<8x8xf32>
    %cst_139 = arith.constant dense<0.000000e+00> : vector<128x8xf32>
    %163 = tpu.matmul %160, %162, %cst_139 {dimension_numbers = #tpu.dot_dimension_numbers<[1], [0], [0], [1], [0, 0, 1, 1], [], []>} : vector<128x8xf32>, vector<8x8xf32>, vector<128x8xf32> -> vector<128x8xf32>
    %164 = arith.addf %159, %163 : vector<128x8xf32>
    %c33_140 = arith.constant 33 : index
    %c0_141 = arith.constant 0 : index
    %165 = vector.load %arg7[%c33_140, %c0_141] : memref<168x8xf32, #tpu.memory_space<vmem>>, vector<128x8xf32>
    %c7_142 = arith.constant 7 : index
    %c0_143 = arith.constant 0 : index
    %c0_144 = arith.constant 0 : index
    %166 = vector.load %arg4[%c7_142, %c0_143, %c0_144] : memref<9x8x8xf32, #tpu.memory_space<vmem>>, vector<1x8x8xf32>
    %167 = vector.shape_cast %166 : vector<1x8x8xf32> to vector<8x8xf32>
    %cst_145 = arith.constant dense<0.000000e+00> : vector<128x8xf32>
    %168 = tpu.matmul %165, %167, %cst_145 {dimension_numbers = #tpu.dot_dimension_numbers<[1], [0], [0], [1], [0, 0, 1, 1], [], []>} : vector<128x8xf32>, vector<8x8xf32>, vector<128x8xf32> -> vector<128x8xf32>
    %169 = arith.addf %164, %168 : vector<128x8xf32>
    %c34_146 = arith.constant 34 : index
    %c0_147 = arith.constant 0 : index
    %170 = vector.load %arg7[%c34_146, %c0_147] : memref<168x8xf32, #tpu.memory_space<vmem>>, vector<128x8xf32>
    %c8_148 = arith.constant 8 : index
    %c0_149 = arith.constant 0 : index
    %c0_150 = arith.constant 0 : index
    %171 = vector.load %arg4[%c8_148, %c0_149, %c0_150] : memref<9x8x8xf32, #tpu.memory_space<vmem>>, vector<1x8x8xf32>
    %172 = vector.shape_cast %171 : vector<1x8x8xf32> to vector<8x8xf32>
    %cst_151 = arith.constant dense<0.000000e+00> : vector<128x8xf32>
    %173 = tpu.matmul %170, %172, %cst_151 {dimension_numbers = #tpu.dot_dimension_numbers<[1], [0], [0], [1], [0, 0, 1, 1], [], []>} : vector<128x8xf32>, vector<8x8xf32>, vector<128x8xf32> -> vector<128x8xf32>
    %174 = arith.addf %169, %173 : vector<128x8xf32>
    %c0_152 = arith.constant 0 : index
    %c0_153 = arith.constant 0 : index
    %175 = vector.load %arg5[%c0_152, %c0_153] : memref<1x8xf32, #tpu.memory_space<vmem>>, vector<1x8xf32>
    %176 = vector.broadcast %175 : vector<1x8xf32> to vector<128x8xf32>
    %177 = arith.addf %174, %176 : vector<128x8xf32>
    %cst_154 = arith.constant 0.000000e+00 : f32
    %178 = vector.broadcast %cst_154 : f32 to vector<128x8xf32>
    %179 = arith.maximumf %177, %178 : vector<128x8xf32>
    %c0_155 = arith.constant 0 : index
    %c0_156 = arith.constant 0 : index
    %c0_157 = arith.constant 0 : index
    %180 = vector.load %arg6[%c0_155, %c0_156, %c0_157] : memref<1x128x8xf32, #tpu.memory_space<vmem>>, vector<1x128x8xf32>
    %181 = vector.shape_cast %180 : vector<1x128x8xf32> to vector<128x8xf32>
    %182 = vector.shape_cast %179 : vector<128x8xf32> to vector<1x128x8xf32>
    tpu.vector_store %arg6[%c0_155, %c0_156, %c0_157], %182 {strides = array<i32>} : memref<1x128x8xf32, #tpu.memory_space<vmem>>, vector<1x128x8xf32>,
    return
  }
  func.func @transform_0(%arg0: i32) -> (i32, i32, i32) {
    %c0_i32 = arith.constant 0 : i32
    %c0_i32_0 = arith.constant 0 : i32
    %c0_i32_1 = arith.constant 0 : i32
    return %arg0, %c0_i32, %c0_i32_0 : i32, i32, i32
  }
  func.func @transform_1(%arg0: i32) -> (i32, i32, i32) {
    %c0_i32 = arith.constant 0 : i32
    %c0_i32_0 = arith.constant 0 : i32
    %c0_i32_1 = arith.constant 0 : i32
    %c0_i32_2 = arith.constant 0 : i32
    return %c0_i32, %c0_i32_0, %c0_i32_1 : i32, i32, i32
  }
  func.func @transform_2(%arg0: i32) -> (i32, i32) {
    %c0_i32 = arith.constant 0 : i32
    %c0_i32_0 = arith.constant 0 : i32
    %c0_i32_1 = arith.constant 0 : i32
    return %c0_i32, %c0_i32_0 : i32, i32
  }
  func.func @transform_3(%arg0: i32) -> (i32, i32, i32) {
    %c0_i32 = arith.constant 0 : i32
    %c0_i32_0 = arith.constant 0 : i32
    %c0_i32_1 = arith.constant 0 : i32
    %c0_i32_2 = arith.constant 0 : i32
    return %c0_i32, %c0_i32_0, %c0_i32_1 : i32, i32, i32
  }
  func.func @transform_4(%arg0: i32) -> (i32, i32) {
    %c0_i32 = arith.constant 0 : i32
    %c0_i32_0 = arith.constant 0 : i32
    %c0_i32_1 = arith.constant 0 : i32
    return %c0_i32, %c0_i32_0 : i32, i32
  }
  func.func @transform_5(%arg0: i32) -> (i32, i32, i32) {
    %c0_i32 = arith.constant 0 : i32
    %c0_i32_0 = arith.constant 0 : i32
    %c0_i32_1 = arith.constant 0 : i32
    return %arg0, %c0_i32, %c0_i32_0 : i32, i32, i32
  }
}

module attributes {stable_mosaic.version = 11 : i64} {
  func.func @conv_layer_kernel(%arg0: i32, %arg1: memref<1x56x8xf32, #tpu.memory_space<vmem>>, %arg2: memref<9x8x16xf32, #tpu.memory_space<vmem>>, %arg3: memref<1x16xf32, #tpu.memory_space<vmem>>, %arg4: memref<9x16x16xf32, #tpu.memory_space<vmem>>, %arg5: memref<1x16xf32, #tpu.memory_space<vmem>>, %arg6: memref<1x32x16xf32, #tpu.memory_space<vmem>>, %arg7: memref<56x16xf32, #tpu.memory_space<vmem>>) attributes {dimension_semantics = [#tpu.dimension_semantics<parallel>], iteration_bounds = array<i64: 2>, scalar_prefetch = 0 : i64, scratch_operands = 1 : i64, tpu.core_type = #tpu.core_type<tc>, window_params = [{transform_indices = @transform_0, window_bounds = array<i64: 1, 56, 8>}, {pipeline_mode = #tpu.pipeline_mode<synchronous>, transform_indices = @transform_1, window_bounds = array<i64: 9, 8, 16>}, {pipeline_mode = #tpu.pipeline_mode<synchronous>, transform_indices = @transform_2, window_bounds = array<i64: 1, 16>}, {pipeline_mode = #tpu.pipeline_mode<synchronous>, transform_indices = @transform_3, window_bounds = array<i64: 9, 16, 16>}, {pipeline_mode = #tpu.pipeline_mode<synchronous>, transform_indices = @transform_4, window_bounds = array<i64: 1, 16>}, {transform_indices = @transform_5, window_bounds = array<i64: 1, 32, 16>}]} {
    %c0 = arith.constant 0 : index
    %c0_0 = arith.constant 0 : index
    %c0_1 = arith.constant 0 : index
    %0 = vector.load %arg1[%c0, %c0_0, %c0_1] : memref<1x56x8xf32, #tpu.memory_space<vmem>>, vector<1x32x8xf32>
    %1 = vector.shape_cast %0 : vector<1x32x8xf32> to vector<32x8xf32>
    %c0_2 = arith.constant 0 : index
    %c0_3 = arith.constant 0 : index
    %c0_4 = arith.constant 0 : index
    %2 = vector.load %arg2[%c0_2, %c0_3, %c0_4] : memref<9x8x16xf32, #tpu.memory_space<vmem>>, vector<1x8x16xf32>
    %3 = vector.shape_cast %2 : vector<1x8x16xf32> to vector<8x16xf32>
    %cst = arith.constant dense<0.000000e+00> : vector<32x16xf32>
    %4 = tpu.matmul %1, %3, %cst {dimension_numbers = #tpu.dot_dimension_numbers<[1], [0], [0], [1], [0, 0, 1, 1], [], []>} : vector<32x8xf32>, vector<8x16xf32>, vector<32x16xf32> -> vector<32x16xf32>
    %c0_5 = arith.constant 0 : index
    %c1 = arith.constant 1 : index
    %c0_6 = arith.constant 0 : index
    %5 = vector.load %arg1[%c0_5, %c1, %c0_6] : memref<1x56x8xf32, #tpu.memory_space<vmem>>, vector<1x32x8xf32>
    %6 = vector.shape_cast %5 : vector<1x32x8xf32> to vector<32x8xf32>
    %c1_7 = arith.constant 1 : index
    %c0_8 = arith.constant 0 : index
    %c0_9 = arith.constant 0 : index
    %7 = vector.load %arg2[%c1_7, %c0_8, %c0_9] : memref<9x8x16xf32, #tpu.memory_space<vmem>>, vector<1x8x16xf32>
    %8 = vector.shape_cast %7 : vector<1x8x16xf32> to vector<8x16xf32>
    %cst_10 = arith.constant dense<0.000000e+00> : vector<32x16xf32>
    %9 = tpu.matmul %6, %8, %cst_10 {dimension_numbers = #tpu.dot_dimension_numbers<[1], [0], [0], [1], [0, 0, 1, 1], [], []>} : vector<32x8xf32>, vector<8x16xf32>, vector<32x16xf32> -> vector<32x16xf32>
    %10 = arith.addf %4, %9 : vector<32x16xf32>
    %c0_11 = arith.constant 0 : index
    %c2 = arith.constant 2 : index
    %c0_12 = arith.constant 0 : index
    %11 = vector.load %arg1[%c0_11, %c2, %c0_12] : memref<1x56x8xf32, #tpu.memory_space<vmem>>, vector<1x32x8xf32>
    %12 = vector.shape_cast %11 : vector<1x32x8xf32> to vector<32x8xf32>
    %c2_13 = arith.constant 2 : index
    %c0_14 = arith.constant 0 : index
    %c0_15 = arith.constant 0 : index
    %13 = vector.load %arg2[%c2_13, %c0_14, %c0_15] : memref<9x8x16xf32, #tpu.memory_space<vmem>>, vector<1x8x16xf32>
    %14 = vector.shape_cast %13 : vector<1x8x16xf32> to vector<8x16xf32>
    %cst_16 = arith.constant dense<0.000000e+00> : vector<32x16xf32>
    %15 = tpu.matmul %12, %14, %cst_16 {dimension_numbers = #tpu.dot_dimension_numbers<[1], [0], [0], [1], [0, 0, 1, 1], [], []>} : vector<32x8xf32>, vector<8x16xf32>, vector<32x16xf32> -> vector<32x16xf32>
    %16 = arith.addf %10, %15 : vector<32x16xf32>
    %c0_17 = arith.constant 0 : index
    %c8 = arith.constant 8 : index
    %c0_18 = arith.constant 0 : index
    %17 = vector.load %arg1[%c0_17, %c8, %c0_18] : memref<1x56x8xf32, #tpu.memory_space<vmem>>, vector<1x32x8xf32>
    %18 = vector.shape_cast %17 : vector<1x32x8xf32> to vector<32x8xf32>
    %c3 = arith.constant 3 : index
    %c0_19 = arith.constant 0 : index
    %c0_20 = arith.constant 0 : index
    %19 = vector.load %arg2[%c3, %c0_19, %c0_20] : memref<9x8x16xf32, #tpu.memory_space<vmem>>, vector<1x8x16xf32>
    %20 = vector.shape_cast %19 : vector<1x8x16xf32> to vector<8x16xf32>
    %cst_21 = arith.constant dense<0.000000e+00> : vector<32x16xf32>
    %21 = tpu.matmul %18, %20, %cst_21 {dimension_numbers = #tpu.dot_dimension_numbers<[1], [0], [0], [1], [0, 0, 1, 1], [], []>} : vector<32x8xf32>, vector<8x16xf32>, vector<32x16xf32> -> vector<32x16xf32>
    %22 = arith.addf %16, %21 : vector<32x16xf32>
    %c0_22 = arith.constant 0 : index
    %c9 = arith.constant 9 : index
    %c0_23 = arith.constant 0 : index
    %23 = vector.load %arg1[%c0_22, %c9, %c0_23] : memref<1x56x8xf32, #tpu.memory_space<vmem>>, vector<1x32x8xf32>
    %24 = vector.shape_cast %23 : vector<1x32x8xf32> to vector<32x8xf32>
    %c4 = arith.constant 4 : index
    %c0_24 = arith.constant 0 : index
    %c0_25 = arith.constant 0 : index
    %25 = vector.load %arg2[%c4, %c0_24, %c0_25] : memref<9x8x16xf32, #tpu.memory_space<vmem>>, vector<1x8x16xf32>
    %26 = vector.shape_cast %25 : vector<1x8x16xf32> to vector<8x16xf32>
    %cst_26 = arith.constant dense<0.000000e+00> : vector<32x16xf32>
    %27 = tpu.matmul %24, %26, %cst_26 {dimension_numbers = #tpu.dot_dimension_numbers<[1], [0], [0], [1], [0, 0, 1, 1], [], []>} : vector<32x8xf32>, vector<8x16xf32>, vector<32x16xf32> -> vector<32x16xf32>
    %28 = arith.addf %22, %27 : vector<32x16xf32>
    %c0_27 = arith.constant 0 : index
    %c10 = arith.constant 10 : index
    %c0_28 = arith.constant 0 : index
    %29 = vector.load %arg1[%c0_27, %c10, %c0_28] : memref<1x56x8xf32, #tpu.memory_space<vmem>>, vector<1x32x8xf32>
    %30 = vector.shape_cast %29 : vector<1x32x8xf32> to vector<32x8xf32>
    %c5 = arith.constant 5 : index
    %c0_29 = arith.constant 0 : index
    %c0_30 = arith.constant 0 : index
    %31 = vector.load %arg2[%c5, %c0_29, %c0_30] : memref<9x8x16xf32, #tpu.memory_space<vmem>>, vector<1x8x16xf32>
    %32 = vector.shape_cast %31 : vector<1x8x16xf32> to vector<8x16xf32>
    %cst_31 = arith.constant dense<0.000000e+00> : vector<32x16xf32>
    %33 = tpu.matmul %30, %32, %cst_31 {dimension_numbers = #tpu.dot_dimension_numbers<[1], [0], [0], [1], [0, 0, 1, 1], [], []>} : vector<32x8xf32>, vector<8x16xf32>, vector<32x16xf32> -> vector<32x16xf32>
    %34 = arith.addf %28, %33 : vector<32x16xf32>
    %c0_32 = arith.constant 0 : index
    %c16 = arith.constant 16 : index
    %c0_33 = arith.constant 0 : index
    %35 = vector.load %arg1[%c0_32, %c16, %c0_33] : memref<1x56x8xf32, #tpu.memory_space<vmem>>, vector<1x32x8xf32>
    %36 = vector.shape_cast %35 : vector<1x32x8xf32> to vector<32x8xf32>
    %c6 = arith.constant 6 : index
    %c0_34 = arith.constant 0 : index
    %c0_35 = arith.constant 0 : index
    %37 = vector.load %arg2[%c6, %c0_34, %c0_35] : memref<9x8x16xf32, #tpu.memory_space<vmem>>, vector<1x8x16xf32>
    %38 = vector.shape_cast %37 : vector<1x8x16xf32> to vector<8x16xf32>
    %cst_36 = arith.constant dense<0.000000e+00> : vector<32x16xf32>
    %39 = tpu.matmul %36, %38, %cst_36 {dimension_numbers = #tpu.dot_dimension_numbers<[1], [0], [0], [1], [0, 0, 1, 1], [], []>} : vector<32x8xf32>, vector<8x16xf32>, vector<32x16xf32> -> vector<32x16xf32>
    %40 = arith.addf %34, %39 : vector<32x16xf32>
    %c0_37 = arith.constant 0 : index
    %c17 = arith.constant 17 : index
    %c0_38 = arith.constant 0 : index
    %41 = vector.load %arg1[%c0_37, %c17, %c0_38] : memref<1x56x8xf32, #tpu.memory_space<vmem>>, vector<1x32x8xf32>
    %42 = vector.shape_cast %41 : vector<1x32x8xf32> to vector<32x8xf32>
    %c7 = arith.constant 7 : index
    %c0_39 = arith.constant 0 : index
    %c0_40 = arith.constant 0 : index
    %43 = vector.load %arg2[%c7, %c0_39, %c0_40] : memref<9x8x16xf32, #tpu.memory_space<vmem>>, vector<1x8x16xf32>
    %44 = vector.shape_cast %43 : vector<1x8x16xf32> to vector<8x16xf32>
    %cst_41 = arith.constant dense<0.000000e+00> : vector<32x16xf32>
    %45 = tpu.matmul %42, %44, %cst_41 {dimension_numbers = #tpu.dot_dimension_numbers<[1], [0], [0], [1], [0, 0, 1, 1], [], []>} : vector<32x8xf32>, vector<8x16xf32>, vector<32x16xf32> -> vector<32x16xf32>
    %46 = arith.addf %40, %45 : vector<32x16xf32>
    %c0_42 = arith.constant 0 : index
    %c18 = arith.constant 18 : index
    %c0_43 = arith.constant 0 : index
    %47 = vector.load %arg1[%c0_42, %c18, %c0_43] : memref<1x56x8xf32, #tpu.memory_space<vmem>>, vector<1x32x8xf32>
    %48 = vector.shape_cast %47 : vector<1x32x8xf32> to vector<32x8xf32>
    %c8_44 = arith.constant 8 : index
    %c0_45 = arith.constant 0 : index
    %c0_46 = arith.constant 0 : index
    %49 = vector.load %arg2[%c8_44, %c0_45, %c0_46] : memref<9x8x16xf32, #tpu.memory_space<vmem>>, vector<1x8x16xf32>
    %50 = vector.shape_cast %49 : vector<1x8x16xf32> to vector<8x16xf32>
    %cst_47 = arith.constant dense<0.000000e+00> : vector<32x16xf32>
    %51 = tpu.matmul %48, %50, %cst_47 {dimension_numbers = #tpu.dot_dimension_numbers<[1], [0], [0], [1], [0, 0, 1, 1], [], []>} : vector<32x8xf32>, vector<8x16xf32>, vector<32x16xf32> -> vector<32x16xf32>
    %52 = arith.addf %46, %51 : vector<32x16xf32>
    %c0_48 = arith.constant 0 : index
    %c0_49 = arith.constant 0 : index
    %53 = vector.load %arg3[%c0_48, %c0_49] : memref<1x16xf32, #tpu.memory_space<vmem>>, vector<1x16xf32>
    %54 = vector.broadcast %53 : vector<1x16xf32> to vector<32x16xf32>
    %55 = arith.addf %52, %54 : vector<32x16xf32>
    %cst_50 = arith.constant 0.000000e+00 : f32
    %56 = vector.broadcast %cst_50 : f32 to vector<32x16xf32>
    %57 = arith.maximumf %55, %56 : vector<32x16xf32>
    %58 = tpu.iota {dimensions = array<i32: 0>} : vector<32x1xi32>
    %c8_i32 = arith.constant 8 : i32
    %c0_i32 = arith.constant 0 : i32
    %59 = arith.cmpi eq, %c8_i32, %c0_i32 : i32
    %c1_i32 = arith.constant 1 : i32
    %60 = arith.select %59, %c1_i32, %c8_i32 : i32
    %61 = vector.broadcast %60 : i32 to vector<32x1xi32>
    %62 = arith.remsi %58, %61 : vector<32x1xi32>
    %c0_i32_51 = arith.constant 0 : i32
    %63 = vector.broadcast %c0_i32_51 : i32 to vector<32x1xi32>
    %64 = arith.cmpi ne, %62, %63 : vector<32x1xi32>
    %c0_i32_52 = arith.constant 0 : i32
    %65 = vector.broadcast %c0_i32_52 : i32 to vector<32x1xi32>
    %66 = arith.cmpi slt, %62, %65 : vector<32x1xi32>
    %c0_i32_53 = arith.constant 0 : i32
    %67 = arith.cmpi slt, %60, %c0_i32_53 : i32
    %68 = vector.broadcast %67 : i1 to vector<32x1xi1>
    %69 = vector.broadcast %68 : vector<32x1xi1> to vector<32x1xi1>
    %70 = arith.xori %66, %69 : vector<32x1xi1>
    %71 = arith.andi %70, %64 : vector<32x1xi1>
    %72 = vector.broadcast %60 : i32 to vector<32x1xi32>
    %73 = arith.addi %62, %72 : vector<32x1xi32>
    %74 = arith.select %71, %73, %62 : vector<32x1xi1>, vector<32x1xi32>
    %c1_i32_54 = arith.constant 1 : i32
    %75 = vector.broadcast %c1_i32_54 : i32 to vector<32x1xi32>
    %76 = arith.cmpi sge, %74, %75 : vector<32x1xi32>
    %c4_i32 = arith.constant 4 : i32
    %77 = vector.broadcast %c4_i32 : i32 to vector<32x1xi32>
    %78 = arith.cmpi sle, %74, %77 : vector<32x1xi32>
    %79 = arith.andi %76, %78 : vector<32x1xi1>
    %cst_55 = arith.constant 0.000000e+00 : f32
    %80 = vector.shape_cast %79 : vector<32x1xi1> to vector<32x1xi1>
    %81 = vector.broadcast %80 : vector<32x1xi1> to vector<32x16xi1>
    %82 = vector.broadcast %cst_55 : f32 to vector<32x16xf32>
    %83 = arith.select %81, %57, %82 : vector<32x16xi1>, vector<32x16xf32>
    %cst_56 = arith.constant 0.000000e+00 : f32
    %84 = vector.broadcast %cst_56 : f32 to vector<8x16xf32>
    %c0_57 = arith.constant 0 : index
    %c0_58 = arith.constant 0 : index
    %85 = vector.load %arg7[%c0_57, %c0_58] : memref<56x16xf32, #tpu.memory_space<vmem>>, vector<8x16xf32>
    tpu.vector_store %arg7[%c0_57, %c0_58], %84 {strides = array<i32>} : memref<56x16xf32, #tpu.memory_space<vmem>>, vector<8x16xf32>,
    %cst_59 = arith.constant 0.000000e+00 : f32
    %86 = vector.broadcast %cst_59 : f32 to vector<16x16xf32>
    %c40 = arith.constant 40 : index
    %c0_60 = arith.constant 0 : index
    %87 = vector.load %arg7[%c40, %c0_60] : memref<56x16xf32, #tpu.memory_space<vmem>>, vector<16x16xf32>
    tpu.vector_store %arg7[%c40, %c0_60], %86 {strides = array<i32>} : memref<56x16xf32, #tpu.memory_space<vmem>>, vector<16x16xf32>,
    %c8_61 = arith.constant 8 : index
    %c0_62 = arith.constant 0 : index
    %88 = vector.load %arg7[%c8_61, %c0_62] : memref<56x16xf32, #tpu.memory_space<vmem>>, vector<32x16xf32>
    tpu.vector_store %arg7[%c8_61, %c0_62], %83 {strides = array<i32>} : memref<56x16xf32, #tpu.memory_space<vmem>>, vector<32x16xf32>,
    %c0_63 = arith.constant 0 : index
    %c0_64 = arith.constant 0 : index
    %89 = vector.load %arg7[%c0_63, %c0_64] : memref<56x16xf32, #tpu.memory_space<vmem>>, vector<32x16xf32>
    %c0_65 = arith.constant 0 : index
    %c0_66 = arith.constant 0 : index
    %c0_67 = arith.constant 0 : index
    %90 = vector.load %arg4[%c0_65, %c0_66, %c0_67] : memref<9x16x16xf32, #tpu.memory_space<vmem>>, vector<1x16x16xf32>
    %91 = vector.shape_cast %90 : vector<1x16x16xf32> to vector<16x16xf32>
    %cst_68 = arith.constant dense<0.000000e+00> : vector<32x16xf32>
    %92 = tpu.matmul %89, %91, %cst_68 {dimension_numbers = #tpu.dot_dimension_numbers<[1], [0], [0], [1], [0, 0, 1, 1], [], []>} : vector<32x16xf32>, vector<16x16xf32>, vector<32x16xf32> -> vector<32x16xf32>
    %c1_69 = arith.constant 1 : index
    %c0_70 = arith.constant 0 : index
    %93 = vector.load %arg7[%c1_69, %c0_70] : memref<56x16xf32, #tpu.memory_space<vmem>>, vector<32x16xf32>
    %c1_71 = arith.constant 1 : index
    %c0_72 = arith.constant 0 : index
    %c0_73 = arith.constant 0 : index
    %94 = vector.load %arg4[%c1_71, %c0_72, %c0_73] : memref<9x16x16xf32, #tpu.memory_space<vmem>>, vector<1x16x16xf32>
    %95 = vector.shape_cast %94 : vector<1x16x16xf32> to vector<16x16xf32>
    %cst_74 = arith.constant dense<0.000000e+00> : vector<32x16xf32>
    %96 = tpu.matmul %93, %95, %cst_74 {dimension_numbers = #tpu.dot_dimension_numbers<[1], [0], [0], [1], [0, 0, 1, 1], [], []>} : vector<32x16xf32>, vector<16x16xf32>, vector<32x16xf32> -> vector<32x16xf32>
    %97 = arith.addf %92, %96 : vector<32x16xf32>
    %c2_75 = arith.constant 2 : index
    %c0_76 = arith.constant 0 : index
    %98 = vector.load %arg7[%c2_75, %c0_76] : memref<56x16xf32, #tpu.memory_space<vmem>>, vector<32x16xf32>
    %c2_77 = arith.constant 2 : index
    %c0_78 = arith.constant 0 : index
    %c0_79 = arith.constant 0 : index
    %99 = vector.load %arg4[%c2_77, %c0_78, %c0_79] : memref<9x16x16xf32, #tpu.memory_space<vmem>>, vector<1x16x16xf32>
    %100 = vector.shape_cast %99 : vector<1x16x16xf32> to vector<16x16xf32>
    %cst_80 = arith.constant dense<0.000000e+00> : vector<32x16xf32>
    %101 = tpu.matmul %98, %100, %cst_80 {dimension_numbers = #tpu.dot_dimension_numbers<[1], [0], [0], [1], [0, 0, 1, 1], [], []>} : vector<32x16xf32>, vector<16x16xf32>, vector<32x16xf32> -> vector<32x16xf32>
    %102 = arith.addf %97, %101 : vector<32x16xf32>
    %c8_81 = arith.constant 8 : index
    %c0_82 = arith.constant 0 : index
    %103 = vector.load %arg7[%c8_81, %c0_82] : memref<56x16xf32, #tpu.memory_space<vmem>>, vector<32x16xf32>
    %c3_83 = arith.constant 3 : index
    %c0_84 = arith.constant 0 : index
    %c0_85 = arith.constant 0 : index
    %104 = vector.load %arg4[%c3_83, %c0_84, %c0_85] : memref<9x16x16xf32, #tpu.memory_space<vmem>>, vector<1x16x16xf32>
    %105 = vector.shape_cast %104 : vector<1x16x16xf32> to vector<16x16xf32>
    %cst_86 = arith.constant dense<0.000000e+00> : vector<32x16xf32>
    %106 = tpu.matmul %103, %105, %cst_86 {dimension_numbers = #tpu.dot_dimension_numbers<[1], [0], [0], [1], [0, 0, 1, 1], [], []>} : vector<32x16xf32>, vector<16x16xf32>, vector<32x16xf32> -> vector<32x16xf32>
    %107 = arith.addf %102, %106 : vector<32x16xf32>
    %c9_87 = arith.constant 9 : index
    %c0_88 = arith.constant 0 : index
    %108 = vector.load %arg7[%c9_87, %c0_88] : memref<56x16xf32, #tpu.memory_space<vmem>>, vector<32x16xf32>
    %c4_89 = arith.constant 4 : index
    %c0_90 = arith.constant 0 : index
    %c0_91 = arith.constant 0 : index
    %109 = vector.load %arg4[%c4_89, %c0_90, %c0_91] : memref<9x16x16xf32, #tpu.memory_space<vmem>>, vector<1x16x16xf32>
    %110 = vector.shape_cast %109 : vector<1x16x16xf32> to vector<16x16xf32>
    %cst_92 = arith.constant dense<0.000000e+00> : vector<32x16xf32>
    %111 = tpu.matmul %108, %110, %cst_92 {dimension_numbers = #tpu.dot_dimension_numbers<[1], [0], [0], [1], [0, 0, 1, 1], [], []>} : vector<32x16xf32>, vector<16x16xf32>, vector<32x16xf32> -> vector<32x16xf32>
    %112 = arith.addf %107, %111 : vector<32x16xf32>
    %c10_93 = arith.constant 10 : index
    %c0_94 = arith.constant 0 : index
    %113 = vector.load %arg7[%c10_93, %c0_94] : memref<56x16xf32, #tpu.memory_space<vmem>>, vector<32x16xf32>
    %c5_95 = arith.constant 5 : index
    %c0_96 = arith.constant 0 : index
    %c0_97 = arith.constant 0 : index
    %114 = vector.load %arg4[%c5_95, %c0_96, %c0_97] : memref<9x16x16xf32, #tpu.memory_space<vmem>>, vector<1x16x16xf32>
    %115 = vector.shape_cast %114 : vector<1x16x16xf32> to vector<16x16xf32>
    %cst_98 = arith.constant dense<0.000000e+00> : vector<32x16xf32>
    %116 = tpu.matmul %113, %115, %cst_98 {dimension_numbers = #tpu.dot_dimension_numbers<[1], [0], [0], [1], [0, 0, 1, 1], [], []>} : vector<32x16xf32>, vector<16x16xf32>, vector<32x16xf32> -> vector<32x16xf32>
    %117 = arith.addf %112, %116 : vector<32x16xf32>
    %c16_99 = arith.constant 16 : index
    %c0_100 = arith.constant 0 : index
    %118 = vector.load %arg7[%c16_99, %c0_100] : memref<56x16xf32, #tpu.memory_space<vmem>>, vector<32x16xf32>
    %c6_101 = arith.constant 6 : index
    %c0_102 = arith.constant 0 : index
    %c0_103 = arith.constant 0 : index
    %119 = vector.load %arg4[%c6_101, %c0_102, %c0_103] : memref<9x16x16xf32, #tpu.memory_space<vmem>>, vector<1x16x16xf32>
    %120 = vector.shape_cast %119 : vector<1x16x16xf32> to vector<16x16xf32>
    %cst_104 = arith.constant dense<0.000000e+00> : vector<32x16xf32>
    %121 = tpu.matmul %118, %120, %cst_104 {dimension_numbers = #tpu.dot_dimension_numbers<[1], [0], [0], [1], [0, 0, 1, 1], [], []>} : vector<32x16xf32>, vector<16x16xf32>, vector<32x16xf32> -> vector<32x16xf32>
    %122 = arith.addf %117, %121 : vector<32x16xf32>
    %c17_105 = arith.constant 17 : index
    %c0_106 = arith.constant 0 : index
    %123 = vector.load %arg7[%c17_105, %c0_106] : memref<56x16xf32, #tpu.memory_space<vmem>>, vector<32x16xf32>
    %c7_107 = arith.constant 7 : index
    %c0_108 = arith.constant 0 : index
    %c0_109 = arith.constant 0 : index
    %124 = vector.load %arg4[%c7_107, %c0_108, %c0_109] : memref<9x16x16xf32, #tpu.memory_space<vmem>>, vector<1x16x16xf32>
    %125 = vector.shape_cast %124 : vector<1x16x16xf32> to vector<16x16xf32>
    %cst_110 = arith.constant dense<0.000000e+00> : vector<32x16xf32>
    %126 = tpu.matmul %123, %125, %cst_110 {dimension_numbers = #tpu.dot_dimension_numbers<[1], [0], [0], [1], [0, 0, 1, 1], [], []>} : vector<32x16xf32>, vector<16x16xf32>, vector<32x16xf32> -> vector<32x16xf32>
    %127 = arith.addf %122, %126 : vector<32x16xf32>
    %c18_111 = arith.constant 18 : index
    %c0_112 = arith.constant 0 : index
    %128 = vector.load %arg7[%c18_111, %c0_112] : memref<56x16xf32, #tpu.memory_space<vmem>>, vector<32x16xf32>
    %c8_113 = arith.constant 8 : index
    %c0_114 = arith.constant 0 : index
    %c0_115 = arith.constant 0 : index
    %129 = vector.load %arg4[%c8_113, %c0_114, %c0_115] : memref<9x16x16xf32, #tpu.memory_space<vmem>>, vector<1x16x16xf32>
    %130 = vector.shape_cast %129 : vector<1x16x16xf32> to vector<16x16xf32>
    %cst_116 = arith.constant dense<0.000000e+00> : vector<32x16xf32>
    %131 = tpu.matmul %128, %130, %cst_116 {dimension_numbers = #tpu.dot_dimension_numbers<[1], [0], [0], [1], [0, 0, 1, 1], [], []>} : vector<32x16xf32>, vector<16x16xf32>, vector<32x16xf32> -> vector<32x16xf32>
    %132 = arith.addf %127, %131 : vector<32x16xf32>
    %c0_117 = arith.constant 0 : index
    %c0_118 = arith.constant 0 : index
    %133 = vector.load %arg5[%c0_117, %c0_118] : memref<1x16xf32, #tpu.memory_space<vmem>>, vector<1x16xf32>
    %134 = vector.broadcast %133 : vector<1x16xf32> to vector<32x16xf32>
    %135 = arith.addf %132, %134 : vector<32x16xf32>
    %cst_119 = arith.constant 0.000000e+00 : f32
    %136 = vector.broadcast %cst_119 : f32 to vector<32x16xf32>
    %137 = arith.maximumf %135, %136 : vector<32x16xf32>
    %c0_120 = arith.constant 0 : index
    %c0_121 = arith.constant 0 : index
    %c0_122 = arith.constant 0 : index
    %138 = vector.load %arg6[%c0_120, %c0_121, %c0_122] : memref<1x32x16xf32, #tpu.memory_space<vmem>>, vector<1x32x16xf32>
    %139 = vector.shape_cast %138 : vector<1x32x16xf32> to vector<32x16xf32>
    %140 = vector.shape_cast %137 : vector<32x16xf32> to vector<1x32x16xf32>
    tpu.vector_store %arg6[%c0_120, %c0_121, %c0_122], %140 {strides = array<i32>} : memref<1x32x16xf32, #tpu.memory_space<vmem>>, vector<1x32x16xf32>,
    return
  }
  func.func @transform_0(%arg0: i32) -> (i32, i32, i32) {
    %c0_i32 = arith.constant 0 : i32
    %c0_i32_0 = arith.constant 0 : i32
    %c0_i32_1 = arith.constant 0 : i32
    return %arg0, %c0_i32, %c0_i32_0 : i32, i32, i32
  }
  func.func @transform_1(%arg0: i32) -> (i32, i32, i32) {
    %c0_i32 = arith.constant 0 : i32
    %c0_i32_0 = arith.constant 0 : i32
    %c0_i32_1 = arith.constant 0 : i32
    %c0_i32_2 = arith.constant 0 : i32
    return %c0_i32, %c0_i32_0, %c0_i32_1 : i32, i32, i32
  }
  func.func @transform_2(%arg0: i32) -> (i32, i32) {
    %c0_i32 = arith.constant 0 : i32
    %c0_i32_0 = arith.constant 0 : i32
    %c0_i32_1 = arith.constant 0 : i32
    return %c0_i32, %c0_i32_0 : i32, i32
  }
  func.func @transform_3(%arg0: i32) -> (i32, i32, i32) {
    %c0_i32 = arith.constant 0 : i32
    %c0_i32_0 = arith.constant 0 : i32
    %c0_i32_1 = arith.constant 0 : i32
    %c0_i32_2 = arith.constant 0 : i32
    return %c0_i32, %c0_i32_0, %c0_i32_1 : i32, i32, i32
  }
  func.func @transform_4(%arg0: i32) -> (i32, i32) {
    %c0_i32 = arith.constant 0 : i32
    %c0_i32_0 = arith.constant 0 : i32
    %c0_i32_1 = arith.constant 0 : i32
    return %c0_i32, %c0_i32_0 : i32, i32
  }
  func.func @transform_5(%arg0: i32) -> (i32, i32, i32) {
    %c0_i32 = arith.constant 0 : i32
    %c0_i32_0 = arith.constant 0 : i32
    %c0_i32_1 = arith.constant 0 : i32
    return %arg0, %c0_i32, %c0_i32_0 : i32, i32, i32
  }
}

module attributes {stable_mosaic.version = 11 : i64} {
  func.func @conv_layer_kernel(%arg0: i32, %arg1: memref<1x40x16xf32, #tpu.memory_space<vmem>>, %arg2: memref<9x16x32xf32, #tpu.memory_space<vmem>>, %arg3: memref<1x32xf32, #tpu.memory_space<vmem>>, %arg4: memref<9x32x32xf32, #tpu.memory_space<vmem>>, %arg5: memref<1x32xf32, #tpu.memory_space<vmem>>, %arg6: memref<1x16x32xf32, #tpu.memory_space<vmem>>, %arg7: memref<40x32xf32, #tpu.memory_space<vmem>>) attributes {dimension_semantics = [#tpu.dimension_semantics<parallel>], iteration_bounds = array<i64: 2>, scalar_prefetch = 0 : i64, scratch_operands = 1 : i64, tpu.core_type = #tpu.core_type<tc>, window_params = [{transform_indices = @transform_0, window_bounds = array<i64: 1, 40, 16>}, {pipeline_mode = #tpu.pipeline_mode<synchronous>, transform_indices = @transform_1, window_bounds = array<i64: 9, 16, 32>}, {pipeline_mode = #tpu.pipeline_mode<synchronous>, transform_indices = @transform_2, window_bounds = array<i64: 1, 32>}, {pipeline_mode = #tpu.pipeline_mode<synchronous>, transform_indices = @transform_3, window_bounds = array<i64: 9, 32, 32>}, {pipeline_mode = #tpu.pipeline_mode<synchronous>, transform_indices = @transform_4, window_bounds = array<i64: 1, 32>}, {transform_indices = @transform_5, window_bounds = array<i64: 1, 16, 32>}]} {
    %c0 = arith.constant 0 : index
    %c0_0 = arith.constant 0 : index
    %c0_1 = arith.constant 0 : index
    %0 = vector.load %arg1[%c0, %c0_0, %c0_1] : memref<1x40x16xf32, #tpu.memory_space<vmem>>, vector<1x16x16xf32>
    %1 = vector.shape_cast %0 : vector<1x16x16xf32> to vector<16x16xf32>
    %c0_2 = arith.constant 0 : index
    %c0_3 = arith.constant 0 : index
    %c0_4 = arith.constant 0 : index
    %2 = vector.load %arg2[%c0_2, %c0_3, %c0_4] : memref<9x16x32xf32, #tpu.memory_space<vmem>>, vector<1x16x32xf32>
    %3 = vector.shape_cast %2 : vector<1x16x32xf32> to vector<16x32xf32>
    %cst = arith.constant dense<0.000000e+00> : vector<16x32xf32>
    %4 = tpu.matmul %1, %3, %cst {dimension_numbers = #tpu.dot_dimension_numbers<[1], [0], [0], [1], [0, 0, 1, 1], [], []>} : vector<16x16xf32>, vector<16x32xf32>, vector<16x32xf32> -> vector<16x32xf32>
    %c0_5 = arith.constant 0 : index
    %c1 = arith.constant 1 : index
    %c0_6 = arith.constant 0 : index
    %5 = vector.load %arg1[%c0_5, %c1, %c0_6] : memref<1x40x16xf32, #tpu.memory_space<vmem>>, vector<1x16x16xf32>
    %6 = vector.shape_cast %5 : vector<1x16x16xf32> to vector<16x16xf32>
    %c1_7 = arith.constant 1 : index
    %c0_8 = arith.constant 0 : index
    %c0_9 = arith.constant 0 : index
    %7 = vector.load %arg2[%c1_7, %c0_8, %c0_9] : memref<9x16x32xf32, #tpu.memory_space<vmem>>, vector<1x16x32xf32>
    %8 = vector.shape_cast %7 : vector<1x16x32xf32> to vector<16x32xf32>
    %cst_10 = arith.constant dense<0.000000e+00> : vector<16x32xf32>
    %9 = tpu.matmul %6, %8, %cst_10 {dimension_numbers = #tpu.dot_dimension_numbers<[1], [0], [0], [1], [0, 0, 1, 1], [], []>} : vector<16x16xf32>, vector<16x32xf32>, vector<16x32xf32> -> vector<16x32xf32>
    %10 = arith.addf %4, %9 : vector<16x32xf32>
    %c0_11 = arith.constant 0 : index
    %c2 = arith.constant 2 : index
    %c0_12 = arith.constant 0 : index
    %11 = vector.load %arg1[%c0_11, %c2, %c0_12] : memref<1x40x16xf32, #tpu.memory_space<vmem>>, vector<1x16x16xf32>
    %12 = vector.shape_cast %11 : vector<1x16x16xf32> to vector<16x16xf32>
    %c2_13 = arith.constant 2 : index
    %c0_14 = arith.constant 0 : index
    %c0_15 = arith.constant 0 : index
    %13 = vector.load %arg2[%c2_13, %c0_14, %c0_15] : memref<9x16x32xf32, #tpu.memory_space<vmem>>, vector<1x16x32xf32>
    %14 = vector.shape_cast %13 : vector<1x16x32xf32> to vector<16x32xf32>
    %cst_16 = arith.constant dense<0.000000e+00> : vector<16x32xf32>
    %15 = tpu.matmul %12, %14, %cst_16 {dimension_numbers = #tpu.dot_dimension_numbers<[1], [0], [0], [1], [0, 0, 1, 1], [], []>} : vector<16x16xf32>, vector<16x32xf32>, vector<16x32xf32> -> vector<16x32xf32>
    %16 = arith.addf %10, %15 : vector<16x32xf32>
    %c0_17 = arith.constant 0 : index
    %c8 = arith.constant 8 : index
    %c0_18 = arith.constant 0 : index
    %17 = vector.load %arg1[%c0_17, %c8, %c0_18] : memref<1x40x16xf32, #tpu.memory_space<vmem>>, vector<1x16x16xf32>
    %18 = vector.shape_cast %17 : vector<1x16x16xf32> to vector<16x16xf32>
    %c3 = arith.constant 3 : index
    %c0_19 = arith.constant 0 : index
    %c0_20 = arith.constant 0 : index
    %19 = vector.load %arg2[%c3, %c0_19, %c0_20] : memref<9x16x32xf32, #tpu.memory_space<vmem>>, vector<1x16x32xf32>
    %20 = vector.shape_cast %19 : vector<1x16x32xf32> to vector<16x32xf32>
    %cst_21 = arith.constant dense<0.000000e+00> : vector<16x32xf32>
    %21 = tpu.matmul %18, %20, %cst_21 {dimension_numbers = #tpu.dot_dimension_numbers<[1], [0], [0], [1], [0, 0, 1, 1], [], []>} : vector<16x16xf32>, vector<16x32xf32>, vector<16x32xf32> -> vector<16x32xf32>
    %22 = arith.addf %16, %21 : vector<16x32xf32>
    %c0_22 = arith.constant 0 : index
    %c9 = arith.constant 9 : index
    %c0_23 = arith.constant 0 : index
    %23 = vector.load %arg1[%c0_22, %c9, %c0_23] : memref<1x40x16xf32, #tpu.memory_space<vmem>>, vector<1x16x16xf32>
    %24 = vector.shape_cast %23 : vector<1x16x16xf32> to vector<16x16xf32>
    %c4 = arith.constant 4 : index
    %c0_24 = arith.constant 0 : index
    %c0_25 = arith.constant 0 : index
    %25 = vector.load %arg2[%c4, %c0_24, %c0_25] : memref<9x16x32xf32, #tpu.memory_space<vmem>>, vector<1x16x32xf32>
    %26 = vector.shape_cast %25 : vector<1x16x32xf32> to vector<16x32xf32>
    %cst_26 = arith.constant dense<0.000000e+00> : vector<16x32xf32>
    %27 = tpu.matmul %24, %26, %cst_26 {dimension_numbers = #tpu.dot_dimension_numbers<[1], [0], [0], [1], [0, 0, 1, 1], [], []>} : vector<16x16xf32>, vector<16x32xf32>, vector<16x32xf32> -> vector<16x32xf32>
    %28 = arith.addf %22, %27 : vector<16x32xf32>
    %c0_27 = arith.constant 0 : index
    %c10 = arith.constant 10 : index
    %c0_28 = arith.constant 0 : index
    %29 = vector.load %arg1[%c0_27, %c10, %c0_28] : memref<1x40x16xf32, #tpu.memory_space<vmem>>, vector<1x16x16xf32>
    %30 = vector.shape_cast %29 : vector<1x16x16xf32> to vector<16x16xf32>
    %c5 = arith.constant 5 : index
    %c0_29 = arith.constant 0 : index
    %c0_30 = arith.constant 0 : index
    %31 = vector.load %arg2[%c5, %c0_29, %c0_30] : memref<9x16x32xf32, #tpu.memory_space<vmem>>, vector<1x16x32xf32>
    %32 = vector.shape_cast %31 : vector<1x16x32xf32> to vector<16x32xf32>
    %cst_31 = arith.constant dense<0.000000e+00> : vector<16x32xf32>
    %33 = tpu.matmul %30, %32, %cst_31 {dimension_numbers = #tpu.dot_dimension_numbers<[1], [0], [0], [1], [0, 0, 1, 1], [], []>} : vector<16x16xf32>, vector<16x32xf32>, vector<16x32xf32> -> vector<16x32xf32>
    %34 = arith.addf %28, %33 : vector<16x32xf32>
    %c0_32 = arith.constant 0 : index
    %c16 = arith.constant 16 : index
    %c0_33 = arith.constant 0 : index
    %35 = vector.load %arg1[%c0_32, %c16, %c0_33] : memref<1x40x16xf32, #tpu.memory_space<vmem>>, vector<1x16x16xf32>
    %36 = vector.shape_cast %35 : vector<1x16x16xf32> to vector<16x16xf32>
    %c6 = arith.constant 6 : index
    %c0_34 = arith.constant 0 : index
    %c0_35 = arith.constant 0 : index
    %37 = vector.load %arg2[%c6, %c0_34, %c0_35] : memref<9x16x32xf32, #tpu.memory_space<vmem>>, vector<1x16x32xf32>
    %38 = vector.shape_cast %37 : vector<1x16x32xf32> to vector<16x32xf32>
    %cst_36 = arith.constant dense<0.000000e+00> : vector<16x32xf32>
    %39 = tpu.matmul %36, %38, %cst_36 {dimension_numbers = #tpu.dot_dimension_numbers<[1], [0], [0], [1], [0, 0, 1, 1], [], []>} : vector<16x16xf32>, vector<16x32xf32>, vector<16x32xf32> -> vector<16x32xf32>
    %40 = arith.addf %34, %39 : vector<16x32xf32>
    %c0_37 = arith.constant 0 : index
    %c17 = arith.constant 17 : index
    %c0_38 = arith.constant 0 : index
    %41 = vector.load %arg1[%c0_37, %c17, %c0_38] : memref<1x40x16xf32, #tpu.memory_space<vmem>>, vector<1x16x16xf32>
    %42 = vector.shape_cast %41 : vector<1x16x16xf32> to vector<16x16xf32>
    %c7 = arith.constant 7 : index
    %c0_39 = arith.constant 0 : index
    %c0_40 = arith.constant 0 : index
    %43 = vector.load %arg2[%c7, %c0_39, %c0_40] : memref<9x16x32xf32, #tpu.memory_space<vmem>>, vector<1x16x32xf32>
    %44 = vector.shape_cast %43 : vector<1x16x32xf32> to vector<16x32xf32>
    %cst_41 = arith.constant dense<0.000000e+00> : vector<16x32xf32>
    %45 = tpu.matmul %42, %44, %cst_41 {dimension_numbers = #tpu.dot_dimension_numbers<[1], [0], [0], [1], [0, 0, 1, 1], [], []>} : vector<16x16xf32>, vector<16x32xf32>, vector<16x32xf32> -> vector<16x32xf32>
    %46 = arith.addf %40, %45 : vector<16x32xf32>
    %c0_42 = arith.constant 0 : index
    %c18 = arith.constant 18 : index
    %c0_43 = arith.constant 0 : index
    %47 = vector.load %arg1[%c0_42, %c18, %c0_43] : memref<1x40x16xf32, #tpu.memory_space<vmem>>, vector<1x16x16xf32>
    %48 = vector.shape_cast %47 : vector<1x16x16xf32> to vector<16x16xf32>
    %c8_44 = arith.constant 8 : index
    %c0_45 = arith.constant 0 : index
    %c0_46 = arith.constant 0 : index
    %49 = vector.load %arg2[%c8_44, %c0_45, %c0_46] : memref<9x16x32xf32, #tpu.memory_space<vmem>>, vector<1x16x32xf32>
    %50 = vector.shape_cast %49 : vector<1x16x32xf32> to vector<16x32xf32>
    %cst_47 = arith.constant dense<0.000000e+00> : vector<16x32xf32>
    %51 = tpu.matmul %48, %50, %cst_47 {dimension_numbers = #tpu.dot_dimension_numbers<[1], [0], [0], [1], [0, 0, 1, 1], [], []>} : vector<16x16xf32>, vector<16x32xf32>, vector<16x32xf32> -> vector<16x32xf32>
    %52 = arith.addf %46, %51 : vector<16x32xf32>
    %c0_48 = arith.constant 0 : index
    %c0_49 = arith.constant 0 : index
    %53 = vector.load %arg3[%c0_48, %c0_49] : memref<1x32xf32, #tpu.memory_space<vmem>>, vector<1x32xf32>
    %54 = vector.broadcast %53 : vector<1x32xf32> to vector<16x32xf32>
    %55 = arith.addf %52, %54 : vector<16x32xf32>
    %cst_50 = arith.constant 0.000000e+00 : f32
    %56 = vector.broadcast %cst_50 : f32 to vector<16x32xf32>
    %57 = arith.maximumf %55, %56 : vector<16x32xf32>
    %58 = tpu.iota {dimensions = array<i32: 0>} : vector<16x1xi32>
    %c8_i32 = arith.constant 8 : i32
    %c0_i32 = arith.constant 0 : i32
    %59 = arith.cmpi eq, %c8_i32, %c0_i32 : i32
    %c1_i32 = arith.constant 1 : i32
    %60 = arith.select %59, %c1_i32, %c8_i32 : i32
    %61 = vector.broadcast %60 : i32 to vector<16x1xi32>
    %62 = arith.remsi %58, %61 : vector<16x1xi32>
    %c0_i32_51 = arith.constant 0 : i32
    %63 = vector.broadcast %c0_i32_51 : i32 to vector<16x1xi32>
    %64 = arith.cmpi ne, %62, %63 : vector<16x1xi32>
    %c0_i32_52 = arith.constant 0 : i32
    %65 = vector.broadcast %c0_i32_52 : i32 to vector<16x1xi32>
    %66 = arith.cmpi slt, %62, %65 : vector<16x1xi32>
    %c0_i32_53 = arith.constant 0 : i32
    %67 = arith.cmpi slt, %60, %c0_i32_53 : i32
    %68 = vector.broadcast %67 : i1 to vector<16x1xi1>
    %69 = vector.broadcast %68 : vector<16x1xi1> to vector<16x1xi1>
    %70 = arith.xori %66, %69 : vector<16x1xi1>
    %71 = arith.andi %70, %64 : vector<16x1xi1>
    %72 = vector.broadcast %60 : i32 to vector<16x1xi32>
    %73 = arith.addi %62, %72 : vector<16x1xi32>
    %74 = arith.select %71, %73, %62 : vector<16x1xi1>, vector<16x1xi32>
    %c1_i32_54 = arith.constant 1 : i32
    %75 = vector.broadcast %c1_i32_54 : i32 to vector<16x1xi32>
    %76 = arith.cmpi sge, %74, %75 : vector<16x1xi32>
    %c2_i32 = arith.constant 2 : i32
    %77 = vector.broadcast %c2_i32 : i32 to vector<16x1xi32>
    %78 = arith.cmpi sle, %74, %77 : vector<16x1xi32>
    %79 = arith.andi %76, %78 : vector<16x1xi1>
    %cst_55 = arith.constant 0.000000e+00 : f32
    %80 = vector.shape_cast %79 : vector<16x1xi1> to vector<16x1xi1>
    %81 = vector.broadcast %80 : vector<16x1xi1> to vector<16x32xi1>
    %82 = vector.broadcast %cst_55 : f32 to vector<16x32xf32>
    %83 = arith.select %81, %57, %82 : vector<16x32xi1>, vector<16x32xf32>
    %cst_56 = arith.constant 0.000000e+00 : f32
    %84 = vector.broadcast %cst_56 : f32 to vector<8x32xf32>
    %c0_57 = arith.constant 0 : index
    %c0_58 = arith.constant 0 : index
    %85 = vector.load %arg7[%c0_57, %c0_58] : memref<40x32xf32, #tpu.memory_space<vmem>>, vector<8x32xf32>
    tpu.vector_store %arg7[%c0_57, %c0_58], %84 {strides = array<i32>} : memref<40x32xf32, #tpu.memory_space<vmem>>, vector<8x32xf32>,
    %cst_59 = arith.constant 0.000000e+00 : f32
    %86 = vector.broadcast %cst_59 : f32 to vector<16x32xf32>
    %c24 = arith.constant 24 : index
    %c0_60 = arith.constant 0 : index
    %87 = vector.load %arg7[%c24, %c0_60] : memref<40x32xf32, #tpu.memory_space<vmem>>, vector<16x32xf32>
    tpu.vector_store %arg7[%c24, %c0_60], %86 {strides = array<i32>} : memref<40x32xf32, #tpu.memory_space<vmem>>, vector<16x32xf32>,
    %c8_61 = arith.constant 8 : index
    %c0_62 = arith.constant 0 : index
    %88 = vector.load %arg7[%c8_61, %c0_62] : memref<40x32xf32, #tpu.memory_space<vmem>>, vector<16x32xf32>
    tpu.vector_store %arg7[%c8_61, %c0_62], %83 {strides = array<i32>} : memref<40x32xf32, #tpu.memory_space<vmem>>, vector<16x32xf32>,
    %c0_63 = arith.constant 0 : index
    %c0_64 = arith.constant 0 : index
    %89 = vector.load %arg7[%c0_63, %c0_64] : memref<40x32xf32, #tpu.memory_space<vmem>>, vector<16x32xf32>
    %c0_65 = arith.constant 0 : index
    %c0_66 = arith.constant 0 : index
    %c0_67 = arith.constant 0 : index
    %90 = vector.load %arg4[%c0_65, %c0_66, %c0_67] : memref<9x32x32xf32, #tpu.memory_space<vmem>>, vector<1x32x32xf32>
    %91 = vector.shape_cast %90 : vector<1x32x32xf32> to vector<32x32xf32>
    %cst_68 = arith.constant dense<0.000000e+00> : vector<16x32xf32>
    %92 = tpu.matmul %89, %91, %cst_68 {dimension_numbers = #tpu.dot_dimension_numbers<[1], [0], [0], [1], [0, 0, 1, 1], [], []>} : vector<16x32xf32>, vector<32x32xf32>, vector<16x32xf32> -> vector<16x32xf32>
    %c1_69 = arith.constant 1 : index
    %c0_70 = arith.constant 0 : index
    %93 = vector.load %arg7[%c1_69, %c0_70] : memref<40x32xf32, #tpu.memory_space<vmem>>, vector<16x32xf32>
    %c1_71 = arith.constant 1 : index
    %c0_72 = arith.constant 0 : index
    %c0_73 = arith.constant 0 : index
    %94 = vector.load %arg4[%c1_71, %c0_72, %c0_73] : memref<9x32x32xf32, #tpu.memory_space<vmem>>, vector<1x32x32xf32>
    %95 = vector.shape_cast %94 : vector<1x32x32xf32> to vector<32x32xf32>
    %cst_74 = arith.constant dense<0.000000e+00> : vector<16x32xf32>
    %96 = tpu.matmul %93, %95, %cst_74 {dimension_numbers = #tpu.dot_dimension_numbers<[1], [0], [0], [1], [0, 0, 1, 1], [], []>} : vector<16x32xf32>, vector<32x32xf32>, vector<16x32xf32> -> vector<16x32xf32>
    %97 = arith.addf %92, %96 : vector<16x32xf32>
    %c2_75 = arith.constant 2 : index
    %c0_76 = arith.constant 0 : index
    %98 = vector.load %arg7[%c2_75, %c0_76] : memref<40x32xf32, #tpu.memory_space<vmem>>, vector<16x32xf32>
    %c2_77 = arith.constant 2 : index
    %c0_78 = arith.constant 0 : index
    %c0_79 = arith.constant 0 : index
    %99 = vector.load %arg4[%c2_77, %c0_78, %c0_79] : memref<9x32x32xf32, #tpu.memory_space<vmem>>, vector<1x32x32xf32>
    %100 = vector.shape_cast %99 : vector<1x32x32xf32> to vector<32x32xf32>
    %cst_80 = arith.constant dense<0.000000e+00> : vector<16x32xf32>
    %101 = tpu.matmul %98, %100, %cst_80 {dimension_numbers = #tpu.dot_dimension_numbers<[1], [0], [0], [1], [0, 0, 1, 1], [], []>} : vector<16x32xf32>, vector<32x32xf32>, vector<16x32xf32> -> vector<16x32xf32>
    %102 = arith.addf %97, %101 : vector<16x32xf32>
    %c8_81 = arith.constant 8 : index
    %c0_82 = arith.constant 0 : index
    %103 = vector.load %arg7[%c8_81, %c0_82] : memref<40x32xf32, #tpu.memory_space<vmem>>, vector<16x32xf32>
    %c3_83 = arith.constant 3 : index
    %c0_84 = arith.constant 0 : index
    %c0_85 = arith.constant 0 : index
    %104 = vector.load %arg4[%c3_83, %c0_84, %c0_85] : memref<9x32x32xf32, #tpu.memory_space<vmem>>, vector<1x32x32xf32>
    %105 = vector.shape_cast %104 : vector<1x32x32xf32> to vector<32x32xf32>
    %cst_86 = arith.constant dense<0.000000e+00> : vector<16x32xf32>
    %106 = tpu.matmul %103, %105, %cst_86 {dimension_numbers = #tpu.dot_dimension_numbers<[1], [0], [0], [1], [0, 0, 1, 1], [], []>} : vector<16x32xf32>, vector<32x32xf32>, vector<16x32xf32> -> vector<16x32xf32>
    %107 = arith.addf %102, %106 : vector<16x32xf32>
    %c9_87 = arith.constant 9 : index
    %c0_88 = arith.constant 0 : index
    %108 = vector.load %arg7[%c9_87, %c0_88] : memref<40x32xf32, #tpu.memory_space<vmem>>, vector<16x32xf32>
    %c4_89 = arith.constant 4 : index
    %c0_90 = arith.constant 0 : index
    %c0_91 = arith.constant 0 : index
    %109 = vector.load %arg4[%c4_89, %c0_90, %c0_91] : memref<9x32x32xf32, #tpu.memory_space<vmem>>, vector<1x32x32xf32>
    %110 = vector.shape_cast %109 : vector<1x32x32xf32> to vector<32x32xf32>
    %cst_92 = arith.constant dense<0.000000e+00> : vector<16x32xf32>
    %111 = tpu.matmul %108, %110, %cst_92 {dimension_numbers = #tpu.dot_dimension_numbers<[1], [0], [0], [1], [0, 0, 1, 1], [], []>} : vector<16x32xf32>, vector<32x32xf32>, vector<16x32xf32> -> vector<16x32xf32>
    %112 = arith.addf %107, %111 : vector<16x32xf32>
    %c10_93 = arith.constant 10 : index
    %c0_94 = arith.constant 0 : index
    %113 = vector.load %arg7[%c10_93, %c0_94] : memref<40x32xf32, #tpu.memory_space<vmem>>, vector<16x32xf32>
    %c5_95 = arith.constant 5 : index
    %c0_96 = arith.constant 0 : index
    %c0_97 = arith.constant 0 : index
    %114 = vector.load %arg4[%c5_95, %c0_96, %c0_97] : memref<9x32x32xf32, #tpu.memory_space<vmem>>, vector<1x32x32xf32>
    %115 = vector.shape_cast %114 : vector<1x32x32xf32> to vector<32x32xf32>
    %cst_98 = arith.constant dense<0.000000e+00> : vector<16x32xf32>
    %116 = tpu.matmul %113, %115, %cst_98 {dimension_numbers = #tpu.dot_dimension_numbers<[1], [0], [0], [1], [0, 0, 1, 1], [], []>} : vector<16x32xf32>, vector<32x32xf32>, vector<16x32xf32> -> vector<16x32xf32>
    %117 = arith.addf %112, %116 : vector<16x32xf32>
    %c16_99 = arith.constant 16 : index
    %c0_100 = arith.constant 0 : index
    %118 = vector.load %arg7[%c16_99, %c0_100] : memref<40x32xf32, #tpu.memory_space<vmem>>, vector<16x32xf32>
    %c6_101 = arith.constant 6 : index
    %c0_102 = arith.constant 0 : index
    %c0_103 = arith.constant 0 : index
    %119 = vector.load %arg4[%c6_101, %c0_102, %c0_103] : memref<9x32x32xf32, #tpu.memory_space<vmem>>, vector<1x32x32xf32>
    %120 = vector.shape_cast %119 : vector<1x32x32xf32> to vector<32x32xf32>
    %cst_104 = arith.constant dense<0.000000e+00> : vector<16x32xf32>
    %121 = tpu.matmul %118, %120, %cst_104 {dimension_numbers = #tpu.dot_dimension_numbers<[1], [0], [0], [1], [0, 0, 1, 1], [], []>} : vector<16x32xf32>, vector<32x32xf32>, vector<16x32xf32> -> vector<16x32xf32>
    %122 = arith.addf %117, %121 : vector<16x32xf32>
    %c17_105 = arith.constant 17 : index
    %c0_106 = arith.constant 0 : index
    %123 = vector.load %arg7[%c17_105, %c0_106] : memref<40x32xf32, #tpu.memory_space<vmem>>, vector<16x32xf32>
    %c7_107 = arith.constant 7 : index
    %c0_108 = arith.constant 0 : index
    %c0_109 = arith.constant 0 : index
    %124 = vector.load %arg4[%c7_107, %c0_108, %c0_109] : memref<9x32x32xf32, #tpu.memory_space<vmem>>, vector<1x32x32xf32>
    %125 = vector.shape_cast %124 : vector<1x32x32xf32> to vector<32x32xf32>
    %cst_110 = arith.constant dense<0.000000e+00> : vector<16x32xf32>
    %126 = tpu.matmul %123, %125, %cst_110 {dimension_numbers = #tpu.dot_dimension_numbers<[1], [0], [0], [1], [0, 0, 1, 1], [], []>} : vector<16x32xf32>, vector<32x32xf32>, vector<16x32xf32> -> vector<16x32xf32>
    %127 = arith.addf %122, %126 : vector<16x32xf32>
    %c18_111 = arith.constant 18 : index
    %c0_112 = arith.constant 0 : index
    %128 = vector.load %arg7[%c18_111, %c0_112] : memref<40x32xf32, #tpu.memory_space<vmem>>, vector<16x32xf32>
    %c8_113 = arith.constant 8 : index
    %c0_114 = arith.constant 0 : index
    %c0_115 = arith.constant 0 : index
    %129 = vector.load %arg4[%c8_113, %c0_114, %c0_115] : memref<9x32x32xf32, #tpu.memory_space<vmem>>, vector<1x32x32xf32>
    %130 = vector.shape_cast %129 : vector<1x32x32xf32> to vector<32x32xf32>
    %cst_116 = arith.constant dense<0.000000e+00> : vector<16x32xf32>
    %131 = tpu.matmul %128, %130, %cst_116 {dimension_numbers = #tpu.dot_dimension_numbers<[1], [0], [0], [1], [0, 0, 1, 1], [], []>} : vector<16x32xf32>, vector<32x32xf32>, vector<16x32xf32> -> vector<16x32xf32>
    %132 = arith.addf %127, %131 : vector<16x32xf32>
    %c0_117 = arith.constant 0 : index
    %c0_118 = arith.constant 0 : index
    %133 = vector.load %arg5[%c0_117, %c0_118] : memref<1x32xf32, #tpu.memory_space<vmem>>, vector<1x32xf32>
    %134 = vector.broadcast %133 : vector<1x32xf32> to vector<16x32xf32>
    %135 = arith.addf %132, %134 : vector<16x32xf32>
    %cst_119 = arith.constant 0.000000e+00 : f32
    %136 = vector.broadcast %cst_119 : f32 to vector<16x32xf32>
    %137 = arith.maximumf %135, %136 : vector<16x32xf32>
    %c0_120 = arith.constant 0 : index
    %c0_121 = arith.constant 0 : index
    %c0_122 = arith.constant 0 : index
    %138 = vector.load %arg6[%c0_120, %c0_121, %c0_122] : memref<1x16x32xf32, #tpu.memory_space<vmem>>, vector<1x16x32xf32>
    %139 = vector.shape_cast %138 : vector<1x16x32xf32> to vector<16x32xf32>
    %140 = vector.shape_cast %137 : vector<16x32xf32> to vector<1x16x32xf32>
    tpu.vector_store %arg6[%c0_120, %c0_121, %c0_122], %140 {strides = array<i32>} : memref<1x16x32xf32, #tpu.memory_space<vmem>>, vector<1x16x32xf32>,
    return
  }
  func.func @transform_0(%arg0: i32) -> (i32, i32, i32) {
    %c0_i32 = arith.constant 0 : i32
    %c0_i32_0 = arith.constant 0 : i32
    %c0_i32_1 = arith.constant 0 : i32
    return %arg0, %c0_i32, %c0_i32_0 : i32, i32, i32
  }
  func.func @transform_1(%arg0: i32) -> (i32, i32, i32) {
    %c0_i32 = arith.constant 0 : i32
    %c0_i32_0 = arith.constant 0 : i32
    %c0_i32_1 = arith.constant 0 : i32
    %c0_i32_2 = arith.constant 0 : i32
    return %c0_i32, %c0_i32_0, %c0_i32_1 : i32, i32, i32
  }
  func.func @transform_2(%arg0: i32) -> (i32, i32) {
    %c0_i32 = arith.constant 0 : i32
    %c0_i32_0 = arith.constant 0 : i32
    %c0_i32_1 = arith.constant 0 : i32
    return %c0_i32, %c0_i32_0 : i32, i32
  }
  func.func @transform_3(%arg0: i32) -> (i32, i32, i32) {
    %c0_i32 = arith.constant 0 : i32
    %c0_i32_0 = arith.constant 0 : i32
    %c0_i32_1 = arith.constant 0 : i32
    %c0_i32_2 = arith.constant 0 : i32
    return %c0_i32, %c0_i32_0, %c0_i32_1 : i32, i32, i32
  }
  func.func @transform_4(%arg0: i32) -> (i32, i32) {
    %c0_i32 = arith.constant 0 : i32
    %c0_i32_0 = arith.constant 0 : i32
    %c0_i32_1 = arith.constant 0 : i32
    return %c0_i32, %c0_i32_0 : i32, i32
  }
  func.func @transform_5(%arg0: i32) -> (i32, i32, i32) {
    %c0_i32 = arith.constant 0 : i32
    %c0_i32_0 = arith.constant 0 : i32
    %c0_i32_1 = arith.constant 0 : i32
    return %arg0, %c0_i32, %c0_i32_0 : i32, i32, i32
  }
}

</mosaic_0001>

<bundles_post_ra>
// kernel: encoder_forward.4
= control target key start
LH: loop header
LB: loop body
LE: loop exit
PB: predicated region body
PF: predicated region fallthrough
CT: control target
= control target key end

     0   :  { %s1463_s18 = smov 0   ;;  %s1740_s0 = inlined_call_operand.vmem [shape: f32[2,56,8], index: 0, kind: input, shape index: {}]   ;;  %s1741_s1 = inlined_call_operand.vmem [shape: f32[9,8,16], index: 1, kind: input, shape index: {}]   ;;  %s1742_s2 = inlined_call_operand.vmem [shape: f32[1,16], index: 2, kind: input, shape index: {}]   ;;  %s1743_s3 = inlined_call_operand.vmem [shape: f32[9,16,16], index: 3, kind: input, shape index: {}]   ;;  %s1744_s4 = inlined_call_operand.vmem [shape: f32[1,16], index: 4, kind: input, shape index: {}]   ;;  %s1745_s5 = inlined_call_operand.vmem [shape: f32[2,32,16], index: 5, kind: output, shape index: {}]  }
   0x1 LB: > { %s1303_s19 = sadd.s32 4294967295, %s1430_s18   ;;  %p1307_p0 = scmp.ge.s32.totalorder %s1430_s18, 1  ;;  %s1430_s18 = sphi %s1463_s18, %s15_s18  }
   0x2   : > { %p187_p1 = scmp.lt.s32.totalorder %s1430_s18, 3 }
   0x4   : > { %p188_p2 = pnand %p1307_p0, %p187_p1 }
   0x5   : > { %p215_p3 = scmp.lt.s32.totalorder (!%p188_p2), %s1303_s19, 1 }
   0x6   : > { %191 = sbr.rel (%p188_p2) target bundleno = 436 (0x1b4), region = 40 }
   0xb   : > { %v1311_v0 = vld [vmem:[%s1741_s1 + $0x8] sm:$0xff]  ;;  %v229_v1 = vld [vmem:[%s1741_s1] sm:$0xff]  ;;  %v1320_v2 = vld [vmem:[%s1741_s1 + $0x10] sm:$0xff]  ;;  %s1759_s19 = smov (!%p215_p3, %s1303_s19), 1  ;;  %vm236_vm0 = vcmask 64512   ;;  %vm765_vm1 = vcmask 130048   ;;  %v688_v62 = vlaneseq }
   0xc   : > { %1410 = vmatpush.msra.mxu2 %v1311_v0  ;;  %1411 = vmatpush.msra.mxu3 %v229_v1  ;;  %v1325_v3 = vld [vmem:[%s1741_s1 + $0x18] sm:$0xff]  ;;  %v1330_v4 = vld [vmem:[%s1741_s1 + $0x20] sm:$0xff]  ;;  %v1335_v5 = vld [vmem:[%s1741_s1 + $0x28] sm:$0xff]  ;;  %s1412_s7 = smul.u32 56, %s1759_s19  ;;  %v1432_v39 = vmov 0.0   ;;  %s1409_s11 = sshll.u32 %s1759_s19, 5 }
   0xd   : > { %264 = vmatpush.msra.mxu0 %v1311_v0  ;;  %305 = vmatpush.msra.mxu1 %v229_v1  ;;  %v1340_v6 = vld [vmem:[%s1741_s1 + $0x30] sm:$0xff]  ;;  %v1345_v9 = vld [vmem:[%s1741_s1 + $0x38] sm:$0xff]  ;;  %v1350_v12 = vld [vmem:[%s1741_s1 + $0x40] sm:$0xff]  ;;  %766 = vst.msk [vmem:[#allocation2] sm:$0xff] %vm765_vm1, %v1432_v39  ;;  %s1727_s14 = scalar_lea.vmem %s1745_s5, %s1409_s11 }
   0xe   : > { %352 = vmatpush.msrb.mxu2 %v1320_v2  ;;  %403 = vmatpush.msrb.mxu3 %v1325_v3  ;;  %s1495_s10 = scalar_lea.vmem %s1740_s0, %s1412_s7  ;;  %v1356_v31 = vld [vmem:[%s1743_s3 + $0x18] sm:$0xff]  ;;  %767 = vst.msk [vmem:[#allocation2 + $0x28] sm:$0xff] %vm765_vm1, %v1432_v39  ;;  %v778_v42 = vld [vmem:[%s1743_s3 + $0x8] sm:$0xff]  ;;  %v777_v43 = vld [vmem:[%s1743_s3] sm:$0xff]  ;;  %v1599_v3 = vshrl.u32 %v688_v62, 7 }
   0xf   : > { %454 = vmatpush.msrb.mxu0 %v1330_v4  ;;  %505 = vmatpush.msrb.mxu1 %v1335_v5  ;;  %v232_v7 = vld [vmem:[%s1495_s10 + $0x11] sm:$0xff]  ;;  %v230_v10 = vld [vmem:[%s1495_s10 + $0x1] sm:$0xff]  ;;  %v233_v13 = vld [vmem:[%s1495_s10 + $0x19] sm:$0xff]  ;;  %768 = vst.msk [vmem:[#allocation2 + $0x30] sm:$0xff] %vm765_vm1, %v1432_v39 }
  0x10   : > { %v227_v8 = vld [vmem:[%s1495_s10 + $0x10] sm:$0xff]  ;;  %1314 = vmatmul.msk.f32.vlgmr.msra.gmra.mxu2 %vm236_vm0, %v232_v7  ;;  %v225_v11 = vld [vmem:[%s1495_s10] sm:$0xff]  ;;  %1312 = vmatmul.msk.f32.vlgmr.msra.gmra.mxu0 %vm236_vm0, %v230_v10  ;;  %v228_v14 = vld [vmem:[%s1495_s10 + $0x18] sm:$0xff] }
  0x11   : > { %1318 = vmatmul.msk.f32.vlgmr.msra.gmra.mxu3 %vm236_vm0, %v227_v8  ;;  %1316 = vmatmul.msk.f32.vlgmr.msra.gmra.mxu1 %vm236_vm0, %v225_v11  ;;  %v231_v15 = vld [vmem:[%s1495_s10 + $0x9] sm:$0xff]  ;;  %v321_v19 = vld [vmem:[%s1495_s10 + $0x12] sm:$0xff]  ;;  %v322_v20 = vld [vmem:[%s1495_s10 + $0x1a] sm:$0xff]  ;;  %v697_v11 = vand.u32 7, %v1599_v3 }
  0x12   : > { %556 = vmatpush.msra.mxu2 %v1340_v6  ;;  %607 = vmatpush.msra.mxu3 %v1345_v9  ;;  %v226_v16 = vld [vmem:[%s1495_s10 + $0x8] sm:$0xff]  ;;  %v373_v21 = vld [vmem:[%s1495_s10 + $0x20] sm:$0xff]  ;;  %v1355_v46 = vld [vmem:[%s1743_s3 + $0x10] sm:$0xff] }
  0x13   : > { %658 = vmatpush.msra.mxu0 %v1350_v12  ;;  %v319_v17 = vld [vmem:[%s1495_s10 + $0x2] sm:$0xff]  ;;  %v320_v18 = vld [vmem:[%s1495_s10 + $0xa] sm:$0xff]  ;;  %812 = vmatpush.msra.mxu1 %v1356_v31  ;;  %v1372_v51 = vld [vmem:[%s1743_s3 + $0x38] sm:$0xff]  ;;  %vm1607_vm2 = vcmp.ge.s32.totalorder %v697_v11, 1  ;;  %vm1611_vm3 = vcmp.le.s32.totalorder %v697_v11, 4 }
  0x14   : > { %v424_v22 = vld [vmem:[%s1495_s10 + $0x21] sm:$0xff]  ;;  %v577_v25 = vld [vmem:[%s1495_s10 + $0x29] sm:$0xff]  ;;  %vm749_vm4 = vmand %vm1607_vm2, %vm1611_vm3 }
  0x15   : > { %v475_v23 = vld [vmem:[%s1495_s10 + $0x22] sm:$0xff]  ;;  %v628_v26 = vld [vmem:[%s1495_s10 + $0x2a] sm:$0xff]  ;;  %813 = vmatpush.msra.mxu1 %v1355_v46 }
  0x16   : > { %v526_v24 = vld [vmem:[%s1495_s10 + $0x28] sm:$0xff]  ;;  %v773_v45 = vld [vmem:[#allocation2] sm:$0xff]  ;;  %v1371_v54 = vld [vmem:[%s1743_s3 + $0x30] sm:$0xff] }
  0x17   : > { %v1366_v47 = vld [vmem:[%s1743_s3 + $0x28] sm:$0xff]  ;;  %v1365_v53 = vld [vmem:[%s1743_s3 + $0x20] sm:$0xff] }
  0x18   : > { %1315 = vmatmul.msk.f32.gmra.mxu2 %vm236_vm0, %v233_v13  ;;  %1313 = vmatmul.msk.f32.gmra.mxu0 %vm236_vm0, %v231_v15  ;;  %v1378_v2 = vld [vmem:[%s1743_s3 + $0x48] sm:$0xff] }
  0x19   : > { %1319 = vmatmul.msk.f32.gmra.mxu3 %vm236_vm0, %v228_v14  ;;  %1317 = vmatmul.msk.f32.gmra.mxu1 %vm236_vm0, %v226_v16 }
  0x20   : > { %1321 = vmatmul.msk.f32.vlgmr.msrb.gmra.mxu2 %vm236_vm0, %v319_v17  ;;  %1331 = vmatmul.msk.f32.vlgmr.msrb.gmra.mxu0 %vm236_vm0, %v231_v15  ;;  %v1605_v15 = vld [vmem:[%s1742_s2] ss:$0 sm:$0xff] }
  0x21   : > { %1326 = vmatmul.msk.f32.vlgmr.msrb.gmra.mxu3 %vm236_vm0, %v226_v16  ;;  %1336 = vmatmul.msk.f32.vlgmr.msrb.gmra.mxu1 %vm236_vm0, %v320_v18 }
  0x22   : > { %853 = vmatpush.msrb.mxu2 %v778_v42  ;;  %901 = vmatpush.msrb.mxu3 %v1366_v47 }
  0x23   : > { %953 = vmatpush.msrb.mxu0 %v1372_v51  ;;  %1005 = vmatpush.msrb.mxu1 %v1378_v2  ;;  %v1402_v2 = vld [vmem:[%s1743_s3 + $0x88] sm:$0xff] }
  0x24   : > { %854 = vmatpush.msrb.mxu2 %v777_v43  ;;  %902 = vmatpush.msrb.mxu3 %v1365_v53 }
  0x25   : > { %954 = vmatpush.msrb.mxu0 %v1371_v54 }
  0x28   : > { %1322 = vmatmul.msk.f32.gmra.mxu2 %vm236_vm0, %v320_v18  ;;  %1332 = vmatmul.msk.f32.gmra.mxu0 %vm236_vm0, %v232_v7 }
  0x29   : > { %1327 = vmatmul.msk.f32.gmra.mxu3 %vm236_vm0, %v227_v8  ;;  %1337 = vmatmul.msk.f32.gmra.mxu1 %vm236_vm0, %v321_v19 }
  0x30   : > { %1323 = vmatmul.msk.f32.gmra.mxu2 %vm236_vm0, %v321_v19  ;;  %1333 = vmatmul.msk.f32.gmra.mxu0 %vm236_vm0, %v233_v13 }
  0x31   : > { %1328 = vmatmul.msk.f32.gmra.mxu3 %vm236_vm0, %v228_v14  ;;  %1338 = vmatmul.msk.f32.gmra.mxu1 %vm236_vm0, %v322_v20 }
  0x38   : > { %1324 = vmatmul.msk.f32.gmra.mxu2 %vm236_vm0, %v322_v20  ;;  %1334 = vmatmul.msk.f32.gmra.mxu0 %vm236_vm0, %v424_v22 }
  0x39   : > { %1329 = vmatmul.msk.f32.gmra.mxu3 %vm236_vm0, %v373_v21  ;;  %1339 = vmatmul.msk.f32.gmra.mxu1 %vm236_vm0, %v475_v23 }
  0x40   : > { %1341 = vmatmul.msk.f32.vlgmr.msra.gmra.mxu2 %vm236_vm0, %v227_v8  ;;  %1351 = vmatmul.msk.f32.vlgmr.msra.gmra.mxu0 %vm236_vm0, %v321_v19 }
  0x41   : > { %1346 = vmatmul.msk.f32.vlgmr.msra.gmra.mxu3 %vm236_vm0, %v232_v7 }
  0x48   : > { %1342 = vmatmul.msk.f32.gmra.mxu2 %vm236_vm0, %v228_v14  ;;  %1352 = vmatmul.msk.f32.gmra.mxu0 %vm236_vm0, %v322_v20  ;;  %v690_v20 = vadd.s32 8, %v1599_v3 }
  0x49   : > { %1347 = vmatmul.msk.f32.gmra.mxu3 %vm236_vm0, %v233_v13 }
  0x50   : > { %1343 = vmatmul.msk.f32.gmra.mxu2 %vm236_vm0, %v373_v21  ;;  %1353 = vmatmul.msk.f32.gmra.mxu0 %vm236_vm0, %v475_v23  ;;  %v1377_v21 = vld [vmem:[%s1743_s3 + $0x40] sm:$0xff]  ;;  %v1390_v23 = vld [vmem:[%s1743_s3 + $0x68] sm:$0xff] }
  0x51   : > { %1348 = vmatmul.msk.f32.gmra.mxu3 %vm236_vm0, %v424_v22  ;;  %v1384_v22 = vld [vmem:[%s1743_s3 + $0x58] sm:$0xff]  ;;  %1006 = vmatpush.msrb.mxu1 %v1377_v21 }
  0x52   : > { %1057 = vmatpush.msra.mxu2 %v1384_v22  ;;  %1109 = vmatpush.msra.mxu3 %v1390_v23 }
  0x58   : > { %1344 = vmatmul.msk.f32.gmra.mxu2 %vm236_vm0, %v526_v24  ;;  %1354 = vmatmul.msk.f32.gmra.mxu0 %vm236_vm0, %v628_v26  ;;  %v1383_v24 = vld [vmem:[%s1743_s3 + $0x50] sm:$0xff] }
  0x59   : > { %1349 = vmatmul.msk.f32.gmra.mxu3 %vm236_vm0, %v577_v25  ;;  %1058 = vmatpush.msra.mxu2 %v1383_v24 }
  0x60   : > { %1361 = vmatmul.msk.f32.vlgmr.msrb.gmra.mxu2 %vm765_vm1, %v773_v45  ;;  %v1395_v45 = vld [vmem:[%s1743_s3 + $0x70] sm:$0xff] }
  0x8d   : > { %v266_v27 = vpop.f32.mrf.mxu0 }
  0x8e   : > { %v307_v37 = vpop.f32.mrf.mxu1 }
  0x8f   : > { %v308_v52 = vadd.f32 %v307_v37, %v266_v27 }
  0x93   : > { %v272_v28 = vpop.f32.mrf.mxu2 }
  0x94   : > { %v313_v29 = vpop.f32.mrf.mxu3 }
  0x95   : > { %v269_v30 = vpop.f32.mrf.mxu0  ;;  %v314_v9 = vadd.f32 %v313_v29, %v272_v28 }
  0x96   : > { %v310_v48 = vpop.f32.mrf.mxu1 }
  0x97   : > { %v311_v61 = vadd.f32 %v310_v48, %v269_v30 }
  0x9b   : > { %v1563_v32 = vpop.f32.mrf.mxu2 }
  0x9c   : > { %v1565_v33 = vpop.f32.mrf.mxu3 }
  0x9d   : > { %v456_v34 = vpop.f32.mrf.mxu0  ;;  %v317_v30 = vadd.f32 %v1565_v33, %v1563_v32  ;;  %v691_v32 = vadd.s32 16, %v1599_v3  ;;  %v1396_v33 = vld [vmem:[%s1743_s3 + $0x78] sm:$0xff] }
  0x9e   : > { %v507_v57 = vpop.f32.mrf.mxu1  ;;  %1161 = vmatpush.msra.mxu0 %v1396_v33 }
  0x9f   : > { %v711_v54 = vand.u32 7, %v691_v32 }
  0xa0   : > { %1162 = vmatpush.msra.mxu0 %v1395_v45 }
  0xa1   : > { %vm1664_vm8 = vcmp.ge.s32.totalorder %v711_v54, 1  ;;  %vm1668_vm9 = vcmp.le.s32.totalorder %v711_v54, 4 }
  0xa2   : > { %vm751_vm10 = vmand %vm1664_vm8, %vm1668_vm9 }
  0xa3   : > { %v354_v35 = vpop.f32.mrf.mxu2 }
  0xa4   : > { %v405_v36 = vpop.f32.mrf.mxu3  ;;  %v366_v55 = vadd.f32 %v354_v35, %v308_v52  ;;  %v704_v35 = vand.u32 7, %v690_v20 }
  0xa5   : > { %v459_v38 = vpop.f32.mrf.mxu0 }
  0xa6   : > { %v417_v58 = vadd.f32 %v405_v36, %v366_v55  ;;  %v510_v6 = vpop.f32.mrf.mxu1  ;;  %vm1637_vm5 = vcmp.ge.s32.totalorder %v704_v35, 1  ;;  %vm1641_vm6 = vcmp.le.s32.totalorder %v704_v35, 4 }
  0xa7   : > { %vm750_vm7 = vmand %vm1637_vm5, %vm1641_vm6 }
  0xa8   : > { %v468_v63 = vadd.f32 %v456_v34, %v417_v58 }
  0xaa   : > { %v519_v4 = vadd.f32 %v507_v57, %v468_v63 }
  0xab   : > { %v357_v40 = vpop.f32.mrf.mxu2 }
  0xac   : > { %v408_v41 = vpop.f32.mrf.mxu3  ;;  %v367_v0 = vadd.f32 %v357_v40, %v311_v61 }
  0xad   : > { %v1576_v44 = vpop.f32.mrf.mxu0 }
  0xae   : > { %v418_v5 = vadd.f32 %v408_v41, %v367_v0  ;;  %v513_v36 = vpop.f32.mrf.mxu1 }
  0xb0   : > { %v469_v12 = vadd.f32 %v459_v38, %v418_v5 }
  0xb2   : > { %v520_v25 = vadd.f32 %v510_v6, %v469_v12 }
  0xb3   : > { %v360_v49 = vpop.f32.mrf.mxu2 }
  0xb4   : > { %v411_v50 = vpop.f32.mrf.mxu3  ;;  %v368_v13 = vadd.f32 %v360_v49, %v314_v9 }
  0xb5   : > { %v1594_v56 = vpop.f32.mrf.mxu0 }
  0xb6   : > { %v419_v26 = vadd.f32 %v411_v50, %v368_v13  ;;  %v516_v62 = vpop.f32.mrf.mxu1 }
  0xb8   : > { %v470_v37 = vadd.f32 %v1576_v44, %v419_v26  ;;  %v1389_v44 = vld [vmem:[%s1743_s3 + $0x60] sm:$0xff] }
  0xb9   : > { %1110 = vmatpush.msra.mxu3 %v1389_v44 }
  0xba   : > { %v521_v46 = vadd.f32 %v513_v36, %v470_v37 }
  0xbb   : > { %v363_v59 = vpop.f32.mrf.mxu2 }
  0xbc   : > { %v414_v60 = vpop.f32.mrf.mxu3  ;;  %v369_v38 = vadd.f32 %v363_v59, %v317_v30  ;;  %v1131_v30 = vld [vmem:[#allocation2 + $0x29] sm:$0xff] }
  0xbd   : > { %v660_v1 = vpop.f32.mrf.mxu0 }
  0xbe   : > { %v420_v47 = vadd.f32 %v414_v60, %v369_v38 }
  0xc0   : > { %v471_v55 = vadd.f32 %v1594_v56, %v420_v47  ;;  %v692_v56 = vadd.s32 24, %v1599_v3 }
  0xc3   : > { %v558_v7 = vpop.f32.mrf.mxu2 }
  0xc4   : > { %v609_v8 = vpop.f32.mrf.mxu3  ;;  %v570_v10 = vadd.f32 %v558_v7, %v519_v4  ;;  %v522_v4 = vadd.f32 %v516_v62, %v471_v55 }
  0xc5   : > { %v663_v19 = vpop.f32.mrf.mxu0 }
  0xc6   : > { %v621_v14 = vadd.f32 %v609_v8, %v570_v10  ;;  %v718_v10 = vand.u32 7, %v692_v56 }
  0xc8   : > { %v672_v16 = vadd.f32 %v660_v1, %v621_v14  ;;  %vm744_vm11 = vcmp.ge.s32.totalorder %v718_v10, 1  ;;  %vm748_vm12 = vcmp.le.s32.totalorder %v718_v10, 4 }
  0xc9   : > { %vm752_vm13 = vmand %vm744_vm11, %vm748_vm12 }
  0xca   : > { %v680_v27 = vadd.f32 %v1605_v15, %v672_v16 }
  0xcb   : > { %v561_v28 = vpop.f32.mrf.mxu2 }
  0xcc   : > { %v612_v29 = vpop.f32.mrf.mxu3  ;;  %v684_v31 = vmax.f32 %v680_v27, 0.0  ;;  %v571_v34 = vadd.f32 %v561_v28, %v520_v25 }
  0xcd   : > { %v666_v49 = vpop.f32.mrf.mxu0 }
  0xce   : > { %v761_v39 = vsel %vm749_vm4, %v684_v31, 0.0  ;;  %v622_v40 = vadd.f32 %v612_v29, %v571_v34  ;;  %v1079_v29 = vld [vmem:[#allocation2 + $0x28] sm:$0xff] }
  0xcf   : > { %769 = vst.msk [vmem:[#allocation2 + $0x8] sm:$0xff] %vm765_vm1, %v761_v39  ;;  %v1183_v31 = vld [vmem:[#allocation2 + $0x2a] sm:$0xff] }
  0xd0   : > { %v673_v41 = vadd.f32 %v663_v19, %v622_v40 }
  0xd2   : > { %v681_v48 = vadd.f32 %v1605_v15, %v673_v41 }
  0xd3   : > { %v564_v50 = vpop.f32.mrf.mxu2 }
  0xd4   : > { %v615_v51 = vpop.f32.mrf.mxu3  ;;  %v685_v52 = vmax.f32 %v681_v48, 0.0  ;;  %v572_v53 = vadd.f32 %v564_v50, %v521_v46 }
  0xd5   : > { %v669_v11 = vpop.f32.mrf.mxu0 }
  0xd6   : > { %v762_v57 = vsel %vm750_vm7, %v685_v52, 0.0  ;;  %v623_v58 = vadd.f32 %v615_v51, %v572_v53  ;;  %v779_v59 = vld [vmem:[#allocation2 + $0x1] sm:$0xff] }
  0xd7   : > { %v774_v60 = vld [vmem:[#allocation2 + $0x8] sm:$0xff]  ;;  %770 = vst.msk [vmem:[#allocation2 + $0x10] sm:$0xff] %vm765_vm1, %v762_v57  ;;  %1357 = vmatmul.msk.f32.vlgmr.msra.gmra.mxu1 %vm765_vm1, %v779_v59 }
  0xd8   : > { %v868_v61 = vld [vmem:[#allocation2 + $0x2] sm:$0xff]  ;;  %1362 = vmatmul.msk.f32.gmra.mxu2 %vm765_vm1, %v774_v60  ;;  %v674_v63 = vadd.f32 %v666_v49, %v623_v58  ;;  %1373 = vmatmul.msk.f32.vlgmr.msrb.gmra.mxu0 %vm765_vm1, %v774_v60 }
  0xd9   : > { %1367 = vmatmul.msk.f32.vlgmr.msrb.gmra.mxu3 %vm765_vm1, %v868_v61  ;;  %1213 = vmatpush.msra.mxu1 %v1402_v2 }
  0xda   : > { %v682_v5 = vadd.f32 %v1605_v15, %v674_v63 }
  0xdb   : > { %v567_v6 = vpop.f32.mrf.mxu2 }
  0xdc   : > { %v618_v7 = vpop.f32.mrf.mxu3  ;;  %v686_v8 = vmax.f32 %v682_v5, 0.0  ;;  %v573_v9 = vadd.f32 %v567_v6, %v522_v4 }
  0xde   : > { %v763_v3 = vsel %vm751_vm10, %v686_v8, 0.0  ;;  %v624_v12 = vadd.f32 %v618_v7, %v573_v9  ;;  %v780_v13 = vld [vmem:[#allocation2 + $0x9] sm:$0xff]  ;;  %v1423_v7 = vld [vmem:[%s1744_s4] ss:$0 sm:$0xff] }
  0xdf   : > { %v775_v14 = vld [vmem:[#allocation2 + $0x10] sm:$0xff]  ;;  %771 = vst.msk [vmem:[#allocation2 + $0x18] sm:$0xff] %vm765_vm1, %v763_v3  ;;  %1358 = vmatmul.msk.f32.gmra.mxu1 %vm765_vm1, %v780_v13 }
  0xe0   : > { %v869_v16 = vld [vmem:[#allocation2 + $0xa] sm:$0xff]  ;;  %1363 = vmatmul.msk.f32.gmra.mxu2 %vm765_vm1, %v775_v14  ;;  %v675_v17 = vadd.f32 %v669_v11, %v624_v12  ;;  %1374 = vmatmul.msk.f32.gmra.mxu0 %vm765_vm1, %v775_v14 }
  0xe1   : > { %1368 = vmatmul.msk.f32.gmra.mxu3 %vm765_vm1, %v869_v16 }
  0xe2   : > { %v683_v18 = vadd.f32 %v1605_v15, %v675_v17  ;;  %v1401_v15 = vld [vmem:[%s1743_s3 + $0x80] sm:$0xff] }
  0xe3   : > { %1214 = vmatpush.msra.mxu1 %v1401_v15  ;;  %v856_v36 = vpop.f32.mrf.mxu2 }
  0xe4   : > { %v687_v19 = vmax.f32 %v683_v18, 0.0 }
  0xe6   : > { %v764_v20 = vsel %vm752_vm13, %v687_v19, 0.0  ;;  %v781_v21 = vld [vmem:[#allocation2 + $0x11] sm:$0xff] }
  0xe7   : > { %v776_v22 = vld [vmem:[#allocation2 + $0x18] sm:$0xff]  ;;  %772 = vst.msk [vmem:[#allocation2 + $0x20] sm:$0xff] %vm765_vm1, %v764_v20  ;;  %1359 = vmatmul.msk.f32.gmra.mxu1 %vm765_vm1, %v781_v21 }
  0xe8   : > { %v870_v23 = vld [vmem:[#allocation2 + $0x12] sm:$0xff]  ;;  %1364 = vmatmul.msk.f32.gmra.mxu2 %vm765_vm1, %v776_v22  ;;  %1375 = vmatmul.msk.f32.gmra.mxu0 %vm765_vm1, %v776_v22 }
  0xe9   : > { %1369 = vmatmul.msk.f32.gmra.mxu3 %vm765_vm1, %v870_v23 }
  0xee   : > { %v782_v24 = vld [vmem:[#allocation2 + $0x19] sm:$0xff]  ;;  %v1027_v27 = vld [vmem:[#allocation2 + $0x22] sm:$0xff] }
  0xef   : > { %v871_v25 = vld [vmem:[#allocation2 + $0x1a] sm:$0xff]  ;;  %1360 = vmatmul.msk.f32.gmra.mxu1 %vm765_vm1, %v782_v24 }
  0xf0   : > { %v923_v26 = vld [vmem:[#allocation2 + $0x20] sm:$0xff]  ;;  %1385 = vmatmul.msk.f32.vlgmr.msra.gmra.mxu2 %vm765_vm1, %v869_v16 }
  0xf1   : > { %1370 = vmatmul.msk.f32.gmra.mxu3 %vm765_vm1, %v871_v25  ;;  %1376 = vmatmul.msk.f32.gmra.mxu0 %vm765_vm1, %v923_v26  ;;  %v1130_v28 = vld [vmem:[#allocation2 + $0x21] sm:$0xff] }
  0xf7   : > { %1379 = vmatmul.msk.f32.vlgmr.msrb.gmra.mxu1 %vm765_vm1, %v780_v13 }
  0xf8   : > { %1386 = vmatmul.msk.f32.gmra.mxu2 %vm765_vm1, %v870_v23 }
  0xf9   : > { %1391 = vmatmul.msk.f32.vlgmr.msra.gmra.mxu3 %vm765_vm1, %v775_v14  ;;  %1397 = vmatmul.msk.f32.vlgmr.msra.gmra.mxu0 %vm765_vm1, %v781_v21 }
  0xff   : > { %1380 = vmatmul.msk.f32.gmra.mxu1 %vm765_vm1, %v781_v21 }
 0x100   : > { %1387 = vmatmul.msk.f32.gmra.mxu2 %vm765_vm1, %v871_v25 }
 0x101   : > { %1392 = vmatmul.msk.f32.gmra.mxu3 %vm765_vm1, %v776_v22  ;;  %1398 = vmatmul.msk.f32.gmra.mxu0 %vm765_vm1, %v782_v24 }
 0x107   : > { %1381 = vmatmul.msk.f32.gmra.mxu1 %vm765_vm1, %v782_v24 }
 0x108   : > { %1388 = vmatmul.msk.f32.gmra.mxu2 %vm765_vm1, %v1027_v27 }
 0x109   : > { %1393 = vmatmul.msk.f32.gmra.mxu3 %vm765_vm1, %v923_v26  ;;  %1399 = vmatmul.msk.f32.gmra.mxu0 %vm765_vm1, %v1130_v28 }
 0x10f   : > { %1382 = vmatmul.msk.f32.gmra.mxu1 %vm765_vm1, %v1130_v28 }
 0x111   : > { %1394 = vmatmul.msk.f32.gmra.mxu3 %vm765_vm1, %v1079_v29  ;;  %1400 = vmatmul.msk.f32.gmra.mxu0 %vm765_vm1, %v1131_v30 }
 0x117   : > { %1403 = vmatmul.msk.f32.vlgmr.msra.gmra.mxu1 %vm765_vm1, %v870_v23 }
 0x11f   : > { %1404 = vmatmul.msk.f32.gmra.mxu1 %vm765_vm1, %v871_v25 }
 0x127   : > { %1405 = vmatmul.msk.f32.gmra.mxu1 %vm765_vm1, %v1027_v27 }
 0x12f   : > { %1406 = vmatmul.msk.f32.gmra.mxu1 %vm765_vm1, %v1183_v31 }
 0x154   : > { %v815_v34 = vpop.f32.mrf.mxu1 }
 0x155   : > { %v956_v38 = vpop.f32.mrf.mxu0  ;;  %v857_v49 = vadd.f32 %v856_v36, %v815_v34 }
 0x15b   : > { %v859_v40 = vpop.f32.mrf.mxu2 }
 0x15c   : > { %v818_v35 = vpop.f32.mrf.mxu1  ;;  %v904_v37 = vpop.f32.mrf.mxu3 }
 0x15d   : > { %v959_v43 = vpop.f32.mrf.mxu0  ;;  %v916_v51 = vadd.f32 %v904_v37, %v857_v49  ;;  %v860_v57 = vadd.f32 %v859_v40, %v818_v35 }
 0x15f   : > { %v968_v55 = vadd.f32 %v956_v38, %v916_v51 }
 0x163   : > { %v862_v32 = vpop.f32.mrf.mxu2 }
 0x164   : > { %v821_v39 = vpop.f32.mrf.mxu1  ;;  %v907_v41 = vpop.f32.mrf.mxu3 }
 0x165   : > { %v962_v45 = vpop.f32.mrf.mxu0  ;;  %v917_v59 = vadd.f32 %v907_v41, %v860_v57  ;;  %v863_v2 = vadd.f32 %v862_v32, %v821_v39 }
 0x167   : > { %v969_v1 = vadd.f32 %v959_v43, %v917_v59 }
 0x16b   : > { %v865_v46 = vpop.f32.mrf.mxu2 }
 0x16c   : > { %v824_v42 = vpop.f32.mrf.mxu1  ;;  %v910_v33 = vpop.f32.mrf.mxu3 }
 0x16d   : > { %v918_v5 = vadd.f32 %v910_v33, %v863_v2  ;;  %v866_v14 = vadd.f32 %v865_v46, %v824_v42 }
 0x16e   : > { %v965_v50 = vpop.f32.mrf.mxu0 }
 0x16f   : > { %v970_v12 = vadd.f32 %v962_v45, %v918_v5 }
 0x173   : > { %v1060_v53 = vpop.f32.mrf.mxu2 }
 0x174   : > { %v1008_v44 = vpop.f32.mrf.mxu1  ;;  %v913_v47 = vpop.f32.mrf.mxu3 }
 0x175   : > { %v1020_v58 = vadd.f32 %v1008_v44, %v968_v55  ;;  %v919_v20 = vadd.f32 %v913_v47, %v866_v14 }
 0x176   : > { %v1164_v60 = vpop.f32.mrf.mxu0 }
 0x177   : > { %v1072_v62 = vadd.f32 %v1060_v53, %v1020_v58  ;;  %v971_v25 = vadd.f32 %v965_v50, %v919_v20 }
 0x17b   : > { %v1063_v63 = vpop.f32.mrf.mxu2 }
 0x17c   : > { %v1011_v48 = vpop.f32.mrf.mxu1  ;;  %v1112_v54 = vpop.f32.mrf.mxu3 }
 0x17d   : > { %v1124_v0 = vadd.f32 %v1112_v54, %v1072_v62  ;;  %v1021_v4 = vadd.f32 %v1011_v48, %v969_v1 }
 0x17e   : > { %v1167_v11 = vpop.f32.mrf.mxu0 }
 0x17f   : > { %v1176_v6 = vadd.f32 %v1164_v60, %v1124_v0  ;;  %v1073_v9 = vadd.f32 %v1063_v63, %v1021_v4 }
 0x183   : > { %v1066_v16 = vpop.f32.mrf.mxu2 }
 0x184   : > { %v1014_v52 = vpop.f32.mrf.mxu1  ;;  %v1115_v56 = vpop.f32.mrf.mxu3 }
 0x185   : > { %v1125_v3 = vadd.f32 %v1115_v56, %v1073_v9  ;;  %v1022_v17 = vadd.f32 %v1014_v52, %v970_v12 }
 0x186   : > { %v1170_v27 = vpop.f32.mrf.mxu0 }
 0x187   : > { %v1177_v21 = vadd.f32 %v1167_v11, %v1125_v3  ;;  %v1074_v23 = vadd.f32 %v1066_v16, %v1022_v17 }
 0x18b   : > { %v1069_v30 = vpop.f32.mrf.mxu2 }
 0x18c   : > { %v1017_v61 = vpop.f32.mrf.mxu1  ;;  %v1118_v19 = vpop.f32.mrf.mxu3 }
 0x18d   : > { %v1126_v24 = vadd.f32 %v1118_v19, %v1074_v23  ;;  %v1023_v28 = vadd.f32 %v1017_v61, %v971_v25 }
 0x18e   : > { %v1173_v40 = vpop.f32.mrf.mxu0 }
 0x18f   : > { %v1178_v31 = vadd.f32 %v1170_v27, %v1126_v24  ;;  %v1075_v36 = vadd.f32 %v1069_v30, %v1023_v28 }
 0x194   : > { %v1216_v8 = vpop.f32.mrf.mxu1  ;;  %v1121_v34 = vpop.f32.mrf.mxu3 }
 0x195   : > { %v1228_v10 = vadd.f32 %v1216_v8, %v1176_v6  ;;  %v1127_v38 = vadd.f32 %v1121_v34, %v1075_v36 }
 0x197   : > { %v1236_v13 = vadd.f32 %v1423_v7, %v1228_v10  ;;  %v1179_v42 = vadd.f32 %v1173_v40, %v1127_v38 }
 0x199   : > { %v1240_v18 = vmax.f32 %v1236_v13, 0.0 }
 0x19b   : > { %1244 = vst.msk [vmem:[%s1727_s14] sm:$0xff] %vm765_vm1, %v1240_v18 }
 0x19c   : > { %v1219_v22 = vpop.f32.mrf.mxu1 }
 0x19d   : > { %v1229_v15 = vadd.f32 %v1219_v22, %v1177_v21 }
 0x19f   : > { %v1237_v26 = vadd.f32 %v1423_v7, %v1229_v15 }
 0x1a1   : > { %v1241_v29 = vmax.f32 %v1237_v26, 0.0 }
 0x1a3   : > { %1245 = vst.msk [vmem:[%s1727_s14 + $0x8] sm:$0xff] %vm765_vm1, %v1241_v29 }
 0x1a4   : > { %v1222_v35 = vpop.f32.mrf.mxu1 }
 0x1a5   : > { %v1230_v37 = vadd.f32 %v1222_v35, %v1178_v31 }
 0x1a7   : > { %v1238_v39 = vadd.f32 %v1423_v7, %v1230_v37 }
 0x1a9   : > { %v1242_v41 = vmax.f32 %v1238_v39, 0.0 }
 0x1ab   : > { %1246 = vst.msk [vmem:[%s1727_s14 + $0x10] sm:$0xff] %vm765_vm1, %v1242_v41 }
 0x1ac   : > { %v1225_v43 = vpop.f32.mrf.mxu1 }
 0x1ad   : > { %v1231_v32 = vadd.f32 %v1225_v43, %v1179_v42 }
 0x1af   : > { %v1239_v33 = vadd.f32 %v1423_v7, %v1231_v32 }
 0x1b1   : > { %v1243_v44 = vmax.f32 %v1239_v33, 0.0 }
 0x1b3   : > { %1247 = vst.msk [vmem:[%s1727_s14 + $0x18] sm:$0xff] %vm765_vm1, %v1243_v44 }
 0x1b4 PF: > { %s15_s18 = sadd.s32 1, %s1430_s18  }
 0x1b5   : > { %p12_p4 = scmp.ge.s32.totalorder %s15_s18, 4  }
 0x1b7   :  { %14 = sbr.rel (!%p12_p4) target bundleno = 1 (0x1), region = 86 }

// kernel: encoder_forward.5
= control target key start
LH: loop header
LB: loop body
LE: loop exit
PB: predicated region body
PF: predicated region fallthrough
CT: control target
= control target key end

     0   :  { %s1150_s18 = smov 0   ;;  %s1396_s0 = inlined_call_operand.vmem [shape: f32[2,40,16], index: 0, kind: input, shape index: {}]   ;;  %s1397_s1 = inlined_call_operand.vmem [shape: f32[9,16,32], index: 1, kind: input, shape index: {}]   ;;  %s1398_s2 = inlined_call_operand.vmem [shape: f32[1,32], index: 2, kind: input, shape index: {}]   ;;  %s1399_s3 = inlined_call_operand.vmem [shape: f32[9,32,32], index: 3, kind: input, shape index: {}]   ;;  %s1400_s4 = inlined_call_operand.vmem [shape: f32[1,32], index: 4, kind: input, shape index: {}]   ;;  %s1401_s5 = inlined_call_operand.vmem [shape: f32[2,16,32], index: 5, kind: output, shape index: {}]  }
   0x1 LB: > { %s1000_s19 = sadd.s32 4294967295, %s1117_s18   ;;  %p1004_p0 = scmp.ge.s32.totalorder %s1117_s18, 1  ;;  %s1117_s18 = sphi %s1150_s18, %s15_s18  }
   0x2   : > { %p187_p1 = scmp.lt.s32.totalorder %s1117_s18, 3 }
   0x4   : > { %p188_p2 = pnand %p1004_p0, %p187_p1 }
   0x5   : > { %p215_p3 = scmp.lt.s32.totalorder (!%p188_p2), %s1000_s19, 1 }
   0x6   : > { %191 = sbr.rel (%p188_p2) target bundleno = 367 (0x16f), region = 40 }
   0xb   : > { %v1009_v0 = vld [vmem:[%s1397_s1 + $0x18] sm:$0xff]  ;;  %v228_v1 = vld [vmem:[%s1397_s1 + $0x8] sm:$0xff]  ;;  %v1008_v2 = vld [vmem:[%s1397_s1 + $0x10] sm:$0xff]  ;;  %s1403_s19 = smov (!%p215_p3, %s1000_s19), 1  ;;  %vm234_vm0 = vcmask 130048   ;;  %vm592_vm1 = vcmask 261120  }
   0xc   : > { %1095 = vmatpush.msra.mxu2 %v1009_v0  ;;  %1097 = vmatpush.msra.mxu3 %v228_v1  ;;  %v227_v3 = vld [vmem:[%s1397_s1] sm:$0xff]  ;;  %v1015_v4 = vld [vmem:[%s1397_s1 + $0x28] sm:$0xff]  ;;  %v1019_v5 = vld [vmem:[%s1397_s1 + $0x38] sm:$0xff]  ;;  %s1099_s11 = smul.u32 40, %s1403_s19  ;;  %v1119_v32 = vmov 0.0   ;;  %s1094_s21 = sshll.u32 %s1403_s19, 4 }
   0xd   : > { %255 = vmatpush.msra.mxu0 %v1009_v0  ;;  %284 = vmatpush.msra.mxu1 %v228_v1  ;;  %v1014_v6 = vld [vmem:[%s1397_s1 + $0x20] sm:$0xff]  ;;  %v1018_v7 = vld [vmem:[%s1397_s1 + $0x30] sm:$0xff]  ;;  %v1023_v8 = vld [vmem:[%s1397_s1 + $0x48] sm:$0xff]  ;;  %593 = vst.msk [vmem:[#allocation2] sm:$0xff] %vm592_vm1, %v1119_v32  ;;  %s224_s24 = scalar_lea.vmem %s1401_s5, %s1094_s21 }
   0xe   : > { %1096 = vmatpush.msra.mxu2 %v1008_v2  ;;  %1098 = vmatpush.msra.mxu3 %v227_v3  ;;  %v1027_v9 = vld [vmem:[%s1397_s1 + $0x58] sm:$0xff]  ;;  %v1031_v10 = vld [vmem:[%s1397_s1 + $0x68] sm:$0xff]  ;;  %s1197_s22 = scalar_lea.vmem %s1396_s0, %s1099_s11  ;;  %v1022_v14 = vld [vmem:[%s1397_s1 + $0x40] sm:$0xff]  ;;  %594 = vst.msk [vmem:[#allocation2 + $0x18] sm:$0xff] %vm592_vm1, %v1119_v32 }
   0xf   : > { %256 = vmatpush.msra.mxu0 %v1008_v2  ;;  %285 = vmatpush.msra.mxu1 %v227_v3  ;;  %v1035_v11 = vld [vmem:[%s1397_s1 + $0x78] sm:$0xff]  ;;  %v230_v12 = vld [vmem:[%s1197_s22 + $0x9] sm:$0xff]  ;;  %v229_v15 = vld [vmem:[%s1197_s22 + $0x1] sm:$0xff]  ;;  %595 = vst.msk [vmem:[#allocation2 + $0x20] sm:$0xff] %vm592_vm1, %v1119_v32 }
  0x10   : > { %318 = vmatpush.msrb.mxu2 %v1015_v4  ;;  %354 = vmatpush.msrb.mxu3 %v1019_v5  ;;  %v226_v13 = vld [vmem:[%s1197_s22 + $0x8] sm:$0xff]  ;;  %v225_v16 = vld [vmem:[%s1197_s22] sm:$0xff]  ;;  %v1034_v18 = vld [vmem:[%s1397_s1 + $0x70] sm:$0xff]  ;;  %v553_v4 = vlaneseq }
  0x11   : > { %390 = vmatpush.msrb.mxu0 %v1023_v8  ;;  %426 = vmatpush.msrb.mxu1 %v1027_v9  ;;  %v1030_v17 = vld [vmem:[%s1397_s1 + $0x60] sm:$0xff]  ;;  %v1039_v19 = vld [vmem:[%s1397_s1 + $0x88] sm:$0xff]  ;;  %v1026_v20 = vld [vmem:[%s1397_s1 + $0x50] sm:$0xff] }
  0x12   : > { %319 = vmatpush.msrb.mxu2 %v1014_v6  ;;  %355 = vmatpush.msrb.mxu3 %v1018_v7  ;;  %v1038_v21 = vld [vmem:[%s1397_s1 + $0x80] sm:$0xff]  ;;  %v294_v23 = vld [vmem:[%s1197_s22 + $0xa] sm:$0xff]  ;;  %v402_v26 = vld [vmem:[%s1197_s22 + $0x12] sm:$0xff]  ;;  %v554_v9 = vshrl.u32 %v553_v4, 7 }
  0x13   : > { %1011 = vmatmul.msk.f32.vlgmr.msra.gmra.mxu2 %vm234_vm0, %v230_v12  ;;  %1013 = vmatmul.msk.f32.vlgmr.msra.gmra.mxu3 %vm234_vm0, %v226_v13  ;;  %v293_v22 = vld [vmem:[%s1197_s22 + $0x2] sm:$0xff]  ;;  %v330_v24 = vld [vmem:[%s1197_s22 + $0x10] sm:$0xff]  ;;  %v438_v27 = vld [vmem:[%s1197_s22 + $0x18] sm:$0xff] }
  0x14   : > { %462 = vmatpush.msra.mxu2 %v1031_v10  ;;  %1010 = vmatmul.msk.f32.vlgmr.msra.gmra.mxu0 %vm234_vm0, %v229_v15  ;;  %v366_v25 = vld [vmem:[%s1197_s22 + $0x11] sm:$0xff]  ;;  %v474_v28 = vld [vmem:[%s1197_s22 + $0x19] sm:$0xff]  ;;  %v601_v36 = vld [vmem:[%s1399_s3 + $0x8] sm:$0xff] }
  0x15   : > { %1012 = vmatmul.msk.f32.vlgmr.msra.gmra.mxu1 %vm234_vm0, %v225_v16  ;;  %498 = vmatpush.msra.mxu3 %v1035_v11  ;;  %v510_v29 = vld [vmem:[%s1197_s22 + $0x1a] sm:$0xff]  ;;  %v602_v33 = vld [vmem:[%s1399_s3 + $0x10] sm:$0xff]  ;;  %v1043_v49 = vld [vmem:[%s1399_s3 + $0x28] sm:$0xff] }
  0x16   : > { %391 = vmatpush.msrb.mxu0 %v1022_v14  ;;  %463 = vmatpush.msra.mxu2 %v1030_v17  ;;  %v603_v31 = vld [vmem:[%s1399_s3 + $0x18] sm:$0xff]  ;;  %v600_v37 = vld [vmem:[%s1399_s3] sm:$0xff]  ;;  %v1044_v41 = vld [vmem:[%s1399_s3 + $0x30] sm:$0xff] }
  0x17   : > { %499 = vmatpush.msra.mxu3 %v1034_v18  ;;  %427 = vmatpush.msrb.mxu1 %v1026_v20  ;;  %v598_v39 = vld [vmem:[#allocation2] sm:$0xff]  ;;  %v1045_v40 = vld [vmem:[%s1399_s3 + $0x38] sm:$0xff]  ;;  %v1052_v45 = vld [vmem:[%s1399_s3 + $0x50] sm:$0xff] }
  0x18   : > { %534 = vmatpush.msra.mxu0 %v1039_v19  ;;  %v1053_v42 = vld [vmem:[%s1399_s3 + $0x58] sm:$0xff]  ;;  %v1058_v46 = vld [vmem:[%s1399_s3 + $0x70] sm:$0xff]  ;;  %v1051_v50 = vld [vmem:[%s1399_s3 + $0x48] sm:$0xff] }
  0x19   : > { %629 = vmatpush.msra.mxu1 %v1045_v40  ;;  %v1059_v43 = vld [vmem:[%s1399_s3 + $0x78] sm:$0xff]  ;;  %v1057_v51 = vld [vmem:[%s1399_s3 + $0x68] sm:$0xff]  ;;  %v1042_v53 = vld [vmem:[%s1399_s3 + $0x20] sm:$0xff] }
  0x1a   : > { %535 = vmatpush.msra.mxu0 %v1038_v21  ;;  %v1050_v54 = vld [vmem:[%s1399_s3 + $0x40] sm:$0xff]  ;;  %v1065_v58 = vld [vmem:[%s1399_s3 + $0x98] sm:$0xff]  ;;  %v1070_v60 = vld [vmem:[%s1399_s3 + $0xb0] sm:$0xff] }
  0x1b   : > { %1016 = vmatmul.msk.f32.vlgmr.msrb.gmra.mxu2 %vm234_vm0, %v293_v22  ;;  %1020 = vmatmul.msk.f32.vlgmr.msrb.gmra.mxu3 %vm234_vm0, %v226_v13  ;;  %v1056_v56 = vld [vmem:[%s1399_s3 + $0x60] sm:$0xff]  ;;  %v1071_v59 = vld [vmem:[%s1399_s3 + $0xb8] sm:$0xff]  ;;  %v1064_v61 = vld [vmem:[%s1399_s3 + $0x90] sm:$0xff] }
  0x1c   : > { %1024 = vmatmul.msk.f32.vlgmr.msrb.gmra.mxu0 %vm234_vm0, %v230_v12  ;;  %658 = vmatpush.msrb.mxu2 %v603_v31  ;;  %v1077_v62 = vld [vmem:[%s1399_s3 + $0xd8] sm:$0xff]  ;;  %v1069_v0 = vld [vmem:[%s1399_s3 + $0xa8] sm:$0xff]  ;;  %v1068_v5 = vld [vmem:[%s1399_s3 + $0xa0] sm:$0xff]  ;;  %v555_v31 = vadd.s32 8, %v554_v9 }
  0x1d   : > { %1028 = vmatmul.msk.f32.vlgmr.msrb.gmra.mxu1 %vm234_vm0, %v294_v23  ;;  %694 = vmatpush.msrb.mxu3 %v1053_v42  ;;  %v1063_v10 = vld [vmem:[%s1399_s3 + $0x88] sm:$0xff]  ;;  %v1083_v11 = vld [vmem:[%s1399_s3 + $0xf8] sm:$0xff]  ;;  %v1076_v12 = vld [vmem:[%s1399_s3 + $0xd0] sm:$0xff] }
  0x1e   : > { %659 = vmatpush.msrb.mxu2 %v602_v33  ;;  %732 = vmatpush.msrb.mxu0 %v1059_v43  ;;  %v1082_v13 = vld [vmem:[%s1399_s3 + $0xf0] sm:$0xff]  ;;  %v1062_v14 = vld [vmem:[%s1399_s3 + $0x80] sm:$0xff]  ;;  %v1075_v15 = vld [vmem:[%s1399_s3 + $0xc8] sm:$0xff] }
  0x1f   : > { %630 = vmatpush.msra.mxu1 %v1044_v41  ;;  %695 = vmatpush.msrb.mxu3 %v1052_v45  ;;  %v1081_v19 = vld [vmem:[%s1399_s3 + $0xe8] sm:$0xff]  ;;  %v1074_v22 = vld [vmem:[%s1399_s3 + $0xc0] sm:$0xff]  ;;  %v1089_v45 = vld [vmem:[%s1399_s3 + $0x118] sm:$0xff] }
  0x20   : > { %660 = vmatpush.msrb.mxu2 %v601_v36  ;;  %733 = vmatpush.msrb.mxu0 %v1058_v46 }
  0x21   : > { %631 = vmatpush.msra.mxu1 %v1043_v49  ;;  %696 = vmatpush.msrb.mxu3 %v1051_v50  ;;  %v1088_v50 = vld [vmem:[%s1399_s3 + $0x110] sm:$0xff] }
  0x22   : > { %661 = vmatpush.msrb.mxu2 %v600_v37  ;;  %734 = vmatpush.msrb.mxu0 %v1057_v51  ;;  %v1087_v51 = vld [vmem:[%s1399_s3 + $0x108] sm:$0xff] }
  0x23   : > { %1017 = vmatmul.msk.f32.gmra.mxu2 %vm234_vm0, %v294_v23  ;;  %1021 = vmatmul.msk.f32.gmra.mxu3 %vm234_vm0, %v330_v24 }
  0x24   : > { %1025 = vmatmul.msk.f32.gmra.mxu0 %vm234_vm0, %v366_v25  ;;  %632 = vmatpush.msra.mxu1 %v1042_v53 }
  0x25   : > { %1029 = vmatmul.msk.f32.gmra.mxu1 %vm234_vm0, %v402_v26  ;;  %697 = vmatpush.msrb.mxu3 %v1050_v54 }
  0x26   : > { %735 = vmatpush.msrb.mxu0 %v1056_v56  ;;  %770 = vmatpush.msrb.mxu1 %v1065_v58  ;;  %v822_v58 = vld [vmem:[#allocation2 + $0x18] sm:$0xff] }
  0x28   : > { %771 = vmatpush.msrb.mxu1 %v1064_v61 }
  0x2a   : > { %772 = vmatpush.msrb.mxu1 %v1063_v10 }
  0x2b   : > { %1032 = vmatmul.msk.f32.vlgmr.msra.gmra.mxu2 %vm234_vm0, %v330_v24  ;;  %1036 = vmatmul.msk.f32.vlgmr.msra.gmra.mxu3 %vm234_vm0, %v366_v25  ;;  %v560_v24 = vand.u32 7, %v554_v9  ;;  %v1080_v25 = vld [vmem:[%s1399_s3 + $0xe0] sm:$0xff] }
  0x2c   : > { %1040 = vmatmul.msk.f32.vlgmr.msra.gmra.mxu0 %vm234_vm0, %v402_v26  ;;  %808 = vmatpush.msra.mxu2 %v1071_v59  ;;  %v860_v59 = vld [vmem:[#allocation2 + $0x19] sm:$0xff] }
  0x2d   : > { %846 = vmatpush.msra.mxu3 %v1077_v62  ;;  %884 = vmatpush.msra.mxu0 %v1083_v11  ;;  %vm580_vm2 = vcmp.ge.s32.totalorder %v560_v24, 1  ;;  %vm582_vm3 = vcmp.le.s32.totalorder %v560_v24, 2 }
  0x2e   : > { %809 = vmatpush.msra.mxu2 %v1070_v60  ;;  %773 = vmatpush.msrb.mxu1 %v1062_v14  ;;  %vm584_vm4 = vmand %vm580_vm2, %vm582_vm3  ;;  %v898_v60 = vld [vmem:[#allocation2 + $0x1a] sm:$0xff] }
  0x2f   : > { %847 = vmatpush.msra.mxu3 %v1076_v12  ;;  %885 = vmatpush.msra.mxu0 %v1082_v13 }
  0x30   : > { %810 = vmatpush.msra.mxu2 %v1069_v0 }
  0x31   : > { %848 = vmatpush.msra.mxu3 %v1075_v15  ;;  %886 = vmatpush.msra.mxu0 %v1081_v19 }
  0x32   : > { %811 = vmatpush.msra.mxu2 %v1068_v5 }
  0x33   : > { %1033 = vmatmul.msk.f32.gmra.mxu2 %vm234_vm0, %v438_v27  ;;  %1037 = vmatmul.msk.f32.gmra.mxu3 %vm234_vm0, %v474_v28  ;;  %v1109_v28 = vld [vmem:[%s1398_s2] ss:$0 sm:$0xff] }
  0x34   : > { %1041 = vmatmul.msk.f32.gmra.mxu0 %vm234_vm0, %v510_v29  ;;  %849 = vmatpush.msra.mxu3 %v1074_v22  ;;  %v1110_v22 = vld [vmem:[%s1400_s4] ss:$0 sm:$0xff] }
  0x35   : > { %887 = vmatpush.msra.mxu0 %v1080_v25 }
  0x3b   : > { %1048 = vmatmul.msk.f32.vlgmr.msrb.gmra.mxu2 %vm592_vm1, %v598_v39 }
  0x91   : > { %v258_v30 = vpop.f32.mrf.mxu0 }
  0x92   : > { %v287_v44 = vpop.f32.mrf.mxu1 }
  0x93   : > { %v288_v52 = vadd.f32 %v287_v44, %v258_v30 }
  0x96   : > { %v261_v34 = vpop.f32.mrf.mxu2  ;;  %v290_v35 = vpop.f32.mrf.mxu3 }
  0x97   : > { %v291_v3 = vadd.f32 %v290_v35, %v261_v34 }
  0x99   : > { %v393_v38 = vpop.f32.mrf.mxu0 }
  0x9a   : > { %v429_v6 = vpop.f32.mrf.mxu1 }
  0x9e   : > { %v321_v47 = vpop.f32.mrf.mxu2  ;;  %v357_v48 = vpop.f32.mrf.mxu3 }
  0x9f   : > { %v327_v55 = vadd.f32 %v321_v47, %v288_v52  ;;  %v1086_v52 = vld [vmem:[%s1399_s3 + $0x100] sm:$0xff] }
  0xa1   : > { %v396_v57 = vpop.f32.mrf.mxu0  ;;  %v363_v63 = vadd.f32 %v357_v48, %v327_v55 }
  0xa2   : > { %v432_v29 = vpop.f32.mrf.mxu1 }
  0xa3   : > { %v399_v7 = vadd.f32 %v393_v38, %v363_v63  ;;  %v567_v38 = vand.u32 7, %v555_v31 }
  0xa5   : > { %v435_v16 = vadd.f32 %v429_v6, %v399_v7  ;;  %vm581_vm5 = vcmp.ge.s32.totalorder %v567_v38, 1  ;;  %vm583_vm6 = vcmp.le.s32.totalorder %v567_v38, 2 }
  0xa6   : > { %v324_v1 = vpop.f32.mrf.mxu2  ;;  %v360_v2 = vpop.f32.mrf.mxu3  ;;  %vm585_vm7 = vmand %vm581_vm5, %vm583_vm6 }
  0xa7   : > { %v328_v8 = vadd.f32 %v324_v1, %v291_v3 }
  0xa9   : > { %v364_v17 = vadd.f32 %v360_v2, %v328_v8  ;;  %v537_v18 = vpop.f32.mrf.mxu0 }
  0xab   : > { %v400_v26 = vadd.f32 %v396_v57, %v364_v17 }
  0xad   : > { %v436_v32 = vadd.f32 %v432_v29, %v400_v26 }
  0xae   : > { %v465_v20 = vpop.f32.mrf.mxu2  ;;  %v501_v21 = vpop.f32.mrf.mxu3 }
  0xaf   : > { %v471_v23 = vadd.f32 %v465_v20, %v435_v16 }
  0xb1   : > { %v507_v27 = vadd.f32 %v501_v21, %v471_v23  ;;  %v540_v39 = vpop.f32.mrf.mxu0 }
  0xb3   : > { %v543_v30 = vadd.f32 %v537_v18, %v507_v27 }
  0xb5   : > { %v549_v33 = vadd.f32 %v1109_v28, %v543_v30 }
  0xb6   : > { %v468_v34 = vpop.f32.mrf.mxu2  ;;  %v504_v35 = vpop.f32.mrf.mxu3 }
  0xb7   : > { %v551_v36 = vmax.f32 %v549_v33, 0.0  ;;  %v472_v37 = vadd.f32 %v468_v34, %v436_v32 }
  0xb9   : > { %v590_v40 = vsel %vm584_vm4, %v551_v36, 0.0  ;;  %v508_v41 = vadd.f32 %v504_v35, %v472_v37 }
  0xba   : > { %596 = vst.msk [vmem:[#allocation2 + $0x8] sm:$0xff] %vm592_vm1, %v590_v40 }
  0xbb   : > { %v544_v42 = vadd.f32 %v540_v39, %v508_v41 }
  0xbd   : > { %v550_v43 = vadd.f32 %v1109_v28, %v544_v42 }
  0xbe   : > { %v663_v62 = vpop.f32.mrf.mxu2 }
  0xbf   : > { %v552_v44 = vmax.f32 %v550_v43, 0.0 }
  0xc1   : > { %v591_v46 = vsel %vm585_vm7, %v552_v44, 0.0  ;;  %v604_v47 = vld [vmem:[#allocation2 + $0x1] sm:$0xff] }
  0xc2   : > { %v599_v48 = vld [vmem:[#allocation2 + $0x8] sm:$0xff]  ;;  %597 = vst.msk [vmem:[#allocation2 + $0x10] sm:$0xff] %vm592_vm1, %v591_v46  ;;  %1046 = vmatmul.msk.f32.vlgmr.msra.gmra.mxu1 %vm592_vm1, %v604_v47 }
  0xc3   : > { %v669_v49 = vld [vmem:[#allocation2 + $0x2] sm:$0xff]  ;;  %1049 = vmatmul.msk.f32.gmra.mxu2 %vm592_vm1, %v599_v48  ;;  %1060 = vmatmul.msk.f32.vlgmr.msrb.gmra.mxu0 %vm592_vm1, %v599_v48 }
  0xc4   : > { %1054 = vmatmul.msk.f32.vlgmr.msrb.gmra.mxu3 %vm592_vm1, %v669_v49  ;;  %922 = vmatpush.msra.mxu1 %v1089_v45 }
  0xc6   : > { %923 = vmatpush.msra.mxu1 %v1088_v50 }
  0xc8   : > { %924 = vmatpush.msra.mxu1 %v1087_v51 }
  0xc9   : > { %v605_v53 = vld [vmem:[#allocation2 + $0x9] sm:$0xff]  ;;  %v784_v56 = vld [vmem:[#allocation2 + $0x12] sm:$0xff] }
  0xca   : > { %v670_v54 = vld [vmem:[#allocation2 + $0xa] sm:$0xff]  ;;  %1047 = vmatmul.msk.f32.gmra.mxu1 %vm592_vm1, %v605_v53 }
  0xcb   : > { %v708_v55 = vld [vmem:[#allocation2 + $0x10] sm:$0xff]  ;;  %1072 = vmatmul.msk.f32.vlgmr.msra.gmra.mxu2 %vm592_vm1, %v670_v54  ;;  %925 = vmatpush.msra.mxu1 %v1086_v52 }
  0xcc   : > { %1055 = vmatmul.msk.f32.gmra.mxu3 %vm592_vm1, %v670_v54  ;;  %1061 = vmatmul.msk.f32.gmra.mxu0 %vm592_vm1, %v708_v55  ;;  %v859_v57 = vld [vmem:[#allocation2 + $0x11] sm:$0xff] }
  0xd2   : > { %1066 = vmatmul.msk.f32.vlgmr.msrb.gmra.mxu1 %vm592_vm1, %v605_v53 }
  0xd3   : > { %1073 = vmatmul.msk.f32.gmra.mxu2 %vm592_vm1, %v784_v56 }
  0xd4   : > { %1078 = vmatmul.msk.f32.vlgmr.msra.gmra.mxu3 %vm592_vm1, %v708_v55  ;;  %1084 = vmatmul.msk.f32.vlgmr.msra.gmra.mxu0 %vm592_vm1, %v859_v57 }
  0xda   : > { %1067 = vmatmul.msk.f32.gmra.mxu1 %vm592_vm1, %v859_v57 }
  0xdc   : > { %1079 = vmatmul.msk.f32.gmra.mxu3 %vm592_vm1, %v822_v58  ;;  %1085 = vmatmul.msk.f32.gmra.mxu0 %vm592_vm1, %v860_v59 }
  0xe2   : > { %1090 = vmatmul.msk.f32.vlgmr.msra.gmra.mxu1 %vm592_vm1, %v784_v56 }
  0xea   : > { %1091 = vmatmul.msk.f32.gmra.mxu1 %vm592_vm1, %v898_v60 }
 0x13f   : > { %v634_v61 = vpop.f32.mrf.mxu1 }
 0x140   : > { %v737_v0 = vpop.f32.mrf.mxu0  ;;  %v664_v3 = vadd.f32 %v663_v62, %v634_v61 }
 0x146   : > { %v666_v2 = vpop.f32.mrf.mxu2 }
 0x147   : > { %v699_v63 = vpop.f32.mrf.mxu3  ;;  %v637_v1 = vpop.f32.mrf.mxu1 }
 0x148   : > { %v705_v4 = vadd.f32 %v699_v63, %v664_v3  ;;  %v667_v9 = vadd.f32 %v666_v2, %v637_v1 }
 0x149   : > { %v740_v7 = vpop.f32.mrf.mxu0 }
 0x14a   : > { %v743_v8 = vadd.f32 %v737_v0, %v705_v4 }
 0x14e   : > { %v813_v10 = vpop.f32.mrf.mxu2 }
 0x14f   : > { %v702_v5 = vpop.f32.mrf.mxu3  ;;  %v775_v6 = vpop.f32.mrf.mxu1 }
 0x150   : > { %v781_v11 = vadd.f32 %v775_v6, %v743_v8  ;;  %v706_v12 = vadd.f32 %v702_v5, %v667_v9 }
 0x151   : > { %v889_v18 = vpop.f32.mrf.mxu0 }
 0x152   : > { %v819_v15 = vadd.f32 %v813_v10, %v781_v11  ;;  %v744_v17 = vadd.f32 %v740_v7, %v706_v12 }
 0x156   : > { %v816_v20 = vpop.f32.mrf.mxu2 }
 0x157   : > { %v851_v13 = vpop.f32.mrf.mxu3  ;;  %v778_v14 = vpop.f32.mrf.mxu1 }
 0x158   : > { %v857_v16 = vadd.f32 %v851_v13, %v819_v15  ;;  %v782_v19 = vadd.f32 %v778_v14, %v744_v17 }
 0x159   : > { %v892_v29 = vpop.f32.mrf.mxu0 }
 0x15a   : > { %v895_v21 = vadd.f32 %v889_v18, %v857_v16  ;;  %v820_v25 = vadd.f32 %v816_v20, %v782_v19 }
 0x15f   : > { %v854_v23 = vpop.f32.mrf.mxu3  ;;  %v927_v24 = vpop.f32.mrf.mxu1 }
 0x160   : > { %v933_v26 = vadd.f32 %v927_v24, %v895_v21  ;;  %v858_v27 = vadd.f32 %v854_v23, %v820_v25 }
 0x162   : > { %v939_v28 = vadd.f32 %v1110_v22, %v933_v26  ;;  %v896_v31 = vadd.f32 %v892_v29, %v858_v27 }
 0x164   : > { %v941_v30 = vmax.f32 %v939_v28, 0.0 }
 0x166   : > { %943 = vst.msk [vmem:[%s224_s24] sm:$0xff] %vm592_vm1, %v941_v30 }
 0x167   : > { %v930_v32 = vpop.f32.mrf.mxu1 }
 0x168   : > { %v934_v33 = vadd.f32 %v930_v32, %v896_v31 }
 0x16a   : > { %v940_v34 = vadd.f32 %v1110_v22, %v934_v33 }
 0x16c   : > { %v942_v35 = vmax.f32 %v940_v34, 0.0 }
 0x16e   : > { %944 = vst.msk [vmem:[%s224_s24 + $0x8] sm:$0xff] %vm592_vm1, %v942_v35 }
 0x16f PF: > { %s15_s18 = sadd.s32 1, %s1117_s18  }
 0x170   : > { %p12_p4 = scmp.ge.s32.totalorder %s15_s18, 4  }
 0x172   :  { %14 = sbr.rel (!%p12_p4) target bundleno = 1 (0x1), region = 86 }

// kernel: encoder_forward.3
= control target key start
LH: loop header
LB: loop body
LE: loop exit
PB: predicated region body
PF: predicated region fallthrough
CT: control target
= control target key end

     0   :  { %s4827_s18 = smov 0   ;;  %s6530_s0 = inlined_call_operand.vmem [shape: f32[2,184,16], index: 0, kind: input, shape index: {}]   ;;  %s6531_s1 = inlined_call_operand.vmem [shape: f32[16,16,8], index: 1, kind: input, shape index: {}]   ;;  %s6532_s2 = inlined_call_operand.vmem [shape: f32[1,8], index: 2, kind: input, shape index: {}]   ;;  %s6533_s3 = inlined_call_operand.vmem [shape: f32[9,8,8], index: 3, kind: input, shape index: {}]   ;;  %s6534_s4 = inlined_call_operand.vmem [shape: f32[1,8], index: 4, kind: input, shape index: {}]   ;;  %s6535_s5 = inlined_call_operand.vmem [shape: f32[2,128,8], index: 5, kind: output, shape index: {}]  }
   0x1 LB: > { %s4321_s19 = sadd.s32 4294967295, %s4794_s18   ;;  %p4325_p0 = scmp.ge.s32.totalorder %s4794_s18, 1  ;;  %s4794_s18 = sphi %s4827_s18, %s15_s18  }
   0x2   : > { %p187_p1 = scmp.lt.s32.totalorder %s4794_s18, 3 }
   0x4   : > { %p188_p2 = pnand %p4325_p0, %p187_p1 }
   0x6   : > { %191 = sbr.rel (%p188_p2) target bundleno = 1088 (0x440), region = 40 }
   0xb   : > { %v4330_v0 = vld [vmem:[%s6531_s1 + $0x18] sm:$0xff]  ;;  %v4329_v1 = vld [vmem:[%s6531_s1 + $0x10] sm:$0xff]  ;;  %p215_p3 = scmp.lt.s32.totalorder %s4321_s19, 1  ;;  %v4364_v2 = vld [vmem:[%s6531_s1 + $0x28] sm:$0xff]  ;;  %vm262_vm0 = vcmask 130048   ;;  %vm2902_vm1 = vcmask 64512  }
   0xc   : > { %4770 = vmatpush.msra.mxu1 %v4330_v0  ;;  %4771 = vmatpush.msra.mxu2 %v4330_v0  ;;  %v4382_v3 = vld [vmem:[%s6531_s1 + $0x38] sm:$0xff]  ;;  %v242_v4 = vld [vmem:[%s6531_s1 + $0x8] sm:$0xff]  ;;  %v4363_v5 = vld [vmem:[%s6531_s1 + $0x20] sm:$0xff] }
   0xd   : > { %4772 = vmatpush.msra.mxu3 %v4330_v0  ;;  %s6630_s19 = smov (!%p215_p3, %s4321_s19), 1  ;;  %325 = vmatpush.msra.mxu0 %v4330_v0  ;;  %v4381_v6 = vld [vmem:[%s6531_s1 + $0x30] sm:$0xff]  ;;  %v241_v7 = vld [vmem:[%s6531_s1] sm:$0xff]  ;;  %v4436_v13 = vld [vmem:[%s6531_s1 + $0x68] sm:$0xff] }
   0xe   : > { %4773 = vmatpush.msra.mxu1 %v4329_v1  ;;  %4774 = vmatpush.msra.mxu2 %v4329_v1  ;;  %s4776_s7 = smul.u32 184, %s6630_s19  ;;  %v4454_v16 = vld [vmem:[%s6531_s1 + $0x78] sm:$0xff]  ;;  %v4400_v19 = vld [vmem:[%s6531_s1 + $0x48] sm:$0xff]  ;;  %v4399_v20 = vld [vmem:[%s6531_s1 + $0x40] sm:$0xff]  ;;  %s4769_s20 = sshll.u32 %s6630_s19, 7 }
   0xf   : > { %4775 = vmatpush.msra.mxu3 %v4329_v1  ;;  %326 = vmatpush.msra.mxu0 %v4329_v1  ;;  %v4418_v18 = vld [vmem:[%s6531_s1 + $0x58] sm:$0xff]  ;;  %v4435_v46 = vld [vmem:[%s6531_s1 + $0x60] sm:$0xff]  ;;  %v4453_v47 = vld [vmem:[%s6531_s1 + $0x70] sm:$0xff]  ;;  %s6458_s23 = scalar_lea.vmem %s6535_s5, %s4769_s20 }
  0x10   : > { %570 = vmatpush.msrb.mxu2 %v4364_v2  ;;  %438 = vmatpush.msrb.mxu1 %v242_v4  ;;  %s4865_s14 = scalar_lea.vmem %s6530_s0, %s4776_s7  ;;  %v4417_v48 = vld [vmem:[%s6531_s1 + $0x50] sm:$0xff] }
  0x11   : > { %718 = vmatpush.msrb.mxu3 %v4382_v3  ;;  %v4868_v8 = vld [vmem:[%s4865_s14 + $0x21] sm:$0xff]  ;;  %v4885_v12 = vld [vmem:[%s4865_s14 + $0x29] sm:$0xff]  ;;  %866 = vmatpush.msrb.mxu0 %v4400_v19  ;;  %v4917_v21 = vld [vmem:[%s4865_s14 + $0x31] sm:$0xff] }
  0x12   : > { %571 = vmatpush.msrb.mxu2 %v4363_v5  ;;  %v4871_v9 = vld [vmem:[%s4865_s14 + $0x41] sm:$0xff]  ;;  %439 = vmatpush.msrb.mxu1 %v241_v7  ;;  %v4891_v14 = vld [vmem:[%s4865_s14 + $0x49] sm:$0xff]  ;;  %v4920_v22 = vld [vmem:[%s4865_s14 + $0x51] sm:$0xff] }
  0x13   : > { %v4874_v10 = vld [vmem:[%s4865_s14 + $0x61] sm:$0xff]  ;;  %719 = vmatpush.msrb.mxu3 %v4381_v6  ;;  %4335 = vmatmul.msk.f32.vlgmr.msra.gmra.mxu1 %vm262_vm0, %v4868_v8  ;;  %v4894_v15 = vld [vmem:[%s4865_s14 + $0x69] sm:$0xff]  ;;  %v4923_v23 = vld [vmem:[%s4865_s14 + $0x71] sm:$0xff] }
  0x14   : > { %4339 = vmatmul.msk.f32.vlgmr.msra.gmra.mxu2 %vm262_vm0, %v4871_v9  ;;  %v243_v11 = vld [vmem:[%s4865_s14 + $0x1] sm:$0xff]  ;;  %4343 = vmatmul.msk.f32.vlgmr.msra.gmra.mxu3 %vm262_vm0, %v4874_v10  ;;  %6566 = vst [vmem:[#allocation3_spill] sm:$0xff] %v4894_v15  ;;  %v244_v17 = vld [vmem:[%s4865_s14 + $0x9] sm:$0xff]  ;;  %v4926_v24 = vld [vmem:[%s4865_s14 + $0x11] sm:$0xff] }
  0x15   : > { %4331 = vmatmul.msk.f32.vlgmr.msra.gmra.mxu0 %vm262_vm0, %v243_v11  ;;  %1162 = vmatpush.msra.mxu2 %v4436_v13  ;;  %6567 = vst [vmem:[#allocation4_spill] sm:$0xff] %v4923_v23  ;;  %v4937_v25 = vld [vmem:[%s4865_s14 + $0x39] sm:$0xff]  ;;  %v489_v30 = vld [vmem:[%s4865_s14 + $0x2] sm:$0xff]  ;;  %v785_v32 = vld [vmem:[%s4865_s14 + $0x10] sm:$0xff] }
  0x16   : > { %1310 = vmatpush.msra.mxu3 %v4454_v16  ;;  %1014 = vmatpush.msra.mxu1 %v4418_v18  ;;  %v4940_v26 = vld [vmem:[%s4865_s14 + $0x59] sm:$0xff]  ;;  %v637_v31 = vld [vmem:[%s4865_s14 + $0x3] sm:$0xff]  ;;  %v638_v35 = vld [vmem:[%s4865_s14 + $0xb] sm:$0xff] }
  0x17   : > { %867 = vmatpush.msrb.mxu0 %v4399_v20  ;;  %v4943_v27 = vld [vmem:[%s4865_s14 + $0x79] sm:$0xff]  ;;  %v226_v33 = vld [vmem:[%s4865_s14 + $0x8] sm:$0xff]  ;;  %v5011_v45 = vld [vmem:[%s4865_s14 + $0x30] sm:$0xff]  ;;  %1163 = vmatpush.msra.mxu2 %v4435_v46 }
  0x18   : > { %6568 = vst [vmem:[#allocation5_spill] sm:$0xff] %v4943_v27  ;;  %v4946_v28 = vld [vmem:[%s4865_s14 + $0x19] sm:$0xff]  ;;  %v490_v34 = vld [vmem:[%s4865_s14 + $0xa] sm:$0xff]  ;;  %v5005_v43 = vld [vmem:[%s4865_s14 + $0x22] sm:$0xff]  ;;  %1311 = vmatpush.msra.mxu3 %v4453_v47  ;;  %1015 = vmatpush.msra.mxu1 %v4417_v48 }
  0x19   : > { %v225_v29 = vld [vmem:[%s4865_s14] sm:$0xff]  ;;  %v786_v36 = vld [vmem:[%s4865_s14 + $0x18] sm:$0xff]  ;;  %v4995_v42 = vld [vmem:[%s4865_s14 + $0x28] sm:$0xff] }
  0x1a   : > { %v4973_v37 = vld [vmem:[%s4865_s14 + $0x12] sm:$0xff]  ;;  %v4979_v39 = vld [vmem:[%s4865_s14 + $0x20] sm:$0xff]  ;;  %v5031_v49 = vld [vmem:[%s4865_s14 + $0x2a] sm:$0xff] }
  0x1b   : > { %4336 = vmatmul.msk.f32.gmra.mxu1 %vm262_vm0, %v4885_v12  ;;  %v4976_v38 = vld [vmem:[%s4865_s14 + $0x13] sm:$0xff]  ;;  %v4992_v41 = vld [vmem:[%s4865_s14 + $0x1b] sm:$0xff]  ;;  %v5008_v44 = vld [vmem:[%s4865_s14 + $0x23] sm:$0xff] }
  0x1c   : > { %4340 = vmatmul.msk.f32.gmra.mxu2 %vm262_vm0, %v4891_v14  ;;  %4344 = vmatmul.msk.f32.gmra.mxu3 %vm262_vm0, %v4894_v15  ;;  %v4989_v40 = vld [vmem:[%s4865_s14 + $0x1a] sm:$0xff]  ;;  %v5034_v50 = vld [vmem:[%s4865_s14 + $0x2b] sm:$0xff]  ;;  %v5082_v58 = vld [vmem:[%s4865_s14 + $0x42] sm:$0xff] }
  0x1d   : > { %4332 = vmatmul.msk.f32.gmra.mxu0 %vm262_vm0, %v244_v17  ;;  %v5037_v51 = vld [vmem:[%s4865_s14 + $0x38] sm:$0xff]  ;;  %v5054_v54 = vld [vmem:[%s4865_s14 + $0x40] sm:$0xff]  ;;  %v5071_v57 = vld [vmem:[%s4865_s14 + $0x48] sm:$0xff] }
  0x1e   : > { %v5048_v52 = vld [vmem:[%s4865_s14 + $0x32] sm:$0xff]  ;;  %v5065_v55 = vld [vmem:[%s4865_s14 + $0x3a] sm:$0xff]  ;;  %v5085_v59 = vld [vmem:[%s4865_s14 + $0x43] sm:$0xff] }
  0x1f   : > { %v5051_v53 = vld [vmem:[%s4865_s14 + $0x33] sm:$0xff]  ;;  %v5068_v56 = vld [vmem:[%s4865_s14 + $0x3b] sm:$0xff]  ;;  %v5099_v61 = vld [vmem:[%s4865_s14 + $0x4a] sm:$0xff] }
  0x20   : > { %v5088_v60 = vld [vmem:[%s4865_s14 + $0x50] sm:$0xff]  ;;  %v5105_v63 = vld [vmem:[%s4865_s14 + $0x58] sm:$0xff]  ;;  %v5122_v2 = vld [vmem:[%s4865_s14 + $0x60] sm:$0xff] }
  0x21   : > { %v5102_v62 = vld [vmem:[%s4865_s14 + $0x4b] sm:$0xff]  ;;  %v5119_v1 = vld [vmem:[%s4865_s14 + $0x53] sm:$0xff]  ;;  %v5136_v4 = vld [vmem:[%s4865_s14 + $0x5b] sm:$0xff] }
  0x22   : > { %v5116_v0 = vld [vmem:[%s4865_s14 + $0x52] sm:$0xff]  ;;  %v5133_v3 = vld [vmem:[%s4865_s14 + $0x5a] sm:$0xff]  ;;  %v5139_v5 = vld [vmem:[%s4865_s14 + $0x68] sm:$0xff] }
  0x23   : > { %4337 = vmatmul.msk.f32.gmra.mxu1 %vm262_vm0, %v4917_v21  ;;  %v5152_v7 = vld [vmem:[%s4865_s14 + $0x62] sm:$0xff]  ;;  %v5158_v16 = vld [vmem:[%s4865_s14 + $0x70] sm:$0xff]  ;;  %v4526_v19 = vld [vmem:[%s6531_s1 + $0xb8] sm:$0xff] }
  0x24   : > { %4341 = vmatmul.msk.f32.gmra.mxu2 %vm262_vm0, %v4920_v22  ;;  %4345 = vmatmul.msk.f32.gmra.mxu3 %vm262_vm0, %v4923_v23  ;;  %v5155_v11 = vld [vmem:[%s4865_s14 + $0x63] sm:$0xff]  ;;  %v5239_v23 = vld [vmem:[%s4865_s14 + $0x7b] sm:$0xff] }
  0x25   : > { %4333 = vmatmul.msk.f32.gmra.mxu0 %vm262_vm0, %v4926_v24  ;;  %v4508_v17 = vld [vmem:[%s6531_s1 + $0xa8] sm:$0xff]  ;;  %6580 = vst [vmem:[#allocation17_spill] sm:$0xff] %v5239_v23 }
  0x26   : > { %v4472_v18 = vld [vmem:[%s6531_s1 + $0x88] sm:$0xff] }
  0x27   : > { %1458 = vmatpush.msra.mxu0 %v4472_v18  ;;  %v5216_v18 = vld [vmem:[%s4865_s14 + $0x73] sm:$0xff] }
  0x28   : > { %6575 = vst [vmem:[#allocation12_spill] sm:$0xff] %v5216_v18 }
  0x2b   : > { %4338 = vmatmul.msk.f32.gmra.mxu1 %vm262_vm0, %v4937_v25 }
  0x2c   : > { %4342 = vmatmul.msk.f32.gmra.mxu2 %vm262_vm0, %v4940_v26  ;;  %4346 = vmatmul.msk.f32.gmra.mxu3 %vm262_vm0, %v4943_v27 }
  0x2d   : > { %4334 = vmatmul.msk.f32.gmra.mxu0 %vm262_vm0, %v4946_v28 }
  0x33   : > { %4347 = vmatmul.msk.f32.vlgmr.msrb.gmra.mxu1 %vm262_vm0, %v225_v29 }
  0x34   : > { %4365 = vmatmul.msk.f32.vlgmr.msrb.gmra.mxu2 %vm262_vm0, %v489_v30  ;;  %4383 = vmatmul.msk.f32.vlgmr.msrb.gmra.mxu3 %vm262_vm0, %v637_v31  ;;  %v4490_v30 = vld [vmem:[%s6531_s1 + $0x98] sm:$0xff] }
  0x35   : > { %4401 = vmatmul.msk.f32.vlgmr.msrb.gmra.mxu0 %vm262_vm0, %v785_v32  ;;  %1754 = vmatpush.msrb.mxu2 %v4508_v17  ;;  %v5213_v17 = vld [vmem:[%s4865_s14 + $0x72] sm:$0xff] }
  0x36   : > { %1902 = vmatpush.msrb.mxu3 %v4526_v19  ;;  %1606 = vmatpush.msrb.mxu1 %v4490_v30  ;;  %6574 = vst [vmem:[#allocation11_spill] sm:$0xff] %v5213_v17  ;;  %v5219_v30 = vld [vmem:[%s4865_s14 + $0x80] sm:$0xff] }
  0x37   : > { %6576 = vst [vmem:[#allocation13_spill] sm:$0xff] %v5219_v30 }
  0x3b   : > { %4348 = vmatmul.msk.f32.gmra.mxu1 %vm262_vm0, %v226_v33  ;;  %v5190_v33 = vld [vmem:[%s4865_s14 + $0x6b] sm:$0xff] }
  0x3c   : > { %4366 = vmatmul.msk.f32.gmra.mxu2 %vm262_vm0, %v490_v34  ;;  %4384 = vmatmul.msk.f32.gmra.mxu3 %vm262_vm0, %v638_v35  ;;  %6571 = vst [vmem:[#allocation8_spill] sm:$0xff] %v5190_v33  ;;  %v5193_v35 = vld [vmem:[%s4865_s14 + $0x78] sm:$0xff] }
  0x3d   : > { %4402 = vmatmul.msk.f32.gmra.mxu0 %vm262_vm0, %v786_v36  ;;  %6572 = vst [vmem:[#allocation9_spill] sm:$0xff] %v5193_v35 }
  0x43   : > { %4349 = vmatmul.msk.f32.gmra.mxu1 %vm262_vm0, %v785_v32  ;;  %v5187_v32 = vld [vmem:[%s4865_s14 + $0x6a] sm:$0xff] }
  0x44   : > { %4367 = vmatmul.msk.f32.gmra.mxu2 %vm262_vm0, %v4973_v37  ;;  %4385 = vmatmul.msk.f32.gmra.mxu3 %vm262_vm0, %v4976_v38  ;;  %6570 = vst [vmem:[#allocation7_spill] sm:$0xff] %v5187_v32 }
  0x45   : > { %4403 = vmatmul.msk.f32.gmra.mxu0 %vm262_vm0, %v4979_v39 }
  0x4b   : > { %4350 = vmatmul.msk.f32.gmra.mxu1 %vm262_vm0, %v786_v36  ;;  %v4471_v36 = vld [vmem:[%s6531_s1 + $0x80] sm:$0xff] }
  0x4c   : > { %4368 = vmatmul.msk.f32.gmra.mxu2 %vm262_vm0, %v4989_v40  ;;  %4386 = vmatmul.msk.f32.gmra.mxu3 %vm262_vm0, %v4992_v41 }
  0x4d   : > { %4404 = vmatmul.msk.f32.gmra.mxu0 %vm262_vm0, %v4995_v42 }
  0x4e   : > { %1459 = vmatpush.msra.mxu0 %v4471_v36 }
  0x53   : > { %4351 = vmatmul.msk.f32.gmra.mxu1 %vm262_vm0, %v4979_v39 }
  0x54   : > { %4369 = vmatmul.msk.f32.gmra.mxu2 %vm262_vm0, %v5005_v43  ;;  %4387 = vmatmul.msk.f32.gmra.mxu3 %vm262_vm0, %v5008_v44 }
  0x55   : > { %4405 = vmatmul.msk.f32.gmra.mxu0 %vm262_vm0, %v5011_v45 }
  0x5b   : > { %4352 = vmatmul.msk.f32.gmra.mxu1 %vm262_vm0, %v4995_v42 }
  0x5c   : > { %4370 = vmatmul.msk.f32.gmra.mxu2 %vm262_vm0, %v5031_v49  ;;  %4388 = vmatmul.msk.f32.gmra.mxu3 %vm262_vm0, %v5034_v50 }
  0x5d   : > { %4406 = vmatmul.msk.f32.gmra.mxu0 %vm262_vm0, %v5037_v51 }
  0x63   : > { %4353 = vmatmul.msk.f32.gmra.mxu1 %vm262_vm0, %v5011_v45 }
  0x64   : > { %4371 = vmatmul.msk.f32.gmra.mxu2 %vm262_vm0, %v5048_v52  ;;  %4389 = vmatmul.msk.f32.gmra.mxu3 %vm262_vm0, %v5051_v53 }
  0x65   : > { %4407 = vmatmul.msk.f32.gmra.mxu0 %vm262_vm0, %v5054_v54 }
  0x6b   : > { %4354 = vmatmul.msk.f32.gmra.mxu1 %vm262_vm0, %v5037_v51 }
  0x6c   : > { %4372 = vmatmul.msk.f32.gmra.mxu2 %vm262_vm0, %v5065_v55  ;;  %4390 = vmatmul.msk.f32.gmra.mxu3 %vm262_vm0, %v5068_v56 }
  0x6d   : > { %4408 = vmatmul.msk.f32.gmra.mxu0 %vm262_vm0, %v5071_v57 }
  0x73   : > { %4355 = vmatmul.msk.f32.gmra.mxu1 %vm262_vm0, %v5054_v54 }
  0x74   : > { %4373 = vmatmul.msk.f32.gmra.mxu2 %vm262_vm0, %v5082_v58  ;;  %4391 = vmatmul.msk.f32.gmra.mxu3 %vm262_vm0, %v5085_v59 }
  0x75   : > { %4409 = vmatmul.msk.f32.gmra.mxu0 %vm262_vm0, %v5088_v60 }
  0x7b   : > { %4356 = vmatmul.msk.f32.gmra.mxu1 %vm262_vm0, %v5071_v57 }
  0x7c   : > { %4374 = vmatmul.msk.f32.gmra.mxu2 %vm262_vm0, %v5099_v61  ;;  %4392 = vmatmul.msk.f32.gmra.mxu3 %vm262_vm0, %v5102_v62 }
  0x7d   : > { %4410 = vmatmul.msk.f32.gmra.mxu0 %vm262_vm0, %v5105_v63 }
  0x83   : > { %4357 = vmatmul.msk.f32.gmra.mxu1 %vm262_vm0, %v5088_v60 }
  0x84   : > { %4375 = vmatmul.msk.f32.gmra.mxu2 %vm262_vm0, %v5116_v0  ;;  %4393 = vmatmul.msk.f32.gmra.mxu3 %vm262_vm0, %v5119_v1 }
  0x85   : > { %4411 = vmatmul.msk.f32.gmra.mxu0 %vm262_vm0, %v5122_v2 }
  0x8b   : > { %4358 = vmatmul.msk.f32.gmra.mxu1 %vm262_vm0, %v5105_v63 }
  0x8c   : > { %4376 = vmatmul.msk.f32.gmra.mxu2 %vm262_vm0, %v5133_v3  ;;  %4394 = vmatmul.msk.f32.gmra.mxu3 %vm262_vm0, %v5136_v4 }
  0x8d   : > { %4412 = vmatmul.msk.f32.gmra.mxu0 %vm262_vm0, %v5139_v5 }
  0x90   : > { %v5149_v6 = vpop.f32.mrf.mxu1 }
  0x92   : > { %v328_v13 = vpop.f32.mrf.mxu0 }
  0x93   : > { %4359 = vmatmul.msk.f32.gmra.mxu1 %vm262_vm0, %v5122_v2 }
  0x94   : > { %4377 = vmatmul.msk.f32.gmra.mxu2 %vm262_vm0, %v5152_v7  ;;  %4395 = vmatmul.msk.f32.gmra.mxu3 %vm262_vm0, %v5155_v11 }
  0x95   : > { %4413 = vmatmul.msk.f32.gmra.mxu0 %vm262_vm0, %v5158_v16 }
  0x97   : > { %v5177_v20 = vpop.f32.mrf.mxu2  ;;  %v5179_v29 = vpop.f32.mrf.mxu3 }
  0x98   : > { %6569 = vst [vmem:[#allocation6_spill] sm:$0xff] %v5179_v29  ;;  %v5184_v31 = vpop.f32.mrf.mxu1  ;;  %v5236_v29 = vld [vmem:[%s4865_s14 + $0x7a] sm:$0xff] }
  0x99   : > { %6579 = vst [vmem:[#allocation16_spill] sm:$0xff] %v5236_v29 }
  0x9a   : > { %v331_v34 = vpop.f32.mrf.mxu0 }
  0x9b   : > { %4360 = vmatmul.msk.f32.gmra.mxu1 %vm262_vm0, %v5139_v5 }
  0x9c   : > { %4378 = vmatmul.msk.f32.gmra.mxu2 %vm262_vm0, %v5187_v32  ;;  %4396 = vmatmul.msk.f32.gmra.mxu3 %vm262_vm0, %v5190_v33  ;;  %v5242_v32 = vld [vmem:[%s4865_s14 + $0x88] sm:$0xff] }
  0x9d   : > { %4414 = vmatmul.msk.f32.gmra.mxu0 %vm262_vm0, %v5193_v35  ;;  %6581 = vst [vmem:[#allocation18_spill] sm:$0xff] %v5242_v32 }
  0x9f   : > { %v5206_v46 = vpop.f32.mrf.mxu2  ;;  %v5208_v47 = vpop.f32.mrf.mxu3 }
  0xa0   : > { %6573 = vst [vmem:[#allocation10_spill] sm:$0xff] %v5208_v47  ;;  %v5210_v48 = vpop.f32.mrf.mxu1 }
  0xa2   : > { %v334_v19 = vpop.f32.mrf.mxu0 }
  0xa3   : > { %4361 = vmatmul.msk.f32.gmra.mxu1 %vm262_vm0, %v5158_v16 }
  0xa4   : > { %4379 = vmatmul.msk.f32.gmra.mxu2 %vm262_vm0, %v5213_v17  ;;  %4397 = vmatmul.msk.f32.gmra.mxu3 %vm262_vm0, %v5216_v18 }
  0xa5   : > { %4415 = vmatmul.msk.f32.gmra.mxu0 %vm262_vm0, %v5219_v30 }
  0xa7   : > { %v5229_v36 = vpop.f32.mrf.mxu2  ;;  %v5231_v47 = vpop.f32.mrf.mxu3 }
  0xa8   : > { %6577 = vst [vmem:[#allocation14_spill] sm:$0xff] %v5229_v36  ;;  %v5233_v27 = vpop.f32.mrf.mxu1 }
  0xa9   : > { %6578 = vst [vmem:[#allocation15_spill] sm:$0xff] %v5231_v47 }
  0xaa   : > { %v337_v33 = vpop.f32.mrf.mxu0 }
  0xab   : > { %4362 = vmatmul.msk.f32.gmra.mxu1 %vm262_vm0, %v5193_v35 }
  0xac   : > { %4380 = vmatmul.msk.f32.gmra.mxu2 %vm262_vm0, %v5236_v29  ;;  %4398 = vmatmul.msk.f32.gmra.mxu3 %vm262_vm0, %v5239_v23 }
  0xad   : > { %4416 = vmatmul.msk.f32.gmra.mxu0 %vm262_vm0, %v5242_v32 }
  0xaf   : > { %v5252_v47 = vpop.f32.mrf.mxu2  ;;  %v5254_v30 = vpop.f32.mrf.mxu3 }
  0xb0   : > { %6582 = vst [vmem:[#allocation19_spill] sm:$0xff] %v5252_v47  ;;  %v441_v18 = vpop.f32.mrf.mxu1 }
  0xb1   : > { %6583 = vst [vmem:[#allocation20_spill] sm:$0xff] %v5254_v30  ;;  %v442_v15 = vadd.f32 %v441_v18, %v328_v13 }
  0xb2   : > { %v869_v17 = vpop.f32.mrf.mxu0 }
  0xb3   : > { %4419 = vmatmul.msk.f32.vlgmr.msra.gmra.mxu1 %vm262_vm0, %v4926_v24 }
  0xb4   : > { %4437 = vmatmul.msk.f32.vlgmr.msra.gmra.mxu2 %vm262_vm0, %v4973_v37  ;;  %4455 = vmatmul.msk.f32.vlgmr.msra.gmra.mxu3 %vm262_vm0, %v4976_v38 }
  0xb5   : > { %4473 = vmatmul.msk.f32.vlgmr.msra.gmra.mxu0 %vm262_vm0, %v4979_v39 }
  0xb7   : > { %v573_v32 = vpop.f32.mrf.mxu2  ;;  %v721_v29 = vpop.f32.mrf.mxu3 }
  0xb8   : > { %v621_v23 = vadd.f32 %v573_v32, %v442_v15  ;;  %v444_v47 = vpop.f32.mrf.mxu1 }
  0xb9   : > { %v445_v36 = vadd.f32 %v444_v47, %v331_v34 }
  0xba   : > { %v769_v30 = vadd.f32 %v721_v29, %v621_v23  ;;  %v872_v35 = vpop.f32.mrf.mxu0 }
  0xbb   : > { %4420 = vmatmul.msk.f32.gmra.mxu1 %vm262_vm0, %v4946_v28 }
  0xbc   : > { %v5264_v13 = vadd.f32 %v869_v17, %v769_v30  ;;  %4438 = vmatmul.msk.f32.gmra.mxu2 %vm262_vm0, %v4989_v40  ;;  %4456 = vmatmul.msk.f32.gmra.mxu3 %vm262_vm0, %v4992_v41 }
  0xbd   : > { %4474 = vmatmul.msk.f32.gmra.mxu0 %vm262_vm0, %v4995_v42 }
  0xbf   : > { %v576_v15 = vpop.f32.mrf.mxu2  ;;  %v724_v37 = vpop.f32.mrf.mxu3 }
  0xc0   : > { %v622_v24 = vadd.f32 %v576_v15, %v445_v36  ;;  %v447_v23 = vpop.f32.mrf.mxu1 }
  0xc1   : > { %v448_v29 = vadd.f32 %v447_v23, %v334_v19  ;;  %v4525_v23 = vld [vmem:[%s6531_s1 + $0xb0] sm:$0xff] }
  0xc2   : > { %v770_v38 = vadd.f32 %v724_v37, %v622_v24  ;;  %v875_v39 = vpop.f32.mrf.mxu0  ;;  %v4507_v37 = vld [vmem:[%s6531_s1 + $0xa0] sm:$0xff]  ;;  %1903 = vmatpush.msrb.mxu3 %v4525_v23 }
  0xc3   : > { %4421 = vmatmul.msk.f32.gmra.mxu1 %vm262_vm0, %v4868_v8  ;;  %1755 = vmatpush.msrb.mxu2 %v4507_v37 }
  0xc4   : > { %v5274_v32 = vadd.f32 %v872_v35, %v770_v38  ;;  %4439 = vmatmul.msk.f32.gmra.mxu2 %vm262_vm0, %v5005_v43  ;;  %4457 = vmatmul.msk.f32.gmra.mxu3 %vm262_vm0, %v5008_v44 }
  0xc5   : > { %4475 = vmatmul.msk.f32.gmra.mxu0 %vm262_vm0, %v5011_v45 }
  0xc7   : > { %v579_v28 = vpop.f32.mrf.mxu2  ;;  %v727_v41 = vpop.f32.mrf.mxu3 }
  0xc8   : > { %v623_v40 = vadd.f32 %v579_v28, %v448_v29  ;;  %v450_v42 = vpop.f32.mrf.mxu1 }
  0xc9   : > { %v451_v35 = vadd.f32 %v450_v42, %v337_v33 }
  0xca   : > { %v771_v34 = vadd.f32 %v727_v41, %v623_v40  ;;  %v878_v47 = vpop.f32.mrf.mxu0  ;;  %v4489_v40 = vld [vmem:[%s6531_s1 + $0x90] sm:$0xff] }
  0xcb   : > { %4422 = vmatmul.msk.f32.gmra.mxu1 %vm262_vm0, %v4885_v12 }
  0xcc   : > { %v5284_v17 = vadd.f32 %v875_v39, %v771_v34  ;;  %4440 = vmatmul.msk.f32.gmra.mxu2 %vm262_vm0, %v5031_v49  ;;  %4458 = vmatmul.msk.f32.gmra.mxu3 %vm262_vm0, %v5034_v50 }
  0xcd   : > { %4476 = vmatmul.msk.f32.gmra.mxu0 %vm262_vm0, %v5037_v51  ;;  %1607 = vmatpush.msrb.mxu1 %v4489_v40 }
  0xcf   : > { %v582_v18 = vpop.f32.mrf.mxu2  ;;  %v730_v30 = vpop.f32.mrf.mxu3 }
  0xd0   : > { %v624_v19 = vadd.f32 %v582_v18, %v451_v35  ;;  %v453_v36 = vpop.f32.mrf.mxu1 }
  0xd1   : > { %v454_v38 = vadd.f32 %v453_v36, %v5149_v6 }
  0xd2   : > { %v772_v15 = vadd.f32 %v730_v30, %v624_v19  ;;  %v881_v33 = vpop.f32.mrf.mxu0 }
  0xd3   : > { %4423 = vmatmul.msk.f32.gmra.mxu1 %vm262_vm0, %v4917_v21 }
  0xd4   : > { %v5294_v24 = vadd.f32 %v878_v47, %v772_v15  ;;  %4441 = vmatmul.msk.f32.gmra.mxu2 %vm262_vm0, %v5048_v52  ;;  %4459 = vmatmul.msk.f32.gmra.mxu3 %vm262_vm0, %v5051_v53 }
  0xd5   : > { %4477 = vmatmul.msk.f32.gmra.mxu0 %vm262_vm0, %v5054_v54 }
  0xd7   : > { %v585_v39 = vpop.f32.mrf.mxu2  ;;  %v733_v28 = vpop.f32.mrf.mxu3 }
  0xd8   : > { %v625_v29 = vadd.f32 %v585_v39, %v454_v38  ;;  %v456_v41 = vpop.f32.mrf.mxu1 }
  0xd9   : > { %v457_v6 = vadd.f32 %v456_v41, %v5184_v31 }
  0xda   : > { %v773_v42 = vadd.f32 %v733_v28, %v625_v29  ;;  %v884_v34 = vpop.f32.mrf.mxu0 }
  0xdb   : > { %4424 = vmatmul.msk.f32.gmra.mxu1 %vm262_vm0, %v4937_v25 }
  0xdc   : > { %v5314_v47 = vadd.f32 %v881_v33, %v773_v42  ;;  %4442 = vmatmul.msk.f32.gmra.mxu2 %vm262_vm0, %v5065_v55  ;;  %4460 = vmatmul.msk.f32.gmra.mxu3 %vm262_vm0, %v5068_v56 }
  0xdd   : > { %4478 = vmatmul.msk.f32.gmra.mxu0 %vm262_vm0, %v5071_v57 }
  0xdf   : > { %v588_v35 = vpop.f32.mrf.mxu2  ;;  %v736_v19 = vpop.f32.mrf.mxu3 }
  0xe0   : > { %v626_v18 = vadd.f32 %v588_v35, %v457_v6  ;;  %v459_v30 = vpop.f32.mrf.mxu1 }
  0xe1   : > { %v460_v31 = vadd.f32 %v459_v30, %v5210_v48 }
  0xe2   : > { %v774_v36 = vadd.f32 %v736_v19, %v626_v18  ;;  %v887_v15 = vpop.f32.mrf.mxu0 }
  0xe3   : > { %4425 = vmatmul.msk.f32.gmra.mxu1 %vm262_vm0, %v4871_v9 }
  0xe4   : > { %v5325_v33 = vadd.f32 %v884_v34, %v774_v36  ;;  %4443 = vmatmul.msk.f32.gmra.mxu2 %vm262_vm0, %v5082_v58  ;;  %4461 = vmatmul.msk.f32.gmra.mxu3 %vm262_vm0, %v5085_v59 }
  0xe5   : > { %4479 = vmatmul.msk.f32.gmra.mxu0 %vm262_vm0, %v5088_v60 }
  0xe7   : > { %v591_v37 = vpop.f32.mrf.mxu2  ;;  %v739_v38 = vpop.f32.mrf.mxu3 }
  0xe8   : > { %v627_v23 = vadd.f32 %v591_v37, %v460_v31  ;;  %v462_v39 = vpop.f32.mrf.mxu1 }
  0xe9   : > { %v463_v9 = vadd.f32 %v462_v39, %v5233_v27 }
  0xea   : > { %v775_v29 = vadd.f32 %v739_v38, %v627_v23  ;;  %v890_v28 = vpop.f32.mrf.mxu0 }
  0xeb   : > { %4426 = vmatmul.msk.f32.gmra.mxu1 %vm262_vm0, %v4891_v14 }
  0xec   : > { %v5336_v40 = vadd.f32 %v887_v15, %v775_v29  ;;  %4444 = vmatmul.msk.f32.gmra.mxu2 %vm262_vm0, %v5099_v61  ;;  %4462 = vmatmul.msk.f32.gmra.mxu3 %vm262_vm0, %v5102_v62 }
  0xed   : > { %4480 = vmatmul.msk.f32.gmra.mxu0 %vm262_vm0, %v5105_v63 }
  0xef   : > { %v594_v48 = vpop.f32.mrf.mxu2  ;;  %v742_v42 = vpop.f32.mrf.mxu3 }
  0xf0   : > { %v628_v41 = vadd.f32 %v594_v48, %v463_v9  ;;  %v465_v34 = vpop.f32.mrf.mxu1 }
  0xf1   : > { %v466_v14 = vadd.f32 %v465_v34, %v5177_v20 }
  0xf2   : > { %v776_v6 = vadd.f32 %v742_v42, %v628_v41  ;;  %v893_v35 = vpop.f32.mrf.mxu0 }
  0xf3   : > { %4427 = vmatmul.msk.f32.gmra.mxu1 %vm262_vm0, %v4920_v22 }
  0xf4   : > { %v5347_v18 = vadd.f32 %v890_v28, %v776_v6  ;;  %4445 = vmatmul.msk.f32.gmra.mxu2 %vm262_vm0, %v5116_v0  ;;  %4463 = vmatmul.msk.f32.gmra.mxu3 %vm262_vm0, %v5119_v1 }
  0xf5   : > { %4481 = vmatmul.msk.f32.gmra.mxu0 %vm262_vm0, %v5122_v2 }
  0xf7   : > { %v597_v27 = vpop.f32.mrf.mxu2  ;;  %v745_v30 = vpop.f32.mrf.mxu3 }
  0xf8   : > { %v629_v19 = vadd.f32 %v597_v27, %v466_v14  ;;  %v468_v36 = vpop.f32.mrf.mxu1  ;;  %v6586_v27 = vld [vmem:[#allocation7_spill] sm:$0xff] }
  0xf9   : > { %v469_v22 = vadd.f32 %v468_v36, %v5206_v46  ;;  %v6589_v36 = vld [vmem:[#allocation19_spill] sm:$0xff] }
  0xfa   : > { %v777_v15 = vadd.f32 %v745_v30, %v629_v19  ;;  %v896_v31 = vpop.f32.mrf.mxu0  ;;  %v6587_v19 = vld [vmem:[#allocation8_spill] sm:$0xff]  ;;  %v6588_v30 = vld [vmem:[#allocation9_spill] sm:$0xff] }
  0xfb   : > { %4428 = vmatmul.msk.f32.gmra.mxu1 %vm262_vm0, %v4940_v26  ;;  %v6584_v26 = vld [vmem:[#allocation14_spill] sm:$0xff] }
  0xfc   : > { %v5358_v37 = vadd.f32 %v893_v35, %v777_v15  ;;  %4446 = vmatmul.msk.f32.gmra.mxu2 %vm262_vm0, %v5133_v3  ;;  %4464 = vmatmul.msk.f32.gmra.mxu3 %vm262_vm0, %v5136_v4 }
  0xfd   : > { %4482 = vmatmul.msk.f32.gmra.mxu0 %vm262_vm0, %v5139_v5 }
  0xff   : > { %v600_v20 = vpop.f32.mrf.mxu2  ;;  %v748_v38 = vpop.f32.mrf.mxu3 }
 0x100   : > { %v630_v23 = vadd.f32 %v600_v20, %v469_v22  ;;  %v471_v39 = vpop.f32.mrf.mxu1 }
 0x101   : > { %v472_v46 = vadd.f32 %v471_v39, %v6584_v26  ;;  %v6592_v26 = vld [vmem:[#allocation11_spill] sm:$0xff] }
 0x102   : > { %v778_v29 = vadd.f32 %v748_v38, %v630_v23  ;;  %v899_v28 = vpop.f32.mrf.mxu0 }
 0x103   : > { %4429 = vmatmul.msk.f32.gmra.mxu1 %vm262_vm0, %v4874_v10  ;;  %v6585_v10 = vld [vmem:[#allocation3_spill] sm:$0xff] }
 0x104   : > { %v5369_v9 = vadd.f32 %v896_v31, %v778_v29  ;;  %4447 = vmatmul.msk.f32.gmra.mxu2 %vm262_vm0, %v5152_v7  ;;  %4465 = vmatmul.msk.f32.gmra.mxu3 %vm262_vm0, %v5155_v11 }
 0x105   : > { %4483 = vmatmul.msk.f32.gmra.mxu0 %vm262_vm0, %v5158_v16 }
 0x107   : > { %v603_v48 = vpop.f32.mrf.mxu2  ;;  %v751_v42 = vpop.f32.mrf.mxu3 }
 0x108   : > { %v631_v41 = vadd.f32 %v603_v48, %v472_v46  ;;  %v474_v34 = vpop.f32.mrf.mxu1  ;;  %v4580_v46 = vld [vmem:[%s6531_s1 + $0xe8] sm:$0xff]  ;;  %v6593_v48 = vld [vmem:[#allocation12_spill] sm:$0xff] }
 0x109   : > { %v475_v15 = vadd.f32 %v474_v34, %v6589_v36  ;;  %v4598_v34 = vld [vmem:[%s6531_s1 + $0xf8] sm:$0xff]  ;;  %2346 = vmatpush.msra.mxu2 %v4580_v46  ;;  %v6598_v46 = vld [vmem:[#allocation16_spill] sm:$0xff] }
 0x10a   : > { %v779_v6 = vadd.f32 %v751_v42, %v631_v41  ;;  %v902_v35 = vpop.f32.mrf.mxu0  ;;  %v6594_v41 = vld [vmem:[#allocation13_spill] sm:$0xff]  ;;  %v4544_v42 = vld [vmem:[%s6531_s1 + $0xc8] sm:$0xff]  ;;  %2494 = vmatpush.msra.mxu3 %v4598_v34 }
 0x10b   : > { %4430 = vmatmul.msk.f32.gmra.mxu1 %vm262_vm0, %v6585_v10  ;;  %2050 = vmatpush.msrb.mxu0 %v4544_v42  ;;  %v4543_v42 = vld [vmem:[%s6531_s1 + $0xc0] sm:$0xff]  ;;  %v6599_v34 = vld [vmem:[#allocation17_spill] sm:$0xff] }
 0x10c   : > { %v5380_v14 = vadd.f32 %v899_v28, %v779_v6  ;;  %4448 = vmatmul.msk.f32.gmra.mxu2 %vm262_vm0, %v6586_v27  ;;  %4466 = vmatmul.msk.f32.gmra.mxu3 %vm262_vm0, %v6587_v19  ;;  %v6591_v28 = vld [vmem:[#allocation4_spill] sm:$0xff]  ;;  %v6595_v6 = vld [vmem:[#allocation6_spill] sm:$0xff] }
 0x10d   : > { %4484 = vmatmul.msk.f32.gmra.mxu0 %vm262_vm0, %v6588_v30 }
 0x10e   : > { %2051 = vmatpush.msrb.mxu0 %v4543_v42  ;;  %v6606_v42 = vld [vmem:[#allocation15_spill] sm:$0xff] }
 0x10f   : > { %v606_v31 = vpop.f32.mrf.mxu2  ;;  %v754_v20 = vpop.f32.mrf.mxu3 }
 0x110   : > { %v632_v22 = vadd.f32 %v606_v31, %v475_v15  ;;  %v477_v23 = vpop.f32.mrf.mxu1  ;;  %v4562_v31 = vld [vmem:[%s6531_s1 + $0xd8] sm:$0xff] }
 0x111   : > { %2198 = vmatpush.msra.mxu1 %v4562_v31 }
 0x112   : > { %v780_v38 = vadd.f32 %v754_v20, %v632_v22  ;;  %v905_v39 = vpop.f32.mrf.mxu0 }
 0x113   : > { %4431 = vmatmul.msk.f32.gmra.mxu1 %vm262_vm0, %v6591_v28 }
 0x114   : > { %v5391_v29 = vadd.f32 %v902_v35, %v780_v38  ;;  %4449 = vmatmul.msk.f32.gmra.mxu2 %vm262_vm0, %v6592_v26  ;;  %4467 = vmatmul.msk.f32.gmra.mxu3 %vm262_vm0, %v6593_v48  ;;  %v478_v35 = vadd.f32 %v477_v23, %v6595_v6  ;;  %v6597_v23 = vld [vmem:[#allocation5_spill] sm:$0xff]  ;;  %v6600_v6 = vld [vmem:[#allocation18_spill] sm:$0xff] }
 0x115   : > { %4485 = vmatmul.msk.f32.gmra.mxu0 %vm262_vm0, %v6594_v41 }
 0x116   : > { %6590 = vst [vmem:[#allocation14_spill] sm:$0xff] %v5391_v29  ;;  %v5435_v29 = vld [vmem:[%s4865_s14 + $0x83] sm:$0xff] }
 0x117   : > { %v609_v10 = vpop.f32.mrf.mxu2  ;;  %v757_v15 = vpop.f32.mrf.mxu3  ;;  %6604 = vst [vmem:[#allocation9_spill] sm:$0xff] %v5435_v29 }
 0x118   : > { %v633_v36 = vadd.f32 %v609_v10, %v478_v35  ;;  %v480_v22 = vpop.f32.mrf.mxu1  ;;  %v6601_v35 = vld [vmem:[#allocation10_spill] sm:$0xff] }
 0x11a   : > { %v781_v20 = vadd.f32 %v757_v15, %v633_v36  ;;  %v908_v38 = vpop.f32.mrf.mxu0 }
 0x11b   : > { %4432 = vmatmul.msk.f32.gmra.mxu1 %vm262_vm0, %v6597_v23  ;;  %v5432_v23 = vld [vmem:[%s4865_s14 + $0x82] sm:$0xff] }
 0x11c   : > { %v5414_v28 = vadd.f32 %v905_v39, %v781_v20  ;;  %4450 = vmatmul.msk.f32.gmra.mxu2 %vm262_vm0, %v6598_v46  ;;  %4468 = vmatmul.msk.f32.gmra.mxu3 %vm262_vm0, %v6599_v34  ;;  %v481_v39 = vadd.f32 %v480_v22, %v6601_v35  ;;  %v5429_v20 = vld [vmem:[%s4865_s14 + $0x81] sm:$0xff]  ;;  %6603 = vst [vmem:[#allocation8_spill] sm:$0xff] %v5432_v23  ;;  %v5438_v46 = vld [vmem:[%s4865_s14 + $0x90] sm:$0xff] }
 0x11d   : > { %4486 = vmatmul.msk.f32.gmra.mxu0 %vm262_vm0, %v6600_v6  ;;  %6602 = vst [vmem:[#allocation7_spill] sm:$0xff] %v5429_v20  ;;  %v5461_v6 = vld [vmem:[%s4865_s14 + $0x98] sm:$0xff] }
 0x11e   : > { %6596 = vst [vmem:[#allocation3_spill] sm:$0xff] %v5414_v28 }
 0x11f   : > { %v612_v10 = vpop.f32.mrf.mxu2  ;;  %v760_v15 = vpop.f32.mrf.mxu3 }
 0x120   : > { %v634_v36 = vadd.f32 %v612_v10, %v481_v39  ;;  %v483_v31 = vpop.f32.mrf.mxu1 }
 0x121   : > { %v484_v35 = vadd.f32 %v483_v31, %v6606_v42  ;;  %v6608_v31 = vld [vmem:[#allocation20_spill] sm:$0xff] }
 0x122   : > { %v782_v28 = vadd.f32 %v760_v15, %v634_v36  ;;  %v911_v34 = vpop.f32.mrf.mxu0 }
 0x123   : > { %4433 = vmatmul.msk.f32.gmra.mxu1 %vm262_vm0, %v5429_v20  ;;  %v5458_v20 = vld [vmem:[%s4865_s14 + $0x8b] sm:$0xff] }
 0x124   : > { %v5440_v22 = vadd.f32 %v908_v38, %v782_v28  ;;  %4451 = vmatmul.msk.f32.gmra.mxu2 %vm262_vm0, %v5432_v23  ;;  %4469 = vmatmul.msk.f32.gmra.mxu3 %vm262_vm0, %v5435_v29  ;;  %v5452_v38 = vld [vmem:[%s4865_s14 + $0x89] sm:$0xff] }
 0x125   : > { %4487 = vmatmul.msk.f32.gmra.mxu0 %vm262_vm0, %v5438_v46  ;;  %v5455_v28 = vld [vmem:[%s4865_s14 + $0x8a] sm:$0xff] }
 0x126   : > { %6605 = vst [vmem:[#allocation19_spill] sm:$0xff] %v5440_v22 }
 0x127   : > { %v615_v39 = vpop.f32.mrf.mxu2  ;;  %v763_v36 = vpop.f32.mrf.mxu3 }
 0x128   : > { %v635_v10 = vadd.f32 %v615_v39, %v484_v35  ;;  %v486_v15 = vpop.f32.mrf.mxu1 }
 0x129   : > { %v487_v42 = vadd.f32 %v486_v15, %v6608_v31 }
 0x12a   : > { %v783_v22 = vadd.f32 %v763_v36, %v635_v10  ;;  %v914_v23 = vpop.f32.mrf.mxu0 }
 0x12b   : > { %4434 = vmatmul.msk.f32.gmra.mxu1 %vm262_vm0, %v5452_v38 }
 0x12c   : > { %v5463_v29 = vadd.f32 %v911_v34, %v783_v22  ;;  %4452 = vmatmul.msk.f32.gmra.mxu2 %vm262_vm0, %v5455_v28  ;;  %4470 = vmatmul.msk.f32.gmra.mxu3 %vm262_vm0, %v5458_v20 }
 0x12d   : > { %4488 = vmatmul.msk.f32.gmra.mxu0 %vm262_vm0, %v5461_v6 }
 0x12e   : > { %6607 = vst [vmem:[#allocation4_spill] sm:$0xff] %v5463_v29 }
 0x12f   : > { %v618_v35 = vpop.f32.mrf.mxu2  ;;  %v766_v10 = vpop.f32.mrf.mxu3 }
 0x130   : > { %v636_v39 = vadd.f32 %v618_v35, %v487_v42  ;;  %v1017_v36 = vpop.f32.mrf.mxu1 }
 0x131   : > { %v1065_v15 = vadd.f32 %v1017_v36, %v5264_v13 }
 0x132   : > { %v784_v34 = vadd.f32 %v766_v10, %v636_v39  ;;  %v1461_v22 = vpop.f32.mrf.mxu0 }
 0x133   : > { %4491 = vmatmul.msk.f32.vlgmr.msrb.gmra.mxu1 %vm262_vm0, %v4868_v8 }
 0x134   : > { %v5474_v29 = vadd.f32 %v914_v23, %v784_v34  ;;  %4509 = vmatmul.msk.f32.vlgmr.msrb.gmra.mxu2 %vm262_vm0, %v5005_v43  ;;  %4527 = vmatmul.msk.f32.vlgmr.msrb.gmra.mxu3 %vm262_vm0, %v5008_v44 }
 0x135   : > { %4545 = vmatmul.msk.f32.vlgmr.msrb.gmra.mxu0 %vm262_vm0, %v5011_v45 }
 0x137   : > { %v1165_v31 = vpop.f32.mrf.mxu2  ;;  %v1313_v35 = vpop.f32.mrf.mxu3 }
 0x138   : > { %v1213_v42 = vadd.f32 %v1165_v31, %v1065_v15  ;;  %v1020_v39 = vpop.f32.mrf.mxu1 }
 0x139   : > { %v1066_v8 = vadd.f32 %v1020_v39, %v5274_v32  ;;  %v5519_v39 = vld [vmem:[%s4865_s14 + $0x41] sm:$0xff] }
 0x13a   : > { %v1361_v23 = vadd.f32 %v1313_v35, %v1213_v42  ;;  %v1464_v10 = vpop.f32.mrf.mxu0 }
 0x13b   : > { %4492 = vmatmul.msk.f32.gmra.mxu1 %vm262_vm0, %v4885_v12 }
 0x13c   : > { %v5485_v34 = vadd.f32 %v1461_v22, %v1361_v23  ;;  %4510 = vmatmul.msk.f32.gmra.mxu2 %vm262_vm0, %v5031_v49  ;;  %4528 = vmatmul.msk.f32.gmra.mxu3 %vm262_vm0, %v5034_v50 }
 0x13d   : > { %4546 = vmatmul.msk.f32.gmra.mxu0 %vm262_vm0, %v5037_v51 }
 0x13f   : > { %v1168_v43 = vpop.f32.mrf.mxu2  ;;  %v1316_v45 = vpop.f32.mrf.mxu3 }
 0x140   : > { %v1214_v44 = vadd.f32 %v1168_v43, %v1066_v8  ;;  %v1023_v13 = vpop.f32.mrf.mxu1  ;;  %v4561_v43 = vld [vmem:[%s6531_s1 + $0xd0] sm:$0xff] }
 0x141   : > { %v1067_v12 = vadd.f32 %v1023_v13, %v5284_v17  ;;  %2199 = vmatpush.msra.mxu1 %v4561_v43 }
 0x142   : > { %v1362_v36 = vadd.f32 %v1316_v45, %v1214_v44  ;;  %v1467_v22 = vpop.f32.mrf.mxu0  ;;  %v5542_v44 = vld [vmem:[%s4865_s14 + $0x49] sm:$0xff] }
 0x143   : > { %4493 = vmatmul.msk.f32.gmra.mxu1 %vm262_vm0, %v4917_v21 }
 0x144   : > { %v5496_v15 = vadd.f32 %v1464_v10, %v1362_v36  ;;  %4511 = vmatmul.msk.f32.gmra.mxu2 %vm262_vm0, %v5048_v52  ;;  %4529 = vmatmul.msk.f32.gmra.mxu3 %vm262_vm0, %v5051_v53 }
 0x145   : > { %4547 = vmatmul.msk.f32.gmra.mxu0 %vm262_vm0, %v5054_v54 }
 0x147   : > { %v1171_v49 = vpop.f32.mrf.mxu2  ;;  %v1319_v51 = vpop.f32.mrf.mxu3 }
 0x148   : > { %v1215_v50 = vadd.f32 %v1171_v49, %v1067_v12  ;;  %v1026_v32 = vpop.f32.mrf.mxu1 }
 0x149   : > { %v1068_v21 = vadd.f32 %v1026_v32, %v5294_v24 }
 0x14a   : > { %v1363_v31 = vadd.f32 %v1319_v51, %v1215_v50  ;;  %v1470_v42 = vpop.f32.mrf.mxu0  ;;  %v5556_v50 = vld [vmem:[%s4865_s14 + $0x51] sm:$0xff] }
 0x14b   : > { %4494 = vmatmul.msk.f32.gmra.mxu1 %vm262_vm0, %v4937_v25 }
 0x14c   : > { %v5507_v35 = vadd.f32 %v1467_v22, %v1363_v31  ;;  %4512 = vmatmul.msk.f32.gmra.mxu2 %vm262_vm0, %v5065_v55  ;;  %4530 = vmatmul.msk.f32.gmra.mxu3 %vm262_vm0, %v5068_v56  ;;  %v4579_v55 = vld [vmem:[%s6531_s1 + $0xe0] sm:$0xff]  ;;  %v4597_v56 = vld [vmem:[%s6531_s1 + $0xf0] sm:$0xff] }
 0x14d   : > { %4548 = vmatmul.msk.f32.gmra.mxu0 %vm262_vm0, %v5071_v57  ;;  %2347 = vmatpush.msra.mxu2 %v4579_v55 }
 0x14e   : > { %2495 = vmatpush.msra.mxu3 %v4597_v56 }
 0x14f   : > { %v1174_v52 = vpop.f32.mrf.mxu2  ;;  %v1322_v54 = vpop.f32.mrf.mxu3 }
 0x150   : > { %v1216_v53 = vadd.f32 %v1174_v52, %v1068_v21  ;;  %v1029_v17 = vpop.f32.mrf.mxu1  ;;  %v5570_v21 = vld [vmem:[%s4865_s14 + $0x59] sm:$0xff] }
 0x151   : > { %v1069_v57 = vadd.f32 %v1029_v17, %v5314_v47 }
 0x152   : > { %v1364_v23 = vadd.f32 %v1322_v54, %v1216_v53  ;;  %v1473_v10 = vpop.f32.mrf.mxu0 }
 0x153   : > { %4495 = vmatmul.msk.f32.gmra.mxu1 %vm262_vm0, %v5519_v39 }
 0x154   : > { %v5521_v25 = vadd.f32 %v1470_v42, %v1364_v23  ;;  %4513 = vmatmul.msk.f32.gmra.mxu2 %vm262_vm0, %v5082_v58  ;;  %4531 = vmatmul.msk.f32.gmra.mxu3 %vm262_vm0, %v5085_v59  ;;  %v5584_v23 = vld [vmem:[%s4865_s14 + $0x61] sm:$0xff] }
 0x155   : > { %4549 = vmatmul.msk.f32.gmra.mxu0 %vm262_vm0, %v5088_v60 }
 0x157   : > { %v1177_v24 = vpop.f32.mrf.mxu2  ;;  %v1325_v8 = vpop.f32.mrf.mxu3 }
 0x158   : > { %v1217_v58 = vadd.f32 %v1177_v24, %v1069_v57  ;;  %v1032_v59 = vpop.f32.mrf.mxu1  ;;  %v5598_v57 = vld [vmem:[%s4865_s14 + $0x69] sm:$0xff] }
 0x159   : > { %v1070_v13 = vadd.f32 %v1032_v59, %v5325_v33 }
 0x15a   : > { %v1365_v60 = vadd.f32 %v1325_v8, %v1217_v58  ;;  %v1476_v47 = vpop.f32.mrf.mxu0  ;;  %v5612_v8 = vld [vmem:[%s4865_s14 + $0x71] sm:$0xff] }
 0x15b   : > { %4496 = vmatmul.msk.f32.gmra.mxu1 %vm262_vm0, %v5542_v44 }
 0x15c   : > { %v5544_v45 = vadd.f32 %v1473_v10, %v1365_v60  ;;  %4514 = vmatmul.msk.f32.gmra.mxu2 %vm262_vm0, %v5099_v61  ;;  %4532 = vmatmul.msk.f32.gmra.mxu3 %vm262_vm0, %v5102_v62  ;;  %v5626_v60 = vld [vmem:[%s4865_s14 + $0x79] sm:$0xff] }
 0x15d   : > { %4550 = vmatmul.msk.f32.gmra.mxu0 %vm262_vm0, %v5105_v63 }
 0x15f   : > { %v1180_v36 = vpop.f32.mrf.mxu2  ;;  %v1328_v12 = vpop.f32.mrf.mxu3 }
 0x160   : > { %v1218_v22 = vadd.f32 %v1180_v36, %v1070_v13  ;;  %v1035_v49 = vpop.f32.mrf.mxu1 }
 0x161   : > { %v1071_v61 = vadd.f32 %v1035_v49, %v5336_v40 }
 0x162   : > { %v1366_v51 = vadd.f32 %v1328_v12, %v1218_v22  ;;  %v1479_v63 = vpop.f32.mrf.mxu0 }
 0x163   : > { %4497 = vmatmul.msk.f32.gmra.mxu1 %vm262_vm0, %v5556_v50 }
 0x164   : > { %v5558_v32 = vadd.f32 %v1476_v47, %v1366_v51  ;;  %4515 = vmatmul.msk.f32.gmra.mxu2 %vm262_vm0, %v5116_v0  ;;  %4533 = vmatmul.msk.f32.gmra.mxu3 %vm262_vm0, %v5119_v1 }
 0x165   : > { %4551 = vmatmul.msk.f32.gmra.mxu0 %vm262_vm0, %v5122_v2 }
 0x167   : > { %v1183_v62 = vpop.f32.mrf.mxu2  ;;  %v1331_v31 = vpop.f32.mrf.mxu3 }
 0x168   : > { %v1219_v33 = vadd.f32 %v1183_v62, %v1071_v61  ;;  %v1038_v42 = vpop.f32.mrf.mxu1  ;;  %v6613_v61 = vld [vmem:[#allocation7_spill] sm:$0xff]  ;;  %v6614_v62 = vld [vmem:[#allocation8_spill] sm:$0xff] }
 0x169   : > { %v1072_v0 = vadd.f32 %v1038_v42, %v5347_v18 }
 0x16a   : > { %v1367_v52 = vadd.f32 %v1331_v31, %v1219_v33  ;;  %v1482_v17 = vpop.f32.mrf.mxu0  ;;  %v6616_v33 = vld [vmem:[#allocation3_spill] sm:$0xff] }
 0x16b   : > { %4498 = vmatmul.msk.f32.gmra.mxu1 %vm262_vm0, %v5570_v21 }
 0x16c   : > { %v5572_v53 = vadd.f32 %v1479_v63, %v1367_v52  ;;  %4516 = vmatmul.msk.f32.gmra.mxu2 %vm262_vm0, %v5133_v3  ;;  %4534 = vmatmul.msk.f32.gmra.mxu3 %vm262_vm0, %v5136_v4  ;;  %v6615_v63 = vld [vmem:[#allocation9_spill] sm:$0xff] }
 0x16d   : > { %4552 = vmatmul.msk.f32.gmra.mxu0 %vm262_vm0, %v5139_v5 }
 0x16f   : > { %v1186_v1 = vpop.f32.mrf.mxu2  ;;  %v1334_v40 = vpop.f32.mrf.mxu3 }
 0x170   : > { %v1220_v2 = vadd.f32 %v1186_v1, %v1072_v0  ;;  %v1041_v54 = vpop.f32.mrf.mxu1 }
 0x171   : > { %v1073_v3 = vadd.f32 %v1041_v54, %v5358_v37 }
 0x172   : > { %v1368_v10 = vadd.f32 %v1334_v40, %v1220_v2 }
 0x173   : > { %4499 = vmatmul.msk.f32.gmra.mxu1 %vm262_vm0, %v5584_v23 }
 0x174   : > { %v5586_v55 = vadd.f32 %v1482_v17, %v1368_v10  ;;  %4517 = vmatmul.msk.f32.gmra.mxu2 %vm262_vm0, %v5152_v7  ;;  %4535 = vmatmul.msk.f32.gmra.mxu3 %vm262_vm0, %v5155_v11 }
 0x175   : > { %4553 = vmatmul.msk.f32.gmra.mxu0 %vm262_vm0, %v5158_v16 }
 0x177   : > { %v1189_v4 = vpop.f32.mrf.mxu2  ;;  %v1337_v18 = vpop.f32.mrf.mxu3 }
 0x178   : > { %v1221_v5 = vadd.f32 %v1189_v4, %v1073_v3  ;;  %v1044_v56 = vpop.f32.mrf.mxu1  ;;  %v5662_v4 = vld [vmem:[%s4865_s14 + $0x91] sm:$0xff] }
 0x179   : > { %v1074_v7 = vadd.f32 %v1044_v56, %v5369_v9  ;;  %v5670_v56 = vld [vmem:[%s4865_s14 + $0x93] sm:$0xff] }
 0x17a   : > { %v5600_v24 = vadd.f32 %v1337_v18, %v1221_v5  ;;  %v5665_v5 = vld [vmem:[%s4865_s14 + $0x92] sm:$0xff] }
 0x17b   : > { %4500 = vmatmul.msk.f32.gmra.mxu1 %vm262_vm0, %v5598_v57 }
 0x17c   : > { %4518 = vmatmul.msk.f32.gmra.mxu2 %vm262_vm0, %v6586_v27  ;;  %4536 = vmatmul.msk.f32.gmra.mxu3 %vm262_vm0, %v6587_v19 }
 0x17d   : > { %4554 = vmatmul.msk.f32.gmra.mxu0 %vm262_vm0, %v6588_v30 }
 0x17f   : > { %v1192_v11 = vpop.f32.mrf.mxu2  ;;  %v1340_v37 = vpop.f32.mrf.mxu3 }
 0x180   : > { %v1222_v16 = vadd.f32 %v1192_v11, %v1074_v7  ;;  %v1047_v58 = vpop.f32.mrf.mxu1  ;;  %v1983_v7 = vld [vmem:[%s4865_s14 + $0xa0] sm:$0xff]  ;;  %v6618_v11 = vld [vmem:[#allocation4_spill] sm:$0xff] }
 0x181   : > { %v1075_v9 = vadd.f32 %v1047_v58, %v5380_v14  ;;  %v6612_v14 = vld [vmem:[#allocation14_spill] sm:$0xff] }
 0x182   : > { %v5614_v43 = vadd.f32 %v1340_v37, %v1222_v16 }
 0x183   : > { %4501 = vmatmul.msk.f32.gmra.mxu1 %vm262_vm0, %v5612_v8 }
 0x184   : > { %4519 = vmatmul.msk.f32.gmra.mxu2 %vm262_vm0, %v6592_v26  ;;  %4537 = vmatmul.msk.f32.gmra.mxu3 %vm262_vm0, %v6593_v48  ;;  %v6609_v26 = vld [vmem:[#allocation16_spill] sm:$0xff]  ;;  %v6610_v48 = vld [vmem:[#allocation17_spill] sm:$0xff] }
 0x185   : > { %4555 = vmatmul.msk.f32.gmra.mxu0 %vm262_vm0, %v6594_v41  ;;  %v6611_v41 = vld [vmem:[#allocation18_spill] sm:$0xff] }
 0x187   : > { %v1195_v27 = vpop.f32.mrf.mxu2  ;;  %v1343_v30 = vpop.f32.mrf.mxu3 }
 0x188   : > { %v1223_v19 = vadd.f32 %v1195_v27, %v1075_v9  ;;  %v1050_v59 = vpop.f32.mrf.mxu1 }
 0x189   : > { %v1076_v13 = vadd.f32 %v1050_v59, %v6612_v14 }
 0x18a   : > { %v5628_v47 = vadd.f32 %v1343_v30, %v1223_v19  ;;  %v5685_v19 = vld [vmem:[%s4865_s14 + $0x99] sm:$0xff] }
 0x18b   : > { %4502 = vmatmul.msk.f32.gmra.mxu1 %vm262_vm0, %v5626_v60  ;;  %v5688_v30 = vld [vmem:[%s4865_s14 + $0x9a] sm:$0xff] }
 0x18c   : > { %4520 = vmatmul.msk.f32.gmra.mxu2 %vm262_vm0, %v6609_v26  ;;  %4538 = vmatmul.msk.f32.gmra.mxu3 %vm262_vm0, %v6610_v48  ;;  %v5693_v26 = vld [vmem:[%s4865_s14 + $0x9b] sm:$0xff]  ;;  %v1984_v48 = vld [vmem:[%s4865_s14 + $0xa8] sm:$0xff] }
 0x18d   : > { %4556 = vmatmul.msk.f32.gmra.mxu0 %vm262_vm0, %v6611_v41 }
 0x18f   : > { %v1198_v36 = vpop.f32.mrf.mxu2  ;;  %v1346_v12 = vpop.f32.mrf.mxu3 }
 0x190   : > { %v1224_v22 = vadd.f32 %v1198_v36, %v1076_v13  ;;  %v1053_v49 = vpop.f32.mrf.mxu1 }
 0x191   : > { %v1077_v31 = vadd.f32 %v1053_v49, %v6616_v33  ;;  %v2265_v49 = vld [vmem:[%s4865_s14 + $0x32] sm:$0xff] }
 0x192   : > { %v5639_v51 = vadd.f32 %v1346_v12, %v1224_v22  ;;  %v2117_v12 = vld [vmem:[%s4865_s14 + $0x31] sm:$0xff] }
 0x193   : > { %4503 = vmatmul.msk.f32.gmra.mxu1 %vm262_vm0, %v6613_v61 }
 0x194   : > { %4521 = vmatmul.msk.f32.gmra.mxu2 %vm262_vm0, %v6614_v62  ;;  %4539 = vmatmul.msk.f32.gmra.mxu3 %vm262_vm0, %v6615_v63 }
 0x195   : > { %4557 = vmatmul.msk.f32.gmra.mxu0 %vm262_vm0, %v5438_v46  ;;  %v6617_v46 = vld [vmem:[#allocation19_spill] sm:$0xff] }
 0x197   : > { %v1201_v42 = vpop.f32.mrf.mxu2  ;;  %v1349_v0 = vpop.f32.mrf.mxu3 }
 0x198   : > { %v1225_v52 = vadd.f32 %v1201_v42, %v1077_v31  ;;  %v1056_v1 = vpop.f32.mrf.mxu1  ;;  %v2413_v31 = vld [vmem:[%s4865_s14 + $0x33] sm:$0xff] }
 0x199   : > { %v1078_v40 = vadd.f32 %v1056_v1, %v6617_v46  ;;  %v2118_v46 = vld [vmem:[%s4865_s14 + $0x39] sm:$0xff] }
 0x19a   : > { %v5650_v2 = vadd.f32 %v1349_v0, %v1225_v52 }
 0x19b   : > { %4504 = vmatmul.msk.f32.gmra.mxu1 %vm262_vm0, %v5452_v38 }
 0x19c   : > { %4522 = vmatmul.msk.f32.gmra.mxu2 %vm262_vm0, %v5455_v28  ;;  %4540 = vmatmul.msk.f32.gmra.mxu3 %vm262_vm0, %v5458_v20 }
 0x19d   : > { %4558 = vmatmul.msk.f32.gmra.mxu0 %vm262_vm0, %v5461_v6  ;;  %v4615_v6 = vld [vmem:[%s6533_s3 + $0x8] sm:$0xff] }
 0x19e   : > { %3022 = vmatpush.msra.mxu0 %v4615_v6 }
 0x19f   : > { %v1204_v54 = vpop.f32.mrf.mxu2  ;;  %v1352_v10 = vpop.f32.mrf.mxu3 }
 0x1a0   : > { %v1226_v17 = vadd.f32 %v1204_v54, %v1078_v40  ;;  %v1059_v3 = vpop.f32.mrf.mxu1  ;;  %v2266_v40 = vld [vmem:[%s4865_s14 + $0x3a] sm:$0xff] }
 0x1a1   : > { %v1079_v16 = vadd.f32 %v1059_v3, %v6618_v11  ;;  %v2267_v11 = vld [vmem:[%s4865_s14 + $0x42] sm:$0xff] }
 0x1a2   : > { %v5667_v18 = vadd.f32 %v1352_v10, %v1226_v17  ;;  %v2414_v17 = vld [vmem:[%s4865_s14 + $0x3b] sm:$0xff] }
 0x1a3   : > { %4505 = vmatmul.msk.f32.gmra.mxu1 %vm262_vm0, %v5662_v4 }
 0x1a4   : > { %4523 = vmatmul.msk.f32.gmra.mxu2 %vm262_vm0, %v5665_v5  ;;  %4541 = vmatmul.msk.f32.gmra.mxu3 %vm262_vm0, %v5670_v56 }
 0x1a5   : > { %4559 = vmatmul.msk.f32.gmra.mxu0 %vm262_vm0, %v1983_v7 }
 0x1a7   : > { %v1207_v37 = vpop.f32.mrf.mxu2  ;;  %v1355_v9 = vpop.f32.mrf.mxu3 }
 0x1a8   : > { %v1227_v58 = vadd.f32 %v1207_v37, %v1079_v16  ;;  %v1062_v27 = vpop.f32.mrf.mxu1  ;;  %v2415_v37 = vld [vmem:[%s4865_s14 + $0x43] sm:$0xff] }
 0x1a9   : > { %v1080_v41 = vadd.f32 %v1062_v27, %v5474_v29 }
 0x1aa   : > { %v5690_v59 = vadd.f32 %v1355_v9, %v1227_v58  ;;  %v5726_v58 = vpop.f32.mrf.mxu0 }
 0x1ab   : > { %4506 = vmatmul.msk.f32.gmra.mxu1 %vm262_vm0, %v5685_v19 }
 0x1ac   : > { %4524 = vmatmul.msk.f32.gmra.mxu2 %vm262_vm0, %v5688_v30  ;;  %4542 = vmatmul.msk.f32.gmra.mxu3 %vm262_vm0, %v5693_v26 }
 0x1ad   : > { %4560 = vmatmul.msk.f32.gmra.mxu0 %vm262_vm0, %v1984_v48 }
 0x1af   : > { %v1210_v14 = vpop.f32.mrf.mxu2  ;;  %v1358_v36 = vpop.f32.mrf.mxu3 }
 0x1b0   : > { %v1228_v13 = vadd.f32 %v1210_v14, %v1080_v41  ;;  %v1609_v22 = vpop.f32.mrf.mxu1  ;;  %v2268_v14 = vld [vmem:[%s4865_s14 + $0x4a] sm:$0xff] }
 0x1b1   : > { %v1657_v29 = vadd.f32 %v1609_v22, %v5485_v34 }
 0x1b2   : > { %v5706_v33 = vadd.f32 %v1358_v36, %v1228_v13  ;;  %v2416_v36 = vld [vmem:[%s4865_s14 + $0x4b] sm:$0xff] }
 0x1b3   : > { %4563 = vmatmul.msk.f32.vlgmr.msra.gmra.mxu1 %vm262_vm0, %v2117_v12 }
 0x1b4   : > { %4581 = vmatmul.msk.f32.vlgmr.msra.gmra.mxu2 %vm262_vm0, %v2265_v49  ;;  %4599 = vmatmul.msk.f32.vlgmr.msra.gmra.mxu3 %vm262_vm0, %v2413_v31 }
 0x1b7   : > { %v1757_v42 = vpop.f32.mrf.mxu2  ;;  %v1905_v0 = vpop.f32.mrf.mxu3 }
 0x1b8   : > { %v1805_v52 = vadd.f32 %v1757_v42, %v1657_v29  ;;  %v1612_v1 = vpop.f32.mrf.mxu1  ;;  %v2269_v29 = vld [vmem:[%s4865_s14 + $0x52] sm:$0xff] }
 0x1b9   : > { %v1658_v10 = vadd.f32 %v1612_v1, %v5496_v15 }
 0x1ba   : > { %v5715_v54 = vadd.f32 %v1905_v0, %v1805_v52  ;;  %v2417_v52 = vld [vmem:[%s4865_s14 + $0x53] sm:$0xff] }
 0x1bb   : > { %4564 = vmatmul.msk.f32.gmra.mxu1 %vm262_vm0, %v2118_v46 }
 0x1bc   : > { %4582 = vmatmul.msk.f32.gmra.mxu2 %vm262_vm0, %v2266_v40  ;;  %4600 = vmatmul.msk.f32.gmra.mxu3 %vm262_vm0, %v2414_v17  ;;  %v2270_v17 = vld [vmem:[%s4865_s14 + $0x5a] sm:$0xff] }
 0x1bf   : > { %v1760_v34 = vpop.f32.mrf.mxu2  ;;  %v1908_v7 = vpop.f32.mrf.mxu3 }
 0x1c0   : > { %v1806_v3 = vadd.f32 %v1760_v34, %v1658_v10  ;;  %v1615_v6 = vpop.f32.mrf.mxu1  ;;  %v2418_v34 = vld [vmem:[%s4865_s14 + $0x5b] sm:$0xff] }
 0x1c1   : > { %v1659_v15 = vadd.f32 %v1615_v6, %v5507_v35 }
 0x1c2   : > { %v5723_v16 = vadd.f32 %v1908_v7, %v1806_v3 }
 0x1c3   : > { %4565 = vmatmul.msk.f32.gmra.mxu1 %vm262_vm0, %v5519_v39  ;;  %v5740_v39 = vpop.f32.mrf.mxu0 }
 0x1c4   : > { %4583 = vmatmul.msk.f32.gmra.mxu2 %vm262_vm0, %v2267_v11  ;;  %4601 = vmatmul.msk.f32.gmra.mxu3 %vm262_vm0, %v2415_v37  ;;  %v2271_v37 = vld [vmem:[%s4865_s14 + $0x62] sm:$0xff] }
 0x1c7   : > { %v1763_v9 = vpop.f32.mrf.mxu2  ;;  %v1911_v48 = vpop.f32.mrf.mxu3 }
 0x1c8   : > { %v1807_v27 = vadd.f32 %v1763_v9, %v1659_v15  ;;  %v1618_v41 = vpop.f32.mrf.mxu1  ;;  %v2419_v9 = vld [vmem:[%s4865_s14 + $0x63] sm:$0xff] }
 0x1c9   : > { %v1660_v35 = vadd.f32 %v1618_v41, %v5521_v25 }
 0x1ca   : > { %v5734_v13 = vadd.f32 %v1911_v48, %v1807_v27 }
 0x1cb   : > { %4566 = vmatmul.msk.f32.gmra.mxu1 %vm262_vm0, %v5542_v44  ;;  %v5753_v25 = vpop.f32.mrf.mxu0 }
 0x1cc   : > { %4584 = vmatmul.msk.f32.gmra.mxu2 %vm262_vm0, %v2268_v14  ;;  %4602 = vmatmul.msk.f32.gmra.mxu3 %vm262_vm0, %v2416_v36  ;;  %v2272_v14 = vld [vmem:[%s4865_s14 + $0x6a] sm:$0xff] }
 0x1cf   : > { %v1766_v22 = vpop.f32.mrf.mxu2  ;;  %v1914_v49 = vpop.f32.mrf.mxu3 }
 0x1d0   : > { %v1808_v12 = vadd.f32 %v1766_v22, %v1660_v35  ;;  %v1621_v31 = vpop.f32.mrf.mxu1  ;;  %v2420_v35 = vld [vmem:[%s4865_s14 + $0x6b] sm:$0xff] }
 0x1d1   : > { %v1661_v44 = vadd.f32 %v1621_v31, %v5544_v45 }
 0x1d2   : > { %v5745_v42 = vadd.f32 %v1914_v49, %v1808_v12 }
 0x1d3   : > { %4567 = vmatmul.msk.f32.gmra.mxu1 %vm262_vm0, %v5556_v50  ;;  %v5764_v6 = vpop.f32.mrf.mxu0 }
 0x1d4   : > { %4585 = vmatmul.msk.f32.gmra.mxu2 %vm262_vm0, %v2269_v29  ;;  %4603 = vmatmul.msk.f32.gmra.mxu3 %vm262_vm0, %v2417_v52  ;;  %v2273_v29 = vld [vmem:[%s4865_s14 + $0x72] sm:$0xff] }
 0x1d7   : > { %v1769_v0 = vpop.f32.mrf.mxu2  ;;  %v1917_v46 = vpop.f32.mrf.mxu3 }
 0x1d8   : > { %v1809_v1 = vadd.f32 %v1769_v0, %v1661_v44  ;;  %v1624_v40 = vpop.f32.mrf.mxu1  ;;  %v2421_v44 = vld [vmem:[%s4865_s14 + $0x73] sm:$0xff]  ;;  %v1517_v0 = vadd.f32 %v5726_v58, %v5600_v24 }
 0x1d9   : > { %v1662_v45 = vadd.f32 %v1624_v40, %v5558_v32 }
 0x1da   : > { %v5756_v10 = vadd.f32 %v1917_v46, %v1809_v1 }
 0x1db   : > { %4568 = vmatmul.msk.f32.gmra.mxu1 %vm262_vm0, %v5570_v21  ;;  %v5779_v22 = vpop.f32.mrf.mxu0 }
 0x1dc   : > { %4586 = vmatmul.msk.f32.gmra.mxu2 %vm262_vm0, %v2270_v17  ;;  %4604 = vmatmul.msk.f32.gmra.mxu3 %vm262_vm0, %v2418_v34  ;;  %v2274_v34 = vld [vmem:[%s4865_s14 + $0x7a] sm:$0xff] }
 0x1df   : > { %v1772_v50 = vpop.f32.mrf.mxu2  ;;  %v1920_v7 = vpop.f32.mrf.mxu3 }
 0x1e0   : > { %v1810_v3 = vadd.f32 %v1772_v50, %v1662_v45  ;;  %v1627_v11 = vpop.f32.mrf.mxu1  ;;  %v2422_v45 = vld [vmem:[%s4865_s14 + $0x7b] sm:$0xff] }
 0x1e1   : > { %v1663_v32 = vadd.f32 %v1627_v11, %v5572_v53 }
 0x1e2   : > { %v5767_v15 = vadd.f32 %v1920_v7, %v1810_v3 }
 0x1e3   : > { %4569 = vmatmul.msk.f32.gmra.mxu1 %vm262_vm0, %v5584_v23 }
 0x1e4   : > { %4587 = vmatmul.msk.f32.gmra.mxu2 %vm262_vm0, %v2271_v37  ;;  %4605 = vmatmul.msk.f32.gmra.mxu3 %vm262_vm0, %v2419_v9  ;;  %v4796_v37 = vmov 0.0  }
 0x1e5   : > { %2903 = vst.msk [vmem:[#allocation2] sm:$0xff] %vm2902_vm1, %v4796_v37 }
 0x1e6   : > { %2904 = vst.msk [vmem:[#allocation2 + $0x8] sm:$0xff] %vm2902_vm1, %v4796_v37 }
 0x1e7   : > { %v1775_v21 = vpop.f32.mrf.mxu2  ;;  %v1923_v48 = vpop.f32.mrf.mxu3  ;;  %2905 = vst.msk [vmem:[#allocation2 + $0x90] sm:$0xff] %vm2902_vm1, %v4796_v37 }
 0x1e8   : > { %v1811_v27 = vadd.f32 %v1775_v21, %v1663_v32  ;;  %v1630_v41 = vpop.f32.mrf.mxu1  ;;  %2906 = vst.msk [vmem:[#allocation2 + $0x98] sm:$0xff] %vm2902_vm1, %v4796_v37 }
 0x1e9   : > { %v1664_v53 = vadd.f32 %v1630_v41, %v5586_v55  ;;  %2907 = vst.msk [vmem:[#allocation2 + $0xa0] sm:$0xff] %vm2902_vm1, %v4796_v37  ;;  %v2131_v41 = vld [vmem:[%s4865_s14 + $0xa1] sm:$0xff] }
 0x1ea   : > { %v5776_v36 = vadd.f32 %v1923_v48, %v1811_v27 }
 0x1eb   : > { %4570 = vmatmul.msk.f32.gmra.mxu1 %vm262_vm0, %v5598_v57  ;;  %v5795_v57 = vpop.f32.mrf.mxu0 }
 0x1ec   : > { %4588 = vmatmul.msk.f32.gmra.mxu2 %vm262_vm0, %v2272_v14  ;;  %4606 = vmatmul.msk.f32.gmra.mxu3 %vm262_vm0, %v2420_v35  ;;  %v2279_v14 = vld [vmem:[%s4865_s14 + $0xa2] sm:$0xff] }
 0x1ed   : > { %v2941_v27 = vld [vmem:[#allocation2 + $0x1] sm:$0xff] }
 0x1ee   : > { %4616 = vmatmul.msk.f32.vlgmr.msra.gmra.mxu0 %vm2902_vm1, %v2941_v27  ;;  %v3185_v37 = vld [vmem:[#allocation2 + $0x2] sm:$0xff] }
 0x1ef   : > { %v1778_v23 = vpop.f32.mrf.mxu2  ;;  %v1926_v49 = vpop.f32.mrf.mxu3 }
 0x1f0   : > { %v1812_v12 = vadd.f32 %v1778_v23, %v1664_v53  ;;  %v1633_v31 = vpop.f32.mrf.mxu1 }
 0x1f1   : > { %v1665_v55 = vadd.f32 %v1633_v31, %v1517_v0  ;;  %v4682_v31 = vld [vmem:[%s6533_s3 + $0x20] sm:$0xff] }
 0x1f2   : > { %v5787_v52 = vadd.f32 %v1926_v49, %v1812_v12  ;;  %v2132_v12 = vld [vmem:[%s4865_s14 + $0xa9] sm:$0xff]  ;;  %3560 = vmatpush.msrb.mxu0 %v4682_v31 }
 0x1f3   : > { %4571 = vmatmul.msk.f32.gmra.mxu1 %vm262_vm0, %v5612_v8  ;;  %v5810_v24 = vpop.f32.mrf.mxu0  ;;  %v2280_v49 = vld [vmem:[%s4865_s14 + $0xaa] sm:$0xff] }
 0x1f4   : > { %4589 = vmatmul.msk.f32.gmra.mxu2 %vm262_vm0, %v2273_v29  ;;  %4607 = vmatmul.msk.f32.gmra.mxu3 %vm262_vm0, %v2421_v44  ;;  %v2428_v29 = vld [vmem:[%s4865_s14 + $0xab] sm:$0xff] }
 0x1f5   : > { %v2925_v31 = vld [vmem:[#allocation2 + $0x8] sm:$0xff] }
 0x1f7   : > { %v1781_v1 = vpop.f32.mrf.mxu2  ;;  %v5800_v40 = vpop.f32.mrf.mxu3 }
 0x1f8   : > { %v5798_v46 = vadd.f32 %v1781_v1, %v1665_v55  ;;  %v5802_v17 = vpop.f32.mrf.mxu1 }
 0x1fb   : > { %4572 = vmatmul.msk.f32.gmra.mxu1 %vm262_vm0, %v5626_v60  ;;  %v5828_v7 = vpop.f32.mrf.mxu0 }
 0x1fc   : > { %4590 = vmatmul.msk.f32.gmra.mxu2 %vm262_vm0, %v2274_v34  ;;  %4608 = vmatmul.msk.f32.gmra.mxu3 %vm262_vm0, %v2422_v45  ;;  %v2597_v34 = vlaneseq  ;;  %v2924_v45 = vld [vmem:[#allocation2] sm:$0xff] }
 0x1ff   : > { %v5812_v8 = vpop.f32.mrf.mxu2  ;;  %v5814_v58 = vpop.f32.mrf.mxu3 }
 0x200   : > { %v5816_v50 = vpop.f32.mrf.mxu1 }
 0x203   : > { %4573 = vmatmul.msk.f32.gmra.mxu1 %vm262_vm0, %v6613_v61  ;;  %v2053_v9 = vpop.f32.mrf.mxu0 }
 0x204   : > { %4591 = vmatmul.msk.f32.gmra.mxu2 %vm262_vm0, %v6614_v62  ;;  %4609 = vmatmul.msk.f32.gmra.mxu3 %vm262_vm0, %v6615_v63 }
 0x207   : > { %v5824_v60 = vpop.f32.mrf.mxu2  ;;  %v5826_v3 = vpop.f32.mrf.mxu3 }
 0x208   : > { %v5830_v11 = vpop.f32.mrf.mxu1 }
 0x20b   : > { %4574 = vmatmul.msk.f32.gmra.mxu1 %vm262_vm0, %v5452_v38  ;;  %v2940_v38 = vld [vmem:[%s6533_s3] sm:$0xff] }
 0x20c   : > { %4592 = vmatmul.msk.f32.gmra.mxu2 %vm262_vm0, %v5455_v28  ;;  %4610 = vmatmul.msk.f32.gmra.mxu3 %vm262_vm0, %v5458_v20 }
 0x20d   : > { %3135 = vmatpush.msrb.mxu1 %v2940_v38  ;;  %v2101_v38 = vadd.f32 %v2053_v9, %v5715_v54 }
 0x20f   : > { %v5838_v61 = vpop.f32.mrf.mxu2  ;;  %v5840_v62 = vpop.f32.mrf.mxu3 }
 0x210   : > { %v5842_v63 = vpop.f32.mrf.mxu1 }
 0x213   : > { %4575 = vmatmul.msk.f32.gmra.mxu1 %vm262_vm0, %v5662_v4  ;;  %v4648_v4 = vld [vmem:[%s6533_s3 + $0x10] sm:$0xff] }
 0x214   : > { %4593 = vmatmul.msk.f32.gmra.mxu2 %vm262_vm0, %v5665_v5  ;;  %4611 = vmatmul.msk.f32.gmra.mxu3 %vm262_vm0, %v5670_v56  ;;  %v2056_v56 = vpop.f32.mrf.mxu0 }
 0x215   : > { %3266 = vmatpush.msrb.mxu2 %v4648_v4  ;;  %v5911_v4 = vshrl.u32 %v2597_v34, 7 }
 0x217   : > { %v5855_v20 = vpop.f32.mrf.mxu2  ;;  %v5860_v28 = vpop.f32.mrf.mxu3 }
 0x218   : > { %v5865_v5 = vpop.f32.mrf.mxu1 }
 0x21b   : > { %4576 = vmatmul.msk.f32.gmra.mxu1 %vm262_vm0, %v5685_v19  ;;  %v4665_v19 = vld [vmem:[%s6533_s3 + $0x18] sm:$0xff] }
 0x21c   : > { %4594 = vmatmul.msk.f32.gmra.mxu2 %vm262_vm0, %v5688_v30  ;;  %4612 = vmatmul.msk.f32.gmra.mxu3 %vm262_vm0, %v5693_v26  ;;  %v2427_v30 = vld [vmem:[%s4865_s14 + $0xa3] sm:$0xff]  ;;  %v2059_v26 = vpop.f32.mrf.mxu0 }
 0x21d   : > { %3413 = vmatpush.msrb.mxu3 %v4665_v19 }
 0x21f   : > { %v5873_v32 = vpop.f32.mrf.mxu2  ;;  %v5875_v21 = vpop.f32.mrf.mxu3 }
 0x220   : > { %v5877_v48 = vpop.f32.mrf.mxu1 }
 0x223   : > { %4577 = vmatmul.msk.f32.gmra.mxu1 %vm262_vm0, %v2131_v41 }
 0x224   : > { %4595 = vmatmul.msk.f32.gmra.mxu2 %vm262_vm0, %v2279_v14  ;;  %4613 = vmatmul.msk.f32.gmra.mxu3 %vm262_vm0, %v2427_v30  ;;  %v2062_v55 = vpop.f32.mrf.mxu0  ;;  %v5916_v30 = vld [vmem:[%s6532_s2] ss:$0 sm:$0xff] }
 0x227   : > { %v5889_v35 = vpop.f32.mrf.mxu2  ;;  %v5891_v53 = vpop.f32.mrf.mxu3 }
 0x228   : > { %v5893_v23 = vpop.f32.mrf.mxu1 }
 0x229   : > { %6619 = vst [vmem:[#allocation11_spill] sm:$0xff] %v5893_v23 }
 0x22b   : > { %4578 = vmatmul.msk.f32.gmra.mxu1 %vm262_vm0, %v2132_v12 }
 0x22c   : > { %4596 = vmatmul.msk.f32.gmra.mxu2 %vm262_vm0, %v2280_v49  ;;  %4614 = vmatmul.msk.f32.gmra.mxu3 %vm262_vm0, %v2428_v29  ;;  %v2618_v49 = vand.u32 15, %v5911_v4  ;;  %v2065_v9 = vpop.f32.mrf.mxu0  ;;  %v2102_v29 = vadd.f32 %v2056_v56, %v5723_v16  ;;  %v2103_v16 = vadd.f32 %v2059_v26, %v5734_v13 }
 0x22e   : > { %vm2806_vm2 = vcmp.ge.s32.totalorder %v2618_v49, 1  ;;  %v2600_v49 = vadd.s32 16, %v5911_v4 }
 0x22f   : > { %v5904_v44 = vpop.f32.mrf.mxu2  ;;  %v5906_v0 = vpop.f32.mrf.mxu3 }
 0x230   : > { %6620 = vst [vmem:[#allocation12_spill] sm:$0xff] %v5904_v44  ;;  %v2201_v1 = vpop.f32.mrf.mxu1  ;;  %v2632_v13 = vand.u32 15, %v2600_v49 }
 0x231   : > { %6621 = vst [vmem:[#allocation13_spill] sm:$0xff] %v5906_v0  ;;  %v2249_v27 = vadd.f32 %v2201_v1, %v2101_v38  ;;  %v2599_v1 = vadd.s32 8, %v5911_v4 }
 0x232   : > { %vm2808_vm4 = vcmp.ge.s32.totalorder %v2632_v13, 1 }
 0x233   : > { %4632 = vmatmul.msk.f32.vlgmr.msrb.gmra.mxu1 %vm2902_vm1, %v2924_v45 }
 0x234   : > { %4649 = vmatmul.msk.f32.vlgmr.msrb.gmra.mxu2 %vm2902_vm1, %v3185_v37 }
 0x237   : > { %v2349_v41 = vpop.f32.mrf.mxu2  ;;  %v2497_v19 = vpop.f32.mrf.mxu3 }
 0x238   : > { %v2397_v14 = vadd.f32 %v2349_v41, %v2249_v27  ;;  %v2204_v12 = vpop.f32.mrf.mxu1 }
 0x239   : > { %v2250_v45 = vadd.f32 %v2204_v12, %v2102_v29 }
 0x23a   : > { %v2545_v54 = vadd.f32 %v2497_v19, %v2397_v14  ;;  %v2625_v14 = vand.u32 15, %v2599_v1 }
 0x23b   : > { %4633 = vmatmul.msk.f32.gmra.mxu1 %vm2902_vm1, %v2925_v31 }
 0x23c   : > { %v2565_v34 = vadd.f32 %v5916_v30, %v2545_v54  ;;  %v5926_v54 = vpop.f32.mrf.mxu0  ;;  %vm2823_vm3 = vcmp.le.s32.totalorder %v2625_v14, 8 }
 0x23e   : > { %v2581_v37 = vmax.f32 %v2565_v34, 0.0 }
 0x23f   : > { %v2352_v38 = vpop.f32.mrf.mxu2  ;;  %v2500_v0 = vpop.f32.mrf.mxu3 }
 0x240   : > { %v2886_v27 = vsel %vm2806_vm2, %v2581_v37, 0.0  ;;  %v2398_v41 = vadd.f32 %v2352_v38, %v2250_v45  ;;  %v2207_v44 = vpop.f32.mrf.mxu1 }
 0x241   : > { %2908 = vst.msk [vmem:[#allocation2 + $0x10] sm:$0xff] %vm2902_vm1, %v2886_v27  ;;  %v2251_v12 = vadd.f32 %v2207_v44, %v2103_v16  ;;  %v2104_v44 = vadd.f32 %v2062_v55, %v5745_v42 }
 0x242   : > { %v2546_v19 = vadd.f32 %v2500_v0, %v2398_v41  ;;  %v2601_v41 = vadd.s32 24, %v5911_v4 }
 0x244   : > { %v2566_v56 = vadd.f32 %v5916_v30, %v2546_v19  ;;  %v2071_v16 = vpop.f32.mrf.mxu0  ;;  %v2639_v55 = vand.u32 15, %v2601_v41 }
 0x246   : > { %v2582_v31 = vmax.f32 %v2566_v56, 0.0  ;;  %vm2825_vm5 = vcmp.le.s32.totalorder %v2639_v55, 8 }
 0x247   : > { %v2355_v29 = vpop.f32.mrf.mxu2  ;;  %v2503_v37 = vpop.f32.mrf.mxu3 }
 0x248   : > { %v2887_v34 = vsel %vm2823_vm3, %v2582_v31, 0.0  ;;  %v2399_v45 = vadd.f32 %v2355_v29, %v2251_v12  ;;  %v2942_v38 = vld [vmem:[#allocation2 + $0x9] sm:$0xff]  ;;  %v2210_v0 = vpop.f32.mrf.mxu1 }
 0x249   : > { %v2926_v27 = vld [vmem:[#allocation2 + $0x10] sm:$0xff]  ;;  %2909 = vst.msk [vmem:[#allocation2 + $0x18] sm:$0xff] %vm2902_vm1, %v2887_v34  ;;  %4617 = vmatmul.msk.f32.gmra.mxu0 %vm2902_vm1, %v2942_v38  ;;  %v2252_v14 = vadd.f32 %v2210_v0, %v2104_v44 }
 0x24a   : > { %v3186_v23 = vld [vmem:[#allocation2 + $0xa] sm:$0xff]  ;;  %4634 = vmatmul.msk.f32.gmra.mxu1 %vm2902_vm1, %v2926_v27  ;;  %v2547_v26 = vadd.f32 %v2503_v37, %v2399_v45  ;;  %4666 = vmatmul.msk.f32.vlgmr.msrb.gmra.mxu3 %vm2902_vm1, %v2926_v27  ;;  %v2105_v37 = vadd.f32 %v2065_v9, %v5756_v10  ;;  %v2602_v27 = vadd.s32 32, %v5911_v4 }
 0x24b   : > { %4650 = vmatmul.msk.f32.gmra.mxu2 %vm2902_vm1, %v3186_v23 }
 0x24c   : > { %v2567_v1 = vadd.f32 %v5916_v30, %v2547_v26  ;;  %v2646_v9 = vand.u32 15, %v2602_v27 }
 0x24e   : > { %v2583_v19 = vmax.f32 %v2567_v1, 0.0  ;;  %vm2810_vm6 = vcmp.ge.s32.totalorder %v2646_v9, 1 }
 0x24f   : > { %v2358_v56 = vpop.f32.mrf.mxu2  ;;  %v2506_v31 = vpop.f32.mrf.mxu3 }
 0x250   : > { %v2888_v49 = vsel %vm2808_vm4, %v2583_v19, 0.0  ;;  %v2400_v12 = vadd.f32 %v2358_v56, %v2252_v14  ;;  %v5937_v29 = vld [vmem:[#allocation2 + $0x11] sm:$0xff]  ;;  %v2213_v42 = vpop.f32.mrf.mxu1 }
 0x251   : > { %v2927_v34 = vld [vmem:[#allocation2 + $0x18] sm:$0xff]  ;;  %2910 = vst.msk [vmem:[#allocation2 + $0x20] sm:$0xff] %vm2902_vm1, %v2888_v49  ;;  %4618 = vmatmul.msk.f32.gmra.mxu0 %vm2902_vm1, %v5937_v29  ;;  %v2253_v0 = vadd.f32 %v2213_v42, %v2105_v37  ;;  %v2074_v49 = vpop.f32.mrf.mxu0  ;;  %v2603_v42 = vadd.s32 40, %v5911_v4 }
 0x252   : > { %v5939_v23 = vld [vmem:[#allocation2 + $0x12] sm:$0xff]  ;;  %4635 = vmatmul.msk.f32.gmra.mxu1 %vm2902_vm1, %v2927_v34  ;;  %v2548_v45 = vadd.f32 %v2506_v31, %v2400_v12  ;;  %4667 = vmatmul.msk.f32.gmra.mxu3 %vm2902_vm1, %v2927_v34  ;;  %v2106_v31 = vadd.f32 %v5926_v54, %v5767_v15 }
 0x253   : > { %4651 = vmatmul.msk.f32.gmra.mxu2 %vm2902_vm1, %v5939_v23  ;;  %v2653_v54 = vand.u32 15, %v2603_v42 }
 0x254   : > { %v2568_v38 = vadd.f32 %v5916_v30, %v2548_v45 }
 0x255   : > { %vm2827_vm7 = vcmp.le.s32.totalorder %v2653_v54, 8  ;;  %v2108_v54 = vadd.f32 %v2074_v49, %v5787_v52 }
 0x256   : > { %v2584_v13 = vmax.f32 %v2568_v38, 0.0 }
 0x257   : > { %v2361_v26 = vpop.f32.mrf.mxu2  ;;  %v2509_v41 = vpop.f32.mrf.mxu3 }
 0x258   : > { %v2889_v44 = vsel %vm2825_vm5, %v2584_v13, 0.0  ;;  %v2401_v1 = vadd.f32 %v2361_v26, %v2253_v0  ;;  %v5951_v14 = vld [vmem:[#allocation2 + $0x19] sm:$0xff]  ;;  %v2216_v10 = vpop.f32.mrf.mxu1 }
 0x259   : > { %v5953_v19 = vld [vmem:[#allocation2 + $0x20] sm:$0xff]  ;;  %2911 = vst.msk [vmem:[#allocation2 + $0x28] sm:$0xff] %vm2902_vm1, %v2889_v44  ;;  %4619 = vmatmul.msk.f32.gmra.mxu0 %vm2902_vm1, %v5951_v14  ;;  %v2254_v55 = vadd.f32 %v2216_v10, %v2106_v31  ;;  %v2107_v10 = vadd.f32 %v2071_v16, %v5776_v36 }
 0x25a   : > { %v5955_v56 = vld [vmem:[#allocation2 + $0x1a] sm:$0xff]  ;;  %4636 = vmatmul.msk.f32.gmra.mxu1 %vm2902_vm1, %v5953_v19  ;;  %v2549_v12 = vadd.f32 %v2509_v41, %v2401_v1  ;;  %4668 = vmatmul.msk.f32.gmra.mxu3 %vm2902_vm1, %v5953_v19  ;;  %v2077_v41 = vpop.f32.mrf.mxu0 }
 0x25b   : > { %4652 = vmatmul.msk.f32.gmra.mxu2 %vm2902_vm1, %v5955_v56 }
 0x25c   : > { %v2569_v34 = vadd.f32 %v5916_v30, %v2549_v12  ;;  %v2604_v12 = vadd.s32 48, %v5911_v4 }
 0x25e   : > { %v2585_v45 = vmax.f32 %v2569_v34, 0.0  ;;  %v2660_v16 = vand.u32 15, %v2604_v12 }
 0x25f   : > { %v2364_v37 = vpop.f32.mrf.mxu2  ;;  %v2512_v0 = vpop.f32.mrf.mxu3 }
 0x260   : > { %v2890_v38 = vsel %vm2810_vm6, %v2585_v45, 0.0  ;;  %v2402_v27 = vadd.f32 %v2364_v37, %v2254_v55  ;;  %v5970_v13 = vld [vmem:[#allocation2 + $0x21] sm:$0xff]  ;;  %v2219_v15 = vpop.f32.mrf.mxu1  ;;  %vm2812_vm8 = vcmp.ge.s32.totalorder %v2660_v16, 1 }
 0x261   : > { %v5972_v26 = vld [vmem:[#allocation2 + $0x28] sm:$0xff]  ;;  %2912 = vst.msk [vmem:[#allocation2 + $0x30] sm:$0xff] %vm2902_vm1, %v2890_v38  ;;  %4620 = vmatmul.msk.f32.gmra.mxu0 %vm2902_vm1, %v5970_v13  ;;  %v2255_v31 = vadd.f32 %v2219_v15, %v2107_v10 }
 0x262   : > { %v5974_v44 = vld [vmem:[#allocation2 + $0x22] sm:$0xff]  ;;  %4637 = vmatmul.msk.f32.gmra.mxu1 %vm2902_vm1, %v5972_v26  ;;  %v2550_v1 = vadd.f32 %v2512_v0, %v2402_v27  ;;  %4669 = vmatmul.msk.f32.gmra.mxu3 %vm2902_vm1, %v5972_v26  ;;  %v2080_v10 = vpop.f32.mrf.mxu0 }
 0x263   : > { %4653 = vmatmul.msk.f32.gmra.mxu2 %vm2902_vm1, %v5974_v44 }
 0x264   : > { %v2570_v9 = vadd.f32 %v5916_v30, %v2550_v1 }
 0x266   : > { %v2586_v34 = vmax.f32 %v2570_v9, 0.0  ;;  %v2605_v9 = vadd.s32 56, %v5911_v4 }
 0x267   : > { %v2367_v42 = vpop.f32.mrf.mxu2  ;;  %v2515_v37 = vpop.f32.mrf.mxu3 }
 0x268   : > { %v2891_v55 = vsel %vm2827_vm7, %v2586_v34, 0.0  ;;  %v2403_v45 = vadd.f32 %v2367_v42, %v2255_v31  ;;  %v5988_v38 = vld [vmem:[#allocation2 + $0x29] sm:$0xff]  ;;  %v2222_v36 = vpop.f32.mrf.mxu1  ;;  %v1518_v42 = vadd.f32 %v5740_v39, %v5614_v43  ;;  %v2667_v16 = vand.u32 15, %v2605_v9 }
 0x269   : > { %6622 = vst [vmem:[#allocation6_spill] sm:$0xff] %v5988_v38  ;;  %v5990_v27 = vld [vmem:[#allocation2 + $0x30] sm:$0xff]  ;;  %4621 = vmatmul.msk.f32.gmra.mxu0 %vm2902_vm1, %v5988_v38  ;;  %v2256_v12 = vadd.f32 %v2222_v36, %v2108_v54  ;;  %v2606_v54 = vadd.s32 64, %v5911_v4 }
 0x26a   : > { %6623 = vst [vmem:[#allocation5_spill] sm:$0xff] %v5990_v27  ;;  %v5992_v0 = vld [vmem:[#allocation2 + $0x2a] sm:$0xff]  ;;  %4638 = vmatmul.msk.f32.gmra.mxu1 %vm2902_vm1, %v5990_v27  ;;  %v2551_v15 = vadd.f32 %v2515_v37, %v2403_v45  ;;  %4670 = vmatmul.msk.f32.gmra.mxu3 %vm2902_vm1, %v5990_v27  ;;  %v1666_v43 = vadd.f32 %v5802_v17, %v1518_v42  ;;  %vm2829_vm9 = vcmp.le.s32.totalorder %v2667_v16, 8 }
 0x26b   : > { %2913 = vst.msk [vmem:[#allocation2 + $0x38] sm:$0xff] %vm2902_vm1, %v2891_v55  ;;  %4654 = vmatmul.msk.f32.gmra.mxu2 %vm2902_vm1, %v5992_v0  ;;  %v1961_v55 = vadd.f32 %v5800_v40, %v5798_v46  ;;  %v1519_v17 = vadd.f32 %v5753_v25, %v5628_v47 }
 0x26c   : > { %v2571_v1 = vadd.f32 %v5916_v30, %v2551_v15  ;;  %v1814_v40 = vadd.f32 %v5812_v8, %v1666_v43 }
 0x26d   : > { %v2109_v46 = vadd.f32 %v2077_v41, %v1961_v55  ;;  %v1667_v47 = vadd.f32 %v5816_v50, %v1519_v17  ;;  %v1520_v50 = vadd.f32 %v5764_v6, %v5639_v51 }
 0x26e   : > { %v2587_v31 = vmax.f32 %v2571_v1, 0.0 }
 0x26f   : > { %v2370_v34 = vpop.f32.mrf.mxu2  ;;  %v2518_v38 = vpop.f32.mrf.mxu3  ;;  %v1815_v16 = vadd.f32 %v5824_v60, %v1667_v47  ;;  %v1668_v51 = vadd.f32 %v5830_v11, %v1520_v50  ;;  %v1521_v11 = vadd.f32 %v5779_v22, %v5650_v2 }
 0x270   : > { %v2892_v45 = vsel %vm2812_vm8, %v2587_v31, 0.0  ;;  %v2404_v37 = vadd.f32 %v2370_v34, %v2256_v12  ;;  %v2225_v36 = vpop.f32.mrf.mxu1  ;;  %v2083_v12 = vpop.f32.mrf.mxu0 }
 0x271   : > { %2914 = vst.msk [vmem:[#allocation2 + $0x40] sm:$0xff] %vm2902_vm1, %v2892_v45  ;;  %v2257_v1 = vadd.f32 %v2225_v36, %v2109_v46  ;;  %v2674_v36 = vand.u32 15, %v2606_v54  ;;  %v1963_v54 = vadd.f32 %v5826_v3, %v1815_v16  ;;  %v1669_v2 = vadd.f32 %v5842_v63, %v1521_v11 }
 0x272   : > { %v6010_v27 = vld [vmem:[#allocation2 + $0x31] sm:$0xff]  ;;  %v2552_v39 = vadd.f32 %v2518_v38, %v2404_v37  ;;  %v1962_v38 = vadd.f32 %v5814_v58, %v1814_v40  ;;  %v1522_v63 = vadd.f32 %v5795_v57, %v5667_v18 }
 0x273   : > { %v6012_v52 = vld [vmem:[#allocation2 + $0x38] sm:$0xff]  ;;  %4622 = vmatmul.msk.f32.gmra.mxu0 %vm2902_vm1, %v6010_v27  ;;  %vm2814_vm10 = vcmp.ge.s32.totalorder %v2674_v36, 1  ;;  %v2111_v3 = vadd.f32 %v2083_v12, %v1963_v54  ;;  %v2608_v36 = vadd.s32 80, %v5911_v4 }
 0x274   : > { %v6014_v49 = vld [vmem:[#allocation2 + $0x32] sm:$0xff]  ;;  %4639 = vmatmul.msk.f32.gmra.mxu1 %vm2902_vm1, %v6012_v52  ;;  %4671 = vmatmul.msk.f32.gmra.mxu3 %vm2902_vm1, %v6012_v52  ;;  %v2572_v15 = vadd.f32 %v5916_v30, %v2552_v39  ;;  %v2110_v58 = vadd.f32 %v2080_v10, %v1962_v38  ;;  %v2607_v39 = vadd.s32 72, %v5911_v4  ;;  %v1670_v18 = vadd.f32 %v5865_v5, %v1522_v63 }
 0x275   : > { %4655 = vmatmul.msk.f32.gmra.mxu2 %vm2902_vm1, %v6014_v49  ;;  %v2688_v50 = vand.u32 15, %v2608_v36  ;;  %v1523_v5 = vadd.f32 %v5810_v24, %v5690_v59  ;;  %v4716_v59 = vld [vmem:[%s6533_s3 + $0x30] sm:$0xff]  ;;  %v4699_v24 = vld [vmem:[%s6533_s3 + $0x28] sm:$0xff] }
 0x276   : > { %v2588_v9 = vmax.f32 %v2572_v15, 0.0  ;;  %3854 = vmatpush.msra.mxu2 %v4716_v59  ;;  %3707 = vmatpush.msra.mxu1 %v4699_v24  ;;  %v6626_v59 = vld [vmem:[#allocation13_spill] sm:$0xff] }
 0x277   : > { %v2373_v31 = vpop.f32.mrf.mxu2  ;;  %v2521_v45 = vpop.f32.mrf.mxu3  ;;  %vm2816_vm12 = vcmp.ge.s32.totalorder %v2688_v50, 1 }
 0x278   : > { %v2893_v34 = vsel %vm2829_vm9, %v2588_v9, 0.0  ;;  %v2405_v42 = vadd.f32 %v2373_v31, %v2257_v1  ;;  %v6032_v41 = vld [vmem:[#allocation2 + $0x39] sm:$0xff]  ;;  %v2228_v37 = vpop.f32.mrf.mxu1  ;;  %v2086_v38 = vpop.f32.mrf.mxu0 }
 0x279   : > { %v6034_v8 = vld [vmem:[#allocation2 + $0x40] sm:$0xff]  ;;  %2915 = vst.msk [vmem:[#allocation2 + $0x48] sm:$0xff] %vm2902_vm1, %v2893_v34  ;;  %v2258_v46 = vadd.f32 %v2228_v37, %v2110_v58 }
 0x27a   : > { %v6036_v55 = vld [vmem:[#allocation2 + $0x3a] sm:$0xff]  ;;  %v2553_v25 = vadd.f32 %v2521_v45, %v2405_v42  ;;  %v2681_v42 = vand.u32 15, %v2607_v39  ;;  %v1816_v45 = vadd.f32 %v5838_v61, %v1668_v51 }
 0x27b   : > { %4623 = vmatmul.msk.f32.gmra.mxu0 %vm2902_vm1, %v6032_v41 }
 0x27c   : > { %4640 = vmatmul.msk.f32.gmra.mxu1 %vm2902_vm1, %v6034_v8  ;;  %4672 = vmatmul.msk.f32.gmra.mxu3 %vm2902_vm1, %v6034_v8  ;;  %v2573_v43 = vadd.f32 %v5916_v30, %v2553_v25  ;;  %vm2831_vm11 = vcmp.le.s32.totalorder %v2681_v42, 8  ;;  %v1964_v16 = vadd.f32 %v5840_v62, %v1816_v45 }
 0x27d   : > { %4656 = vmatmul.msk.f32.gmra.mxu2 %vm2902_vm1, %v6036_v55 }
 0x27e   : > { %v2589_v40 = vmax.f32 %v2573_v43, 0.0  ;;  %v2112_v54 = vadd.f32 %v2086_v38, %v1964_v16 }
 0x27f   : > { %v2376_v15 = vpop.f32.mrf.mxu2  ;;  %v2524_v31 = vpop.f32.mrf.mxu3 }
 0x280   : > { %v2894_v1 = vsel %vm2814_vm10, %v2589_v40, 0.0  ;;  %v2406_v9 = vadd.f32 %v2376_v15, %v2258_v46  ;;  %v6054_v17 = vld [vmem:[#allocation2 + $0x41] sm:$0xff]  ;;  %v2231_v34 = vpop.f32.mrf.mxu1  ;;  %v2089_v62 = vpop.f32.mrf.mxu0 }
 0x281   : > { %v6056_v10 = vld [vmem:[#allocation2 + $0x48] sm:$0xff]  ;;  %2916 = vst.msk [vmem:[#allocation2 + $0x50] sm:$0xff] %vm2902_vm1, %v2894_v1  ;;  %v2259_v47 = vadd.f32 %v2231_v34, %v2111_v3  ;;  %v1817_v1 = vadd.f32 %v5855_v20, %v1669_v2 }
 0x282   : > { %v6058_v60 = vld [vmem:[#allocation2 + $0x42] sm:$0xff]  ;;  %v2554_v6 = vadd.f32 %v2524_v31, %v2406_v9  ;;  %v2609_v31 = vadd.s32 88, %v5911_v4 }
 0x283   : > { %4624 = vmatmul.msk.f32.gmra.mxu0 %vm2902_vm1, %v6054_v17 }
 0x284   : > { %4641 = vmatmul.msk.f32.gmra.mxu1 %vm2902_vm1, %v6056_v10  ;;  %4673 = vmatmul.msk.f32.gmra.mxu3 %vm2902_vm1, %v6056_v10  ;;  %v2574_v37 = vadd.f32 %v5916_v30, %v2554_v6  ;;  %v1965_v6 = vadd.f32 %v5860_v28, %v1817_v1 }
 0x285   : > { %4657 = vmatmul.msk.f32.gmra.mxu2 %vm2902_vm1, %v6058_v60 }
 0x286   : > { %v2590_v25 = vmax.f32 %v2574_v37, 0.0  ;;  %v2113_v28 = vadd.f32 %v2089_v62, %v1965_v6 }
 0x287   : > { %v2379_v58 = vpop.f32.mrf.mxu2  ;;  %v2527_v46 = vpop.f32.mrf.mxu3 }
 0x288   : > { %v2895_v43 = vsel %vm2831_vm11, %v2590_v25, 0.0  ;;  %v2407_v39 = vadd.f32 %v2379_v58, %v2259_v47  ;;  %v6076_v40 = vld [vmem:[#allocation2 + $0x49] sm:$0xff]  ;;  %v2234_v15 = vpop.f32.mrf.mxu1  ;;  %v2695_v25 = vand.u32 15, %v2609_v31  ;;  %v1818_v58 = vadd.f32 %v5873_v32, %v1670_v18  ;;  %v2092_v16 = vpop.f32.mrf.mxu0 }
 0x289   : > { %v6078_v12 = vld [vmem:[#allocation2 + $0x50] sm:$0xff]  ;;  %2917 = vst.msk [vmem:[#allocation2 + $0x58] sm:$0xff] %vm2902_vm1, %v2895_v43  ;;  %v2260_v34 = vadd.f32 %v2234_v15, %v2112_v54  ;;  %v2610_v43 = vadd.s32 96, %v5911_v4 }
 0x28a   : > { %v6080_v61 = vld [vmem:[#allocation2 + $0x4a] sm:$0xff]  ;;  %v2555_v22 = vadd.f32 %v2527_v46, %v2407_v39  ;;  %vm2833_vm13 = vcmp.le.s32.totalorder %v2695_v25, 8  ;;  %v1966_v50 = vadd.f32 %v5875_v21, %v1818_v58  ;;  %v1671_v21 = vadd.f32 %v5877_v48, %v1523_v5 }
 0x28b   : > { %4625 = vmatmul.msk.f32.gmra.mxu0 %vm2902_vm1, %v6076_v40  ;;  %v2702_v31 = vand.u32 15, %v2610_v43  ;;  %v2611_v48 = vadd.s32 104, %v5911_v4  ;;  %v1524_v25 = vadd.f32 %v5828_v7, %v5706_v33  ;;  %v6624_v33 = vld [vmem:[#allocation11_spill] sm:$0xff]  ;;  %v6625_v5 = vld [vmem:[#allocation12_spill] sm:$0xff] }
 0x28c   : > { %4642 = vmatmul.msk.f32.gmra.mxu1 %vm2902_vm1, %v6078_v12  ;;  %4674 = vmatmul.msk.f32.gmra.mxu3 %vm2902_vm1, %v6078_v12  ;;  %v2575_v9 = vadd.f32 %v5916_v30, %v2555_v22  ;;  %v1819_v63 = vadd.f32 %v5889_v35, %v1671_v21 }
 0x28d   : > { %4658 = vmatmul.msk.f32.gmra.mxu2 %vm2902_vm1, %v6080_v61  ;;  %vm2818_vm14 = vcmp.ge.s32.totalorder %v2702_v31, 1  ;;  %v1672_v7 = vadd.f32 %v6624_v33, %v1524_v25 }
 0x28e   : > { %v2591_v42 = vmax.f32 %v2575_v9, 0.0  ;;  %v1967_v18 = vadd.f32 %v5891_v53, %v1819_v63 }
 0x28f   : > { %v2382_v51 = vpop.f32.mrf.mxu2  ;;  %v2530_v37 = vpop.f32.mrf.mxu3 }
 0x290   : > { %v2896_v3 = vsel %vm2816_vm12, %v2591_v42, 0.0  ;;  %v2408_v45 = vadd.f32 %v2382_v51, %v2260_v34  ;;  %v6098_v36 = vld [vmem:[#allocation2 + $0x51] sm:$0xff]  ;;  %v2237_v47 = vpop.f32.mrf.mxu1  ;;  %v2114_v51 = vadd.f32 %v2092_v16, %v1966_v50  ;;  %v1820_v50 = vadd.f32 %v6625_v5, %v1672_v7 }
 0x291   : > { %v6100_v38 = vld [vmem:[#allocation2 + $0x58] sm:$0xff]  ;;  %2918 = vst.msk [vmem:[#allocation2 + $0x60] sm:$0xff] %vm2902_vm1, %v2896_v3  ;;  %v2261_v39 = vadd.f32 %v2237_v47, %v2113_v28 }
 0x292   : > { %v6102_v20 = vld [vmem:[#allocation2 + $0x52] sm:$0xff]  ;;  %v2556_v57 = vadd.f32 %v2530_v37, %v2408_v45  ;;  %v2095_v37 = vpop.f32.mrf.mxu0  ;;  %v1968_v24 = vadd.f32 %v6626_v59, %v1820_v50 }
 0x293   : > { %4626 = vmatmul.msk.f32.gmra.mxu0 %vm2902_vm1, %v6098_v36  ;;  %v4733_v42 = vld [vmem:[%s6533_s3 + $0x38] sm:$0xff] }
 0x294   : > { %4643 = vmatmul.msk.f32.gmra.mxu1 %vm2902_vm1, %v6100_v38  ;;  %4675 = vmatmul.msk.f32.gmra.mxu3 %vm2902_vm1, %v6100_v38  ;;  %v2576_v11 = vadd.f32 %v5916_v30, %v2556_v57 }
 0x295   : > { %4659 = vmatmul.msk.f32.gmra.mxu2 %vm2902_vm1, %v6102_v20  ;;  %4001 = vmatpush.msra.mxu3 %v4733_v42 }
 0x296   : > { %v2592_v46 = vmax.f32 %v2576_v11, 0.0 }
 0x297   : > { %v2385_v15 = vpop.f32.mrf.mxu2  ;;  %v2533_v54 = vpop.f32.mrf.mxu3 }
 0x298   : > { %v2897_v2 = vsel %vm2833_vm13, %v2592_v46, 0.0  ;;  %v2409_v22 = vadd.f32 %v2385_v15, %v2261_v39  ;;  %v6120_v62 = vld [vmem:[#allocation2 + $0x59] sm:$0xff]  ;;  %v2240_v9 = vpop.f32.mrf.mxu1  ;;  %v2709_v39 = vand.u32 15, %v2611_v48  ;;  %v2115_v15 = vadd.f32 %v2095_v37, %v1967_v18 }
 0x299   : > { %v6122_v32 = vld [vmem:[#allocation2 + $0x60] sm:$0xff]  ;;  %2919 = vst.msk [vmem:[#allocation2 + $0x68] sm:$0xff] %vm2902_vm1, %v2897_v2  ;;  %v2262_v3 = vadd.f32 %v2240_v9, %v2114_v51  ;;  %v2613_v18 = vadd.s32 120, %v5911_v4 }
 0x29a   : > { %v6124_v1 = vld [vmem:[#allocation2 + $0x5a] sm:$0xff]  ;;  %v2557_v34 = vadd.f32 %v2533_v54, %v2409_v22  ;;  %vm2835_vm15 = vcmp.le.s32.totalorder %v2709_v39, 8  ;;  %v2612_v22 = vadd.s32 112, %v5911_v4  ;;  %v2098_v48 = vpop.f32.mrf.mxu0 }
 0x29b   : > { %4627 = vmatmul.msk.f32.gmra.mxu0 %vm2902_vm1, %v6120_v62  ;;  %v4750_v46 = vld [vmem:[%s6533_s3 + $0x40] sm:$0xff] }
 0x29c   : > { %4644 = vmatmul.msk.f32.gmra.mxu1 %vm2902_vm1, %v6122_v32  ;;  %4676 = vmatmul.msk.f32.gmra.mxu3 %vm2902_vm1, %v6122_v32  ;;  %v2577_v6 = vadd.f32 %v5916_v30, %v2557_v34 }
 0x29d   : > { %4660 = vmatmul.msk.f32.gmra.mxu2 %vm2902_vm1, %v6124_v1  ;;  %4148 = vmatpush.msra.mxu0 %v4750_v46 }
 0x29e   : > { %v2593_v45 = vmax.f32 %v2577_v6, 0.0 }
 0x29f   : > { %v2388_v47 = vpop.f32.mrf.mxu2  ;;  %v2536_v58 = vpop.f32.mrf.mxu3 }
 0x2a0   : > { %v2898_v57 = vsel %vm2818_vm14, %v2593_v45, 0.0  ;;  %v2410_v28 = vadd.f32 %v2388_v47, %v2262_v3  ;;  %v6151_v11 = vld [vmem:[#allocation2 + $0x61] sm:$0xff]  ;;  %v2243_v43 = vpop.f32.mrf.mxu1  ;;  %v2716_v3 = vand.u32 15, %v2612_v22  ;;  %v2116_v47 = vadd.f32 %v2098_v48, %v1968_v24 }
 0x2a1   : > { %v6153_v35 = vld [vmem:[#allocation2 + $0x68] sm:$0xff]  ;;  %2920 = vst.msk [vmem:[#allocation2 + $0x70] sm:$0xff] %vm2902_vm1, %v2898_v57  ;;  %v2263_v54 = vadd.f32 %v2243_v43, %v2115_v15  ;;  %v2723_v15 = vand.u32 15, %v2613_v18 }
 0x2a2   : > { %v6155_v16 = vld [vmem:[#allocation2 + $0x62] sm:$0xff]  ;;  %v2558_v53 = vadd.f32 %v2536_v58, %v2410_v28  ;;  %vm2820_vm0 = vcmp.ge.s32.totalorder %v2716_v3, 1 }
 0x2a3   : > { %4628 = vmatmul.msk.f32.gmra.mxu0 %vm2902_vm1, %v6151_v11  ;;  %vm2837_vm2 = vcmp.le.s32.totalorder %v2723_v15, 8 }
 0x2a4   : > { %4645 = vmatmul.msk.f32.gmra.mxu1 %vm2902_vm1, %v6153_v35  ;;  %4677 = vmatmul.msk.f32.gmra.mxu3 %vm2902_vm1, %v6153_v35  ;;  %v2578_v2 = vadd.f32 %v5916_v30, %v2558_v53 }
 0x2a5   : > { %4661 = vmatmul.msk.f32.gmra.mxu2 %vm2902_vm1, %v6155_v16 }
 0x2a6   : > { %v2594_v9 = vmax.f32 %v2578_v2, 0.0 }
 0x2a7   : > { %v2391_v31 = vpop.f32.mrf.mxu2  ;;  %v2539_v42 = vpop.f32.mrf.mxu3 }
 0x2a8   : > { %v2899_v21 = vsel %vm2835_vm15, %v2594_v9, 0.0  ;;  %v2411_v34 = vadd.f32 %v2391_v31, %v2263_v54  ;;  %v6174_v51 = vld [vmem:[#allocation2 + $0x69] sm:$0xff]  ;;  %v2246_v45 = vpop.f32.mrf.mxu1 }
 0x2a9   : > { %v6176_v63 = vld [vmem:[#allocation2 + $0x70] sm:$0xff]  ;;  %2921 = vst.msk [vmem:[#allocation2 + $0x78] sm:$0xff] %vm2902_vm1, %v2899_v21  ;;  %v2264_v57 = vadd.f32 %v2246_v45, %v2116_v47 }
 0x2aa   : > { %v6178_v6 = vld [vmem:[#allocation2 + $0x6a] sm:$0xff]  ;;  %v2559_v37 = vadd.f32 %v2539_v42, %v2411_v34 }
 0x2ab   : > { %4629 = vmatmul.msk.f32.gmra.mxu0 %vm2902_vm1, %v6174_v51 }
 0x2ac   : > { %4646 = vmatmul.msk.f32.gmra.mxu1 %vm2902_vm1, %v6176_v63  ;;  %4678 = vmatmul.msk.f32.gmra.mxu3 %vm2902_vm1, %v6176_v63  ;;  %v2579_v25 = vadd.f32 %v5916_v30, %v2559_v37 }
 0x2ad   : > { %4662 = vmatmul.msk.f32.gmra.mxu2 %vm2902_vm1, %v6178_v6 }
 0x2ae   : > { %v2595_v28 = vmax.f32 %v2579_v25, 0.0 }
 0x2af   : > { %v2394_v58 = vpop.f32.mrf.mxu2  ;;  %v2542_v33 = vpop.f32.mrf.mxu3 }
 0x2b0   : > { %v2900_v43 = vsel %vm2820_vm0, %v2595_v28, 0.0  ;;  %v2412_v39 = vadd.f32 %v2394_v58, %v2264_v57  ;;  %v6191_v7 = vld [vmem:[#allocation2 + $0x71] sm:$0xff]  ;;  %v6206_v5 = vpop.f32.mrf.mxu1 }
 0x2b1   : > { %v6193_v53 = vld [vmem:[#allocation2 + $0x78] sm:$0xff]  ;;  %2922 = vst.msk [vmem:[#allocation2 + $0x80] sm:$0xff] %vm2902_vm1, %v2900_v43 }
 0x2b2   : > { %v6195_v46 = vld [vmem:[#allocation2 + $0x72] sm:$0xff]  ;;  %v2560_v4 = vadd.f32 %v2542_v33, %v2412_v39 }
 0x2b3   : > { %4630 = vmatmul.msk.f32.gmra.mxu0 %vm2902_vm1, %v6191_v7 }
 0x2b4   : > { %4647 = vmatmul.msk.f32.gmra.mxu1 %vm2902_vm1, %v6193_v53  ;;  %4679 = vmatmul.msk.f32.gmra.mxu3 %vm2902_vm1, %v6193_v53  ;;  %v2580_v50 = vadd.f32 %v5916_v30, %v2560_v4  ;;  %v6224_v30 = vpop.f32.mrf.mxu0 }
 0x2b5   : > { %4663 = vmatmul.msk.f32.gmra.mxu2 %vm2902_vm1, %v6195_v46 }
 0x2b6   : > { %v2596_v2 = vmax.f32 %v2580_v50, 0.0 }
 0x2b8   : > { %v2901_v22 = vsel %vm2837_vm2, %v2596_v2, 0.0  ;;  %v6209_v54 = vld [vmem:[#allocation2 + $0x79] sm:$0xff]  ;;  %v3140_v59 = vpop.f32.mrf.mxu1 }
 0x2b9   : > { %v6211_v9 = vld [vmem:[#allocation2 + $0x7a] sm:$0xff]  ;;  %2923 = vst.msk [vmem:[#allocation2 + $0x88] sm:$0xff] %vm2902_vm1, %v2901_v22 }
 0x2ba   : > { %v6213_v31 = vld [vmem:[#allocation2 + $0x80] sm:$0xff] }
 0x2bb   : > { %4631 = vmatmul.msk.f32.gmra.mxu0 %vm2902_vm1, %v6209_v54 }
 0x2bc   : > { %4700 = vmatmul.msk.f32.vlgmr.msra.gmra.mxu1 %vm2902_vm1, %v5939_v23  ;;  %4680 = vmatmul.msk.f32.gmra.mxu3 %vm2902_vm1, %v6213_v31  ;;  %v6236_v23 = vpop.f32.mrf.mxu2 }
 0x2bd   : > { %4664 = vmatmul.msk.f32.gmra.mxu2 %vm2902_vm1, %v6211_v9 }
 0x2c0   : > { %v6226_v24 = vld [vmem:[#allocation2 + $0x88] sm:$0xff] }
 0x2c3   : > { %4683 = vmatmul.msk.f32.vlgmr.msrb.gmra.mxu0 %vm2902_vm1, %v5937_v29 }
 0x2c4   : > { %4701 = vmatmul.msk.f32.gmra.mxu1 %vm2902_vm1, %v5955_v56  ;;  %4681 = vmatmul.msk.f32.gmra.mxu3 %vm2902_vm1, %v6226_v24 }
 0x2c5   : > { %4717 = vmatmul.msk.f32.vlgmr.msra.gmra.mxu2 %vm2902_vm1, %v5953_v19 }
 0x2c6   : > { %v3027_v21 = vpop.f32.mrf.mxu0 }
 0x2c7   : > { %v3143_v34 = vpop.f32.mrf.mxu1  ;;  %v3141_v29 = vadd.f32 %v3140_v59, %v3027_v21 }
 0x2cb   : > { %4684 = vmatmul.msk.f32.gmra.mxu0 %vm2902_vm1, %v5951_v14  ;;  %v6627_v14 = vld [vmem:[#allocation5_spill] sm:$0xff] }
 0x2cc   : > { %4702 = vmatmul.msk.f32.gmra.mxu1 %vm2902_vm1, %v5974_v44  ;;  %4734 = vmatmul.msk.f32.vlgmr.msra.gmra.mxu3 %vm2902_vm1, %v5970_v13 }
 0x2cd   : > { %4718 = vmatmul.msk.f32.gmra.mxu2 %vm2902_vm1, %v5972_v26  ;;  %v6246_v42 = vpop.f32.mrf.mxu3  ;;  %v6628_v26 = vld [vmem:[#allocation6_spill] sm:$0xff] }
 0x2ce   : > { %v3271_v56 = vpop.f32.mrf.mxu2  ;;  %v3030_v48 = vpop.f32.mrf.mxu0 }
 0x2cf   : > { %v3317_v19 = vadd.f32 %v3271_v56, %v3141_v29  ;;  %v3146_v3 = vpop.f32.mrf.mxu1  ;;  %v3144_v45 = vadd.f32 %v3143_v34, %v3030_v48 }
 0x2d3   : > { %4685 = vmatmul.msk.f32.gmra.mxu0 %vm2902_vm1, %v5970_v13 }
 0x2d4   : > { %4703 = vmatmul.msk.f32.gmra.mxu1 %vm2902_vm1, %v5992_v0  ;;  %4735 = vmatmul.msk.f32.gmra.mxu3 %vm2902_vm1, %v6628_v26 }
 0x2d5   : > { %4719 = vmatmul.msk.f32.gmra.mxu2 %vm2902_vm1, %v6627_v14  ;;  %v3418_v47 = vpop.f32.mrf.mxu3 }
 0x2d6   : > { %v3274_v37 = vpop.f32.mrf.mxu2  ;;  %v6256_v18 = vadd.f32 %v3418_v47, %v3317_v19  ;;  %v3033_v57 = vpop.f32.mrf.mxu0 }
 0x2d7   : > { %v3318_v25 = vadd.f32 %v3274_v37, %v3144_v45  ;;  %v3149_v28 = vpop.f32.mrf.mxu1  ;;  %v3147_v13 = vadd.f32 %v3146_v3, %v3033_v57 }
 0x2db   : > { %4686 = vmatmul.msk.f32.gmra.mxu0 %vm2902_vm1, %v6628_v26 }
 0x2dc   : > { %4704 = vmatmul.msk.f32.gmra.mxu1 %vm2902_vm1, %v6014_v49  ;;  %4736 = vmatmul.msk.f32.gmra.mxu3 %vm2902_vm1, %v6010_v27 }
 0x2dd   : > { %4720 = vmatmul.msk.f32.gmra.mxu2 %vm2902_vm1, %v6012_v52  ;;  %v3421_v43 = vpop.f32.mrf.mxu3 }
 0x2de   : > { %v3277_v58 = vpop.f32.mrf.mxu2  ;;  %v6266_v33 = vadd.f32 %v3421_v43, %v3318_v25  ;;  %v3036_v15 = vpop.f32.mrf.mxu0 }
 0x2df   : > { %v3319_v39 = vadd.f32 %v3277_v58, %v3147_v13  ;;  %v3152_v4 = vpop.f32.mrf.mxu1  ;;  %v3150_v52 = vadd.f32 %v3149_v28, %v3036_v15 }
 0x2e3   : > { %4687 = vmatmul.msk.f32.gmra.mxu0 %vm2902_vm1, %v6010_v27 }
 0x2e4   : > { %4705 = vmatmul.msk.f32.gmra.mxu1 %vm2902_vm1, %v6036_v55  ;;  %4737 = vmatmul.msk.f32.gmra.mxu3 %vm2902_vm1, %v6032_v41 }
 0x2e5   : > { %4721 = vmatmul.msk.f32.gmra.mxu2 %vm2902_vm1, %v6034_v8  ;;  %v3424_v2 = vpop.f32.mrf.mxu3 }
 0x2e6   : > { %v3280_v50 = vpop.f32.mrf.mxu2  ;;  %v6276_v59 = vadd.f32 %v3424_v2, %v3319_v39  ;;  %v3039_v21 = vpop.f32.mrf.mxu0 }
 0x2e7   : > { %v3320_v22 = vadd.f32 %v3280_v50, %v3150_v52  ;;  %v3155_v34 = vpop.f32.mrf.mxu1  ;;  %v3153_v27 = vadd.f32 %v3152_v4, %v3039_v21 }
 0x2eb   : > { %4688 = vmatmul.msk.f32.gmra.mxu0 %vm2902_vm1, %v6032_v41 }
 0x2ec   : > { %4706 = vmatmul.msk.f32.gmra.mxu1 %vm2902_vm1, %v6058_v60  ;;  %4738 = vmatmul.msk.f32.gmra.mxu3 %vm2902_vm1, %v6054_v17 }
 0x2ed   : > { %4722 = vmatmul.msk.f32.gmra.mxu2 %vm2902_vm1, %v6056_v10  ;;  %v3427_v29 = vpop.f32.mrf.mxu3 }
 0x2ee   : > { %v3283_v8 = vpop.f32.mrf.mxu2  ;;  %v6286_v19 = vadd.f32 %v3427_v29, %v3320_v22 }
 0x2ef   : > { %v3321_v56 = vadd.f32 %v3283_v8, %v3153_v27 }
 0x2f0   : > { %v3042_v48 = vpop.f32.mrf.mxu0 }
 0x2f1   : > { %v3158_v3 = vpop.f32.mrf.mxu1  ;;  %v3156_v41 = vadd.f32 %v3155_v34, %v3042_v48 }
 0x2f3   : > { %4689 = vmatmul.msk.f32.gmra.mxu0 %vm2902_vm1, %v6054_v17 }
 0x2f4   : > { %4707 = vmatmul.msk.f32.gmra.mxu1 %vm2902_vm1, %v6080_v61  ;;  %4739 = vmatmul.msk.f32.gmra.mxu3 %vm2902_vm1, %v6076_v40 }
 0x2f5   : > { %4723 = vmatmul.msk.f32.gmra.mxu2 %vm2902_vm1, %v6078_v12 }
 0x2f7   : > { %v3430_v14 = vpop.f32.mrf.mxu3 }
 0x2f8   : > { %v3286_v10 = vpop.f32.mrf.mxu2  ;;  %v6296_v45 = vadd.f32 %v3430_v14, %v3321_v56  ;;  %v3045_v37 = vpop.f32.mrf.mxu0 }
 0x2f9   : > { %v3322_v26 = vadd.f32 %v3286_v10, %v3156_v41  ;;  %v3161_v47 = vpop.f32.mrf.mxu1  ;;  %v3159_v17 = vadd.f32 %v3158_v3, %v3045_v37 }
 0x2fb   : > { %4690 = vmatmul.msk.f32.gmra.mxu0 %vm2902_vm1, %v6076_v40 }
 0x2fc   : > { %4708 = vmatmul.msk.f32.gmra.mxu1 %vm2902_vm1, %v6102_v20  ;;  %4740 = vmatmul.msk.f32.gmra.mxu3 %vm2902_vm1, %v6098_v36 }
 0x2fd   : > { %4724 = vmatmul.msk.f32.gmra.mxu2 %vm2902_vm1, %v6100_v38 }
 0x2ff   : > { %v3433_v25 = vpop.f32.mrf.mxu3 }
 0x300   : > { %v3289_v12 = vpop.f32.mrf.mxu2  ;;  %v6306_v28 = vadd.f32 %v3433_v25, %v3322_v26  ;;  %v3048_v13 = vpop.f32.mrf.mxu0  ;;  %v6358_v25 = vld [vmem:[#allocation2 + $0x82] sm:$0xff] }
 0x301   : > { %v3323_v57 = vadd.f32 %v3289_v12, %v3159_v17  ;;  %v3164_v58 = vpop.f32.mrf.mxu1  ;;  %v3162_v40 = vadd.f32 %v3161_v47, %v3048_v13 }
 0x303   : > { %4691 = vmatmul.msk.f32.gmra.mxu0 %vm2902_vm1, %v6098_v36 }
 0x304   : > { %4709 = vmatmul.msk.f32.gmra.mxu1 %vm2902_vm1, %v6124_v1  ;;  %4741 = vmatmul.msk.f32.gmra.mxu3 %vm2902_vm1, %v6120_v62 }
 0x305   : > { %4725 = vmatmul.msk.f32.gmra.mxu2 %vm2902_vm1, %v6122_v32 }
 0x307   : > { %v3436_v43 = vpop.f32.mrf.mxu3 }
 0x308   : > { %v3292_v38 = vpop.f32.mrf.mxu2  ;;  %v6316_v15 = vadd.f32 %v3436_v43, %v3323_v57  ;;  %v3051_v4 = vpop.f32.mrf.mxu0  ;;  %v3787_v43 = vld [vmem:[#allocation2 + $0x90] sm:$0xff] }
 0x309   : > { %v3324_v39 = vadd.f32 %v3292_v38, %v3162_v40  ;;  %v3167_v52 = vpop.f32.mrf.mxu1  ;;  %v3165_v36 = vadd.f32 %v3164_v58, %v3051_v4  ;;  %v3933_v4 = vld [vmem:[#allocation2 + $0x89] sm:$0xff] }
 0x30b   : > { %4692 = vmatmul.msk.f32.gmra.mxu0 %vm2902_vm1, %v6120_v62 }
 0x30c   : > { %4710 = vmatmul.msk.f32.gmra.mxu1 %vm2902_vm1, %v6155_v16  ;;  %4742 = vmatmul.msk.f32.gmra.mxu3 %vm2902_vm1, %v6151_v11 }
 0x30d   : > { %4726 = vmatmul.msk.f32.gmra.mxu2 %vm2902_vm1, %v6153_v35 }
 0x30f   : > { %v3439_v50 = vpop.f32.mrf.mxu3 }
 0x310   : > { %v3295_v32 = vpop.f32.mrf.mxu2  ;;  %v6326_v22 = vadd.f32 %v3439_v50, %v3324_v39  ;;  %v3054_v21 = vpop.f32.mrf.mxu0  ;;  %v6369_v39 = vld [vmem:[#allocation2 + $0x8a] sm:$0xff] }
 0x311   : > { %v3325_v2 = vadd.f32 %v3295_v32, %v3165_v36  ;;  %v3170_v62 = vpop.f32.mrf.mxu1  ;;  %v3168_v35 = vadd.f32 %v3167_v52, %v3054_v21  ;;  %v3788_v21 = vld [vmem:[#allocation2 + $0x98] sm:$0xff] }
 0x313   : > { %4693 = vmatmul.msk.f32.gmra.mxu0 %vm2902_vm1, %v6151_v11 }
 0x314   : > { %4711 = vmatmul.msk.f32.gmra.mxu1 %vm2902_vm1, %v6178_v6  ;;  %4743 = vmatmul.msk.f32.gmra.mxu3 %vm2902_vm1, %v6174_v51 }
 0x315   : > { %4727 = vmatmul.msk.f32.gmra.mxu2 %vm2902_vm1, %v6176_v63 }
 0x317   : > { %v3442_v27 = vpop.f32.mrf.mxu3 }
 0x318   : > { %v3298_v34 = vpop.f32.mrf.mxu2  ;;  %v6336_v29 = vadd.f32 %v3442_v27, %v3325_v2  ;;  %v3057_v56 = vpop.f32.mrf.mxu0 }
 0x319   : > { %v3326_v8 = vadd.f32 %v3298_v34, %v3168_v35  ;;  %v3171_v11 = vadd.f32 %v3170_v62, %v3057_v56  ;;  %v3173_v63 = vpop.f32.mrf.mxu1  ;;  %v3934_v62 = vld [vmem:[#allocation2 + $0x91] sm:$0xff] }
 0x31b   : > { %4694 = vmatmul.msk.f32.gmra.mxu0 %vm2902_vm1, %v6174_v51 }
 0x31c   : > { %4712 = vmatmul.msk.f32.gmra.mxu1 %vm2902_vm1, %v6195_v46  ;;  %4744 = vmatmul.msk.f32.gmra.mxu3 %vm2902_vm1, %v6191_v7 }
 0x31d   : > { %4728 = vmatmul.msk.f32.gmra.mxu2 %vm2902_vm1, %v6193_v53 }
 0x31f   : > { %v3445_v3 = vpop.f32.mrf.mxu3 }
 0x320   : > { %v3301_v48 = vpop.f32.mrf.mxu2  ;;  %v6346_v10 = vadd.f32 %v3445_v3, %v3326_v8  ;;  %v3060_v14 = vpop.f32.mrf.mxu0 }
 0x321   : > { %v3327_v41 = vadd.f32 %v3301_v48, %v3171_v11  ;;  %v3174_v51 = vadd.f32 %v3173_v63, %v3060_v14  ;;  %v3176_v12 = vpop.f32.mrf.mxu1  ;;  %v3935_v48 = vld [vmem:[#allocation2 + $0x99] sm:$0xff] }
 0x323   : > { %4695 = vmatmul.msk.f32.gmra.mxu0 %vm2902_vm1, %v6191_v7  ;;  %v3932_v7 = vld [vmem:[#allocation2 + $0x81] sm:$0xff] }
 0x324   : > { %4713 = vmatmul.msk.f32.gmra.mxu1 %vm2902_vm1, %v6211_v9  ;;  %4745 = vmatmul.msk.f32.gmra.mxu3 %vm2902_vm1, %v6209_v54 }
 0x325   : > { %4729 = vmatmul.msk.f32.gmra.mxu2 %vm2902_vm1, %v6213_v31 }
 0x327   : > { %v3448_v26 = vpop.f32.mrf.mxu3 }
 0x328   : > { %v3304_v53 = vpop.f32.mrf.mxu2  ;;  %v6356_v47 = vadd.f32 %v3448_v26, %v3327_v41  ;;  %v3063_v17 = vpop.f32.mrf.mxu0 }
 0x329   : > { %v3328_v37 = vadd.f32 %v3304_v53, %v3174_v51  ;;  %v3177_v31 = vadd.f32 %v3176_v12, %v3063_v17 }
 0x32b   : > { %4696 = vmatmul.msk.f32.gmra.mxu0 %vm2902_vm1, %v6209_v54  ;;  %v3179_v54 = vpop.f32.mrf.mxu1 }
 0x32c   : > { %4714 = vmatmul.msk.f32.gmra.mxu1 %vm2902_vm1, %v6358_v25  ;;  %4746 = vmatmul.msk.f32.gmra.mxu3 %vm2902_vm1, %v3932_v7 }
 0x32d   : > { %4730 = vmatmul.msk.f32.gmra.mxu2 %vm2902_vm1, %v6226_v24 }
 0x32f   : > { %v3451_v13 = vpop.f32.mrf.mxu3 }
 0x330   : > { %v3307_v57 = vpop.f32.mrf.mxu2  ;;  %v6367_v40 = vadd.f32 %v3451_v13, %v3328_v37  ;;  %v3066_v38 = vpop.f32.mrf.mxu0 }
 0x331   : > { %v3329_v58 = vadd.f32 %v3307_v57, %v3177_v31  ;;  %v3180_v24 = vadd.f32 %v3179_v54, %v3066_v38 }
 0x333   : > { %4697 = vmatmul.msk.f32.gmra.mxu0 %vm2902_vm1, %v3932_v7  ;;  %v3182_v35 = vpop.f32.mrf.mxu1 }
 0x334   : > { %4715 = vmatmul.msk.f32.gmra.mxu1 %vm2902_vm1, %v6369_v39  ;;  %4747 = vmatmul.msk.f32.gmra.mxu3 %vm2902_vm1, %v3933_v4 }
 0x335   : > { %4731 = vmatmul.msk.f32.gmra.mxu2 %vm2902_vm1, %v3787_v43 }
 0x337   : > { %v3454_v36 = vpop.f32.mrf.mxu3 }
 0x338   : > { %v3310_v52 = vpop.f32.mrf.mxu2  ;;  %v3476_v50 = vadd.f32 %v3454_v36, %v3329_v58  ;;  %v3069_v2 = vpop.f32.mrf.mxu0 }
 0x339   : > { %v3330_v32 = vadd.f32 %v3310_v52, %v3180_v24  ;;  %v3183_v34 = vadd.f32 %v3182_v35, %v3069_v2 }
 0x33b   : > { %4698 = vmatmul.msk.f32.gmra.mxu0 %vm2902_vm1, %v3933_v4  ;;  %v3709_v12 = vpop.f32.mrf.mxu1 }
 0x33c   : > { %4748 = vmatmul.msk.f32.gmra.mxu3 %vm2902_vm1, %v3934_v62  ;;  %v6451_v62 = vld [vmem:[%s6534_s4] ss:$0 sm:$0xff] }
 0x33d   : > { %4732 = vmatmul.msk.f32.gmra.mxu2 %vm2902_vm1, %v3788_v21 }
 0x33f   : > { %v3457_v8 = vpop.f32.mrf.mxu3 }
 0x340   : > { %v3313_v27 = vpop.f32.mrf.mxu2  ;;  %v3477_v11 = vadd.f32 %v3457_v8, %v3330_v32  ;;  %v3562_v63 = vpop.f32.mrf.mxu0 }
 0x341   : > { %v3331_v56 = vadd.f32 %v3313_v27, %v3183_v34 }
 0x343   : > { %4751 = vmatmul.msk.f32.vlgmr.msra.gmra.mxu0 %vm2902_vm1, %v5974_v44 }
 0x344   : > { %4749 = vmatmul.msk.f32.gmra.mxu3 %vm2902_vm1, %v3935_v48 }
 0x347   : > { %v3460_v3 = vpop.f32.mrf.mxu3 }
 0x348   : > { %v3478_v41 = vadd.f32 %v3460_v3, %v3331_v56  ;;  %v3565_v14 = vpop.f32.mrf.mxu0 }
 0x349   : > { %v3611_v21 = vadd.f32 %v3565_v14, %v6256_v18 }
 0x34b   : > { %4752 = vmatmul.msk.f32.gmra.mxu0 %vm2902_vm1, %v5992_v0 }
 0x350   : > { %v6384_v51 = vpop.f32.mrf.mxu0 }
 0x351   : > { %v3612_v48 = vadd.f32 %v6384_v51, %v6266_v33 }
 0x353   : > { %4753 = vmatmul.msk.f32.gmra.mxu0 %vm2902_vm1, %v6014_v49 }
 0x358   : > { %v6388_v53 = vpop.f32.mrf.mxu0 }
 0x35b   : > { %4754 = vmatmul.msk.f32.gmra.mxu0 %vm2902_vm1, %v6036_v55 }
 0x360   : > { %v6392_v26 = vpop.f32.mrf.mxu0 }
 0x363   : > { %4755 = vmatmul.msk.f32.gmra.mxu0 %vm2902_vm1, %v6058_v60 }
 0x368   : > { %v6396_v44 = vpop.f32.mrf.mxu0 }
 0x36b   : > { %4756 = vmatmul.msk.f32.gmra.mxu0 %vm2902_vm1, %v6080_v61 }
 0x370   : > { %v6400_v0 = vpop.f32.mrf.mxu0 }
 0x373   : > { %4757 = vmatmul.msk.f32.gmra.mxu0 %vm2902_vm1, %v6102_v20 }
 0x378   : > { %v6404_v49 = vpop.f32.mrf.mxu0 }
 0x37b   : > { %4758 = vmatmul.msk.f32.gmra.mxu0 %vm2902_vm1, %v6124_v1 }
 0x380   : > { %v3586_v55 = vpop.f32.mrf.mxu0 }
 0x381   : > { %v6409_v37 = vadd.f32 %v3586_v55, %v6326_v22 }
 0x383   : > { %4759 = vmatmul.msk.f32.gmra.mxu0 %vm2902_vm1, %v6155_v16  ;;  %v3856_v16 = vpop.f32.mrf.mxu2 }
 0x388   : > { %v3589_v60 = vpop.f32.mrf.mxu0 }
 0x389   : > { %v6414_v61 = vadd.f32 %v3589_v60, %v6336_v29  ;;  %v4003_v29 = vpop.f32.mrf.mxu3 }
 0x38b   : > { %4760 = vmatmul.msk.f32.gmra.mxu0 %vm2902_vm1, %v6178_v6  ;;  %v3859_v31 = vpop.f32.mrf.mxu2 }
 0x390   : > { %v3592_v20 = vpop.f32.mrf.mxu0 }
 0x391   : > { %v6419_v17 = vadd.f32 %v3592_v20, %v6346_v10  ;;  %v3712_v10 = vpop.f32.mrf.mxu1 }
 0x392   : > { %v3758_v34 = vadd.f32 %v3712_v10, %v3611_v21 }
 0x393   : > { %4761 = vmatmul.msk.f32.gmra.mxu0 %vm2902_vm1, %v6195_v46  ;;  %v4006_v46 = vpop.f32.mrf.mxu3  ;;  %v3862_v58 = vpop.f32.mrf.mxu2 }
 0x394   : > { %v3905_v18 = vadd.f32 %v3859_v31, %v3758_v34 }
 0x396   : > { %v4052_v3 = vadd.f32 %v4006_v46, %v3905_v18 }
 0x398   : > { %v3595_v1 = vpop.f32.mrf.mxu0 }
 0x399   : > { %v6424_v22 = vadd.f32 %v3595_v1, %v6356_v47  ;;  %v3715_v47 = vpop.f32.mrf.mxu1 }
 0x39a   : > { %v3759_v55 = vadd.f32 %v3715_v47, %v3612_v48  ;;  %v3614_v47 = vadd.f32 %v6392_v26, %v6286_v19 }
 0x39b   : > { %4762 = vmatmul.msk.f32.gmra.mxu0 %vm2902_vm1, %v6211_v9  ;;  %v3138_v9 = vadd.f32 %v6206_v5, %v6224_v30  ;;  %v4009_v54 = vpop.f32.mrf.mxu3  ;;  %v3865_v5 = vpop.f32.mrf.mxu2 }
 0x39c   : > { %v3906_v20 = vadd.f32 %v3862_v58, %v3759_v55 }
 0x3a0   : > { %v3598_v7 = vpop.f32.mrf.mxu0 }
 0x3a1   : > { %v6429_v6 = vadd.f32 %v3598_v7, %v6367_v40  ;;  %v4081_v40 = vld [vmem:[#allocation2 + $0x92] sm:$0xff]  ;;  %v3718_v36 = vpop.f32.mrf.mxu1  ;;  %v4053_v7 = vadd.f32 %v4009_v54, %v3906_v20 }
 0x3a3   : > { %4763 = vmatmul.msk.f32.gmra.mxu0 %vm2902_vm1, %v6358_v25  ;;  %v3316_v25 = vadd.f32 %v6236_v23, %v3138_v9  ;;  %v3868_v56 = vpop.f32.mrf.mxu2 }
 0x3a5   : > { %v3463_v4 = vadd.f32 %v6246_v42, %v3316_v25 }
 0x3a7   : > { %v3610_v24 = vadd.f32 %v3562_v63, %v3463_v4 }
 0x3a8   : > { %v3601_v57 = vpop.f32.mrf.mxu0 }
 0x3a9   : > { %v6433_v13 = vadd.f32 %v3601_v57, %v3476_v50  ;;  %v3757_v30 = vadd.f32 %v3709_v12, %v3610_v24  ;;  %v4012_v50 = vpop.f32.mrf.mxu3  ;;  %v3721_v27 = vpop.f32.mrf.mxu1 }
 0x3aa   : > { %v3761_v25 = vadd.f32 %v3721_v27, %v3614_v47 }
 0x3ab   : > { %4764 = vmatmul.msk.f32.gmra.mxu0 %vm2902_vm1, %v6369_v39  ;;  %v4082_v39 = vld [vmem:[#allocation2 + $0x9a] sm:$0xff]  ;;  %v3904_v2 = vadd.f32 %v3856_v16, %v3757_v30  ;;  %v3871_v16 = vpop.f32.mrf.mxu2 }
 0x3ac   : > { %v3908_v24 = vadd.f32 %v3868_v56, %v3761_v25 }
 0x3ad   : > { %v4051_v23 = vadd.f32 %v4003_v29, %v3904_v2  ;;  %v3613_v29 = vadd.f32 %v6388_v53, %v6276_v59 }
 0x3af   : > { %v3760_v31 = vadd.f32 %v3718_v36, %v3613_v29 }
 0x3b0   : > { %v3604_v38 = vpop.f32.mrf.mxu0 }
 0x3b1   : > { %v6439_v43 = vadd.f32 %v3604_v38, %v3477_v11  ;;  %v4015_v63 = vpop.f32.mrf.mxu3  ;;  %v3724_v1 = vpop.f32.mrf.mxu1  ;;  %v3907_v57 = vadd.f32 %v3865_v5, %v3760_v31 }
 0x3b2   : > { %v4055_v36 = vadd.f32 %v4015_v63, %v3908_v24 }
 0x3b3   : > { %4765 = vmatmul.msk.f32.gmra.mxu0 %vm2902_vm1, %v4081_v40  ;;  %v4054_v58 = vadd.f32 %v4012_v50, %v3907_v57  ;;  %v3874_v59 = vpop.f32.mrf.mxu2 }
 0x3b8   : > { %v3607_v52 = vpop.f32.mrf.mxu0 }
 0x3b9   : > { %v6444_v32 = vadd.f32 %v3607_v52, %v3478_v41  ;;  %v4018_v33 = vpop.f32.mrf.mxu3  ;;  %v3727_v38 = vpop.f32.mrf.mxu1 }
 0x3bb   : > { %4766 = vmatmul.msk.f32.gmra.mxu0 %vm2902_vm1, %v4082_v39  ;;  %v3615_v39 = vadd.f32 %v6396_v44, %v6296_v45  ;;  %v3877_v30 = vpop.f32.mrf.mxu2 }
 0x3bd   : > { %v3762_v50 = vadd.f32 %v3724_v1, %v3615_v39 }
 0x3c0   : > { %v4150_v42 = vpop.f32.mrf.mxu0 }
 0x3c1   : > { %v4198_v35 = vadd.f32 %v4150_v42, %v4051_v23  ;;  %v4021_v54 = vpop.f32.mrf.mxu3  ;;  %v3730_v26 = vpop.f32.mrf.mxu1  ;;  %v3909_v23 = vadd.f32 %v3871_v16, %v3762_v50 }
 0x3c3   : > { %v4218_v8 = vadd.f32 %v6451_v62, %v4198_v35  ;;  %v3616_v35 = vadd.f32 %v6400_v0, %v6306_v28  ;;  %v4056_v34 = vadd.f32 %v4018_v33, %v3909_v23  ;;  %v3880_v18 = vpop.f32.mrf.mxu2 }
 0x3c5   : > { %v4234_v11 = vmax.f32 %v4218_v8, 0.0  ;;  %v3763_v27 = vadd.f32 %v3727_v38, %v3616_v35 }
 0x3c7   : > { %4250 = vst.msk [vmem:[%s6458_s23] sm:$0xff] %vm2902_vm1, %v4234_v11  ;;  %v3910_v11 = vadd.f32 %v3874_v59, %v3763_v27 }
 0x3c8   : > { %v4153_v41 = vpop.f32.mrf.mxu0 }
 0x3c9   : > { %v4199_v14 = vadd.f32 %v4153_v41, %v4052_v3  ;;  %v4024_v21 = vpop.f32.mrf.mxu3  ;;  %v3733_v8 = vpop.f32.mrf.mxu1  ;;  %v3617_v3 = vadd.f32 %v6404_v49, %v6316_v15  ;;  %v4057_v41 = vadd.f32 %v4021_v54, %v3910_v11 }
 0x3ca   : > { %v3765_v15 = vadd.f32 %v3733_v8, %v6409_v37 }
 0x3cb   : > { %v4219_v60 = vadd.f32 %v6451_v62, %v4199_v14  ;;  %v3764_v14 = vadd.f32 %v3730_v26, %v3617_v3 }
 0x3cd   : > { %v4235_v12 = vmax.f32 %v4219_v60, 0.0  ;;  %v3911_v60 = vadd.f32 %v3877_v30, %v3764_v14 }
 0x3cf   : > { %4251 = vst.msk [vmem:[%s6458_s23 + $0x8] sm:$0xff] %vm2902_vm1, %v4235_v12  ;;  %v3883_v12 = vpop.f32.mrf.mxu2  ;;  %v4058_v16 = vadd.f32 %v4024_v21, %v3911_v60 }
 0x3d0   : > { %v4156_v51 = vpop.f32.mrf.mxu0 }
 0x3d1   : > { %v4200_v10 = vadd.f32 %v4156_v51, %v4053_v7  ;;  %v4027_v48 = vpop.f32.mrf.mxu3  ;;  %v3736_v20 = vpop.f32.mrf.mxu1  ;;  %v3912_v51 = vadd.f32 %v3880_v18, %v3765_v15 }
 0x3d2   : > { %v3766_v38 = vadd.f32 %v3736_v20, %v6414_v61 }
 0x3d3   : > { %v4220_v46 = vadd.f32 %v6451_v62, %v4200_v10 }
 0x3d5   : > { %v4236_v9 = vmax.f32 %v4220_v46, 0.0  ;;  %v4059_v46 = vadd.f32 %v4027_v48, %v3912_v51 }
 0x3d7   : > { %4252 = vst.msk [vmem:[%s6458_s23 + $0x10] sm:$0xff] %vm2902_vm1, %v4236_v9  ;;  %v3886_v57 = vpop.f32.mrf.mxu2 }
 0x3d8   : > { %v4159_v53 = vpop.f32.mrf.mxu0 }
 0x3d9   : > { %v4201_v40 = vadd.f32 %v4159_v53, %v4054_v58  ;;  %v4030_v29 = vpop.f32.mrf.mxu3  ;;  %v3739_v31 = vpop.f32.mrf.mxu1  ;;  %v3913_v53 = vadd.f32 %v3883_v12, %v3766_v38 }
 0x3db   : > { %v4221_v4 = vadd.f32 %v6451_v62, %v4201_v40  ;;  %v4060_v40 = vadd.f32 %v4030_v29, %v3913_v53 }
 0x3dd   : > { %v4237_v52 = vmax.f32 %v4221_v4, 0.0 }
 0x3df   : > { %4253 = vst.msk [vmem:[%s6458_s23 + $0x18] sm:$0xff] %vm2902_vm1, %v4237_v52  ;;  %v3889_v24 = vpop.f32.mrf.mxu2  ;;  %v3767_v52 = vadd.f32 %v3739_v31, %v6419_v17 }
 0x3e0   : > { %v4162_v19 = vpop.f32.mrf.mxu0 }
 0x3e1   : > { %v4202_v5 = vadd.f32 %v4162_v19, %v4055_v36  ;;  %v4033_v58 = vpop.f32.mrf.mxu3  ;;  %v3742_v25 = vpop.f32.mrf.mxu1  ;;  %v3914_v19 = vadd.f32 %v3886_v57, %v3767_v52 }
 0x3e3   : > { %v4222_v2 = vadd.f32 %v6451_v62, %v4202_v5  ;;  %v4061_v26 = vadd.f32 %v4033_v58, %v3914_v19 }
 0x3e5   : > { %v4238_v42 = vmax.f32 %v4222_v2, 0.0  ;;  %v3768_v2 = vadd.f32 %v3742_v25, %v6424_v22 }
 0x3e7   : > { %4254 = vst.msk [vmem:[%s6458_s23 + $0x20] sm:$0xff] %vm2902_vm1, %v4238_v42  ;;  %v3892_v23 = vpop.f32.mrf.mxu2  ;;  %v3915_v42 = vadd.f32 %v3889_v24, %v3768_v2 }
 0x3e8   : > { %v4165_v45 = vpop.f32.mrf.mxu0 }
 0x3e9   : > { %v4203_v44 = vadd.f32 %v4165_v45, %v4056_v34  ;;  %v4036_v36 = vpop.f32.mrf.mxu3  ;;  %v3745_v50 = vpop.f32.mrf.mxu1 }
 0x3ea   : > { %v4062_v34 = vadd.f32 %v4036_v36, %v3915_v42  ;;  %v3769_v27 = vadd.f32 %v3745_v50, %v6429_v6 }
 0x3eb   : > { %v4223_v56 = vadd.f32 %v6451_v62, %v4203_v44 }
 0x3ec   : > { %v3916_v18 = vadd.f32 %v3892_v23, %v3769_v27 }
 0x3ed   : > { %v4239_v63 = vmax.f32 %v4223_v56, 0.0 }
 0x3ef   : > { %4255 = vst.msk [vmem:[%s6458_s23 + $0x28] sm:$0xff] %vm2902_vm1, %v4239_v63  ;;  %v3895_v11 = vpop.f32.mrf.mxu2 }
 0x3f0   : > { %v4168_v28 = vpop.f32.mrf.mxu0 }
 0x3f1   : > { %v4204_v0 = vadd.f32 %v4168_v28, %v4057_v41  ;;  %v4039_v35 = vpop.f32.mrf.mxu3  ;;  %v3748_v56 = vpop.f32.mrf.mxu1 }
 0x3f2   : > { %v4063_v63 = vadd.f32 %v4039_v35, %v3916_v18  ;;  %v3770_v28 = vadd.f32 %v3748_v56, %v6433_v13 }
 0x3f3   : > { %v4224_v55 = vadd.f32 %v6451_v62, %v4204_v0 }
 0x3f4   : > { %v3917_v14 = vadd.f32 %v3895_v11, %v3770_v28 }
 0x3f5   : > { %v4240_v1 = vmax.f32 %v4224_v55, 0.0 }
 0x3f7   : > { %4256 = vst.msk [vmem:[%s6458_s23 + $0x30] sm:$0xff] %vm2902_vm1, %v4240_v1  ;;  %v3898_v20 = vpop.f32.mrf.mxu2 }
 0x3f8   : > { %v4171_v7 = vpop.f32.mrf.mxu0 }
 0x3f9   : > { %v4205_v33 = vadd.f32 %v4171_v7, %v4058_v16  ;;  %v4042_v48 = vpop.f32.mrf.mxu3  ;;  %v3751_v55 = vpop.f32.mrf.mxu1 }
 0x3fa   : > { %v4064_v60 = vadd.f32 %v4042_v48, %v3917_v14  ;;  %v3771_v29 = vadd.f32 %v3751_v55, %v6439_v43 }
 0x3fb   : > { %v4225_v49 = vadd.f32 %v6451_v62, %v4205_v33 }
 0x3fc   : > { %v3918_v33 = vadd.f32 %v3898_v20, %v3771_v29 }
 0x3fd   : > { %v4241_v10 = vmax.f32 %v4225_v49, 0.0 }
 0x3ff   : > { %4257 = vst.msk [vmem:[%s6458_s23 + $0x38] sm:$0xff] %vm2902_vm1, %v4241_v10  ;;  %v3901_v31 = vpop.f32.mrf.mxu2 }
 0x400   : > { %v4174_v9 = vpop.f32.mrf.mxu0 }
 0x401   : > { %v4206_v47 = vadd.f32 %v4174_v9, %v4059_v46  ;;  %v4045_v16 = vpop.f32.mrf.mxu3  ;;  %v3754_v10 = vpop.f32.mrf.mxu1 }
 0x402   : > { %v4065_v15 = vadd.f32 %v4045_v16, %v3918_v33  ;;  %v3772_v46 = vadd.f32 %v3754_v10, %v6444_v32 }
 0x403   : > { %v4226_v59 = vadd.f32 %v6451_v62, %v4206_v47 }
 0x404   : > { %v3919_v47 = vadd.f32 %v3901_v31, %v3772_v46 }
 0x405   : > { %v4242_v37 = vmax.f32 %v4226_v59, 0.0 }
 0x407   : > { %4258 = vst.msk [vmem:[%s6458_s23 + $0x40] sm:$0xff] %vm2902_vm1, %v4242_v37 }
 0x408   : > { %v4177_v54 = vpop.f32.mrf.mxu0 }
 0x409   : > { %v4207_v4 = vadd.f32 %v4177_v54, %v4060_v40  ;;  %v4048_v9 = vpop.f32.mrf.mxu3 }
 0x40a   : > { %v4066_v58 = vadd.f32 %v4048_v9, %v3919_v47 }
 0x40b   : > { %v4227_v39 = vadd.f32 %v6451_v62, %v4207_v4 }
 0x40d   : > { %v4243_v61 = vmax.f32 %v4227_v39, 0.0 }
 0x40f   : > { %4259 = vst.msk [vmem:[%s6458_s23 + $0x48] sm:$0xff] %vm2902_vm1, %v4243_v61 }
 0x410   : > { %v4180_v5 = vpop.f32.mrf.mxu0 }
 0x411   : > { %v4208_v30 = vadd.f32 %v4180_v5, %v4061_v26 }
 0x413   : > { %v4228_v21 = vadd.f32 %v6451_v62, %v4208_v30 }
 0x415   : > { %v4244_v17 = vmax.f32 %v4228_v21, 0.0 }
 0x417   : > { %4260 = vst.msk [vmem:[%s6458_s23 + $0x50] sm:$0xff] %vm2902_vm1, %v4244_v17 }
 0x418   : > { %v4183_v45 = vpop.f32.mrf.mxu0 }
 0x419   : > { %v4209_v44 = vadd.f32 %v4183_v45, %v4062_v34 }
 0x41b   : > { %v4229_v8 = vadd.f32 %v6451_v62, %v4209_v44 }
 0x41d   : > { %v4245_v22 = vmax.f32 %v4229_v8, 0.0 }
 0x41f   : > { %4261 = vst.msk [vmem:[%s6458_s23 + $0x58] sm:$0xff] %vm2902_vm1, %v4245_v22 }
 0x420   : > { %v4186_v3 = vpop.f32.mrf.mxu0 }
 0x421   : > { %v4210_v41 = vadd.f32 %v4186_v3, %v4063_v63 }
 0x423   : > { %v4230_v0 = vadd.f32 %v6451_v62, %v4210_v41 }
 0x425   : > { %v4246_v6 = vmax.f32 %v4230_v0, 0.0 }
 0x427   : > { %4262 = vst.msk [vmem:[%s6458_s23 + $0x60] sm:$0xff] %vm2902_vm1, %v4246_v6 }
 0x428   : > { %v4189_v1 = vpop.f32.mrf.mxu0 }
 0x429   : > { %v4211_v12 = vadd.f32 %v4189_v1, %v4064_v60 }
 0x42b   : > { %v4231_v7 = vadd.f32 %v6451_v62, %v4211_v12 }
 0x42d   : > { %v4247_v13 = vmax.f32 %v4231_v7, 0.0 }
 0x42f   : > { %4263 = vst.msk [vmem:[%s6458_s23 + $0x68] sm:$0xff] %vm2902_vm1, %v4247_v13 }
 0x430   : > { %v4192_v49 = vpop.f32.mrf.mxu0 }
 0x431   : > { %v4212_v51 = vadd.f32 %v4192_v49, %v4065_v15 }
 0x433   : > { %v4232_v57 = vadd.f32 %v6451_v62, %v4212_v51 }
 0x435   : > { %v4248_v43 = vmax.f32 %v4232_v57, 0.0 }
 0x437   : > { %4264 = vst.msk [vmem:[%s6458_s23 + $0x70] sm:$0xff] %vm2902_vm1, %v4248_v43 }
 0x438   : > { %v4195_v38 = vpop.f32.mrf.mxu0 }
 0x439   : > { %v4213_v59 = vadd.f32 %v4195_v38, %v4066_v58 }
 0x43b   : > { %v4233_v53 = vadd.f32 %v6451_v62, %v4213_v59 }
 0x43d   : > { %v4249_v37 = vmax.f32 %v4233_v53, 0.0 }
 0x43f   : > { %4265 = vst.msk [vmem:[%s6458_s23 + $0x78] sm:$0xff] %vm2902_vm1, %v4249_v37 }
 0x440 PF: > { %s15_s18 = sadd.s32 1, %s4794_s18  }
 0x441   : > { %p12_p4 = scmp.ge.s32.totalorder %s15_s18, 4  }
 0x443   :  { %14 = sbr.rel (!%p12_p4) target bundleno = 1 (0x1), region = 93 }

</bundles_post_ra>
